<compile_context>
chip_gen: v7x
topology: tpu7x:2x2x1
jax: 0.10.0
libtpu: 0.0.40
codegen_flags: <defaults>
</compile_context>

<pallas_src>
import math

import jax
import jax.numpy as jnp
from jax.experimental import pallas as pl
from jax.experimental.pallas import tpu as pltpu


# ----------------------------- in-kernel math ---------------------------------
def _erf(z):
    # Abramowitz & Stegun 7.1.26 polynomial (max abs err ~1.5e-7), built only from ops with
    # guaranteed Mosaic lowerings (abs / exp / mul / add / div / select).
    a1, a2, a3, a4, a5 = 0.254829592, -0.284496736, 1.421413741, -1.453152027, 1.061405429
    p = 0.3275911
    az = jnp.abs(z)
    t = 1.0 / (1.0 + p * az)
    poly = ((((a5 * t + a4) * t + a3) * t + a2) * t + a1) * t
    e = 1.0 - poly * jnp.exp(-az * az)
    return jnp.where(z >= 0, e, -e)


def _gelu_exact(x):
    # nn.GELU() default = exact erf formulation.
    return 0.5 * x * (1.0 + _erf(x * (1.0 / math.sqrt(2.0))))


# ----------------------------- Pallas kernel ---------------------------------
def _mlp_kernel(x_ref, w1_ref, b1_ref, w2_ref, b2_ref, o_ref):
    x = x_ref[...].astype(jnp.float32)                                   # (TM, C)
    h = jnp.dot(x, w1_ref[...], preferred_element_type=jnp.float32)      # (TM, H) on the MXU
    h = _gelu_exact(h + b1_ref[...])
    # drop(p=0.0) -> identity.  TODO(synk): wire pltpu.prng_* dropout if drop > 0 is needed.
    y = jnp.dot(h, w2_ref[...], preferred_element_type=jnp.float32)      # (TM, Cout)
    y = y + b2_ref[...]
    o_ref[...] = y.astype(o_ref.dtype)


def _round_up(a, b):
    return ((a + b - 1) // b) * b


def mlp_pallas(x, w1, b1, w2, b2, *, block_rows=256):
    """x: (..., C); w1: (C, H); b1: (1, H); w2: (H, Cout); b2: (1, Cout)."""
    *lead, C = x.shape
    H = w1.shape[1]
    Cout = w2.shape[1]

    x2 = x.reshape(-1, C)
    M = x2.shape[0]
    tm = min(block_rows, _round_up(M, 8))      # row-tile, multiple of 8 sublanes
    Mp = _round_up(M, tm)
    if Mp != M:
        x2 = jnp.pad(x2, ((0, Mp - M), (0, 0)))
    grid = (Mp // tm,)

    out = pl.pallas_call(
        _mlp_kernel,
        out_shape=jax.ShapeDtypeStruct((Mp, Cout), x.dtype),
        grid_spec=pltpu.PrefetchScalarGridSpec(
            num_scalar_prefetch=0,
            grid=grid,
            in_specs=[
                pl.BlockSpec((tm, C), lambda i: (i, 0)),        # activations: one row-tile
                pl.BlockSpec((C, H), lambda i: (0, 0)),         # fc1 weight (VMEM-resident)
                pl.BlockSpec((1, H), lambda i: (0, 0)),         # fc1 bias
                pl.BlockSpec((H, Cout), lambda i: (0, 0)),      # fc2 weight
                pl.BlockSpec((1, Cout), lambda i: (0, 0)),      # fc2 bias
            ],
            out_specs=pl.BlockSpec((tm, Cout), lambda i: (i, 0)),
        ),
        compiler_params=pltpu.CompilerParams(dimension_semantics=("parallel",)),
    )(x2, w1, b1, w2, b2)

    out = out[:M]
    return out.reshape(*lead, Cout)


# ------------------------------ JAX reference ---------------------------------
def mlp_ref(x, w1, b1, w2, b2):
    h = jax.nn.gelu(x @ w1 + b1[0], approximate=False)   # exact erf GELU, like nn.GELU()
    return h @ w2 + b2[0]


# ---------------------------------- main ---------------------------------------
if __name__ == "__main__":
    # Small transformer-MLP shapes: 8*64 = 512 tokens, in=out=128 channels, hidden=256
    # (mlp_ratio=2 style). Feature dims are multiples of 128 so every access is lane-dense;
    # 512 rows / 256-row tiles -> grid=(2,) marked "parallel" (v7x megacore friendly).
    B, N = 8, 64
    in_features = 128
    hidden_features = 256
    out_features = 128

    key = jax.random.PRNGKey(0)
    kx, k1, k2, k3, k4 = jax.random.split(key, 5)
    x = jax.random.normal(kx, (B, N, in_features), dtype=jnp.float32)

    # nn.Linear default init: U(-1/sqrt(fan_in), +1/sqrt(fan_in)) for weight and bias.
    lim1 = 1.0 / math.sqrt(in_features)
    w1 = jax.random.uniform(k1, (in_features, hidden_features), jnp.float32, -lim1, lim1)
    b1 = jax.random.uniform(k2, (1, hidden_features), jnp.float32, -lim1, lim1)
    lim2 = 1.0 / math.sqrt(hidden_features)
    w2 = jax.random.uniform(k3, (hidden_features, out_features), jnp.float32, -lim2, lim2)
    b2 = jax.random.uniform(k4, (1, out_features), jnp.float32, -lim2, lim2)

    out = jax.block_until_ready(mlp_pallas(x, w1, b1, w2, b2))
    ref = jax.block_until_ready(mlp_ref(x, w1, b1, w2, b2))

    if not jnp.allclose(out, ref, atol=2e-4, rtol=2e-4):
        max_err = float(jnp.max(jnp.abs(out - ref)))
        raise AssertionError(f"mismatch vs reference, max abs err = {max_err}")

    print("KERNEL_OK")
</pallas_src>

<mosaic_0001>
module attributes {stable_mosaic.version = 11 : i64} {
  func.func @_mlp_kernel(%arg0: i32, %arg1: memref<256x128xf32, #tpu.memory_space<vmem>>, %arg2: memref<128x256xf32, #tpu.memory_space<vmem>>, %arg3: memref<1x256xf32, #tpu.memory_space<vmem>>, %arg4: memref<256x128xf32, #tpu.memory_space<vmem>>, %arg5: memref<1x128xf32, #tpu.memory_space<vmem>>, %arg6: memref<256x128xf32, #tpu.memory_space<vmem>>) attributes {dimension_semantics = [#tpu.dimension_semantics<parallel>], iteration_bounds = array<i64: 2>, scalar_prefetch = 0 : i64, scratch_operands = 0 : i64, tpu.core_type = #tpu.core_type<tc>, window_params = [{transform_indices = @transform_0, window_bounds = array<i64: 256, 128>}, {pipeline_mode = #tpu.pipeline_mode<synchronous>, transform_indices = @transform_1, window_bounds = array<i64: 128, 256>}, {pipeline_mode = #tpu.pipeline_mode<synchronous>, transform_indices = @transform_2, window_bounds = array<i64: 1, 256>}, {pipeline_mode = #tpu.pipeline_mode<synchronous>, transform_indices = @transform_3, window_bounds = array<i64: 256, 128>}, {pipeline_mode = #tpu.pipeline_mode<synchronous>, transform_indices = @transform_4, window_bounds = array<i64: 1, 128>}, {transform_indices = @transform_5, window_bounds = array<i64: 256, 128>}]} {
    %c0 = arith.constant 0 : index
    %c0_0 = arith.constant 0 : index
    %0 = vector.load %arg1[%c0, %c0_0] : memref<256x128xf32, #tpu.memory_space<vmem>>, vector<256x128xf32>
    %c0_1 = arith.constant 0 : index
    %c0_2 = arith.constant 0 : index
    %1 = vector.load %arg2[%c0_1, %c0_2] : memref<128x256xf32, #tpu.memory_space<vmem>>, vector<128x256xf32>
    %cst = arith.constant dense<0.000000e+00> : vector<256x256xf32>
    %2 = tpu.matmul %0, %1, %cst {dimension_numbers = #tpu.dot_dimension_numbers<[1], [0], [0], [1], [0, 0, 1, 1], [], []>} : vector<256x128xf32>, vector<128x256xf32>, vector<256x256xf32> -> vector<256x256xf32>
    %c0_3 = arith.constant 0 : index
    %c0_4 = arith.constant 0 : index
    %3 = vector.load %arg3[%c0_3, %c0_4] : memref<1x256xf32, #tpu.memory_space<vmem>>, vector<1x256xf32>
    %4 = vector.broadcast %3 : vector<1x256xf32> to vector<256x256xf32>
    %5 = arith.addf %2, %4 : vector<256x256xf32>
    %cst_5 = arith.constant 5.000000e-01 : f32
    %6 = vector.broadcast %cst_5 : f32 to vector<256x256xf32>
    %7 = arith.mulf %6, %5 : vector<256x256xf32>
    %cst_6 = arith.constant 0.707106769 : f32
    %8 = vector.broadcast %cst_6 : f32 to vector<256x256xf32>
    %9 = arith.mulf %5, %8 : vector<256x256xf32>
    %10 = math.absf %9 : vector<256x256xf32>
    %cst_7 = arith.constant 0.327591091 : f32
    %11 = vector.broadcast %cst_7 : f32 to vector<256x256xf32>
    %12 = arith.mulf %11, %10 : vector<256x256xf32>
    %cst_8 = arith.constant 1.000000e+00 : f32
    %13 = vector.broadcast %cst_8 : f32 to vector<256x256xf32>
    %14 = arith.addf %13, %12 : vector<256x256xf32>
    %cst_9 = arith.constant 1.000000e+00 : f32
    %15 = vector.broadcast %cst_9 : f32 to vector<256x256xf32>
    %16 = arith.divf %15, %14 : vector<256x256xf32>
    %cst_10 = arith.constant 1.06140542 : f32
    %17 = vector.broadcast %cst_10 : f32 to vector<256x256xf32>
    %18 = arith.mulf %17, %16 : vector<256x256xf32>
    %cst_11 = arith.constant -1.45315206 : f32
    %19 = vector.broadcast %cst_11 : f32 to vector<256x256xf32>
    %20 = arith.addf %18, %19 : vector<256x256xf32>
    %21 = arith.mulf %20, %16 : vector<256x256xf32>
    %cst_12 = arith.constant 1.42141378 : f32
    %22 = vector.broadcast %cst_12 : f32 to vector<256x256xf32>
    %23 = arith.addf %21, %22 : vector<256x256xf32>
    %24 = arith.mulf %23, %16 : vector<256x256xf32>
    %cst_13 = arith.constant -0.284496725 : f32
    %25 = vector.broadcast %cst_13 : f32 to vector<256x256xf32>
    %26 = arith.addf %24, %25 : vector<256x256xf32>
    %27 = arith.mulf %26, %16 : vector<256x256xf32>
    %cst_14 = arith.constant 0.254829586 : f32
    %28 = vector.broadcast %cst_14 : f32 to vector<256x256xf32>
    %29 = arith.addf %27, %28 : vector<256x256xf32>
    %30 = arith.mulf %29, %16 : vector<256x256xf32>
    %cst_15 = arith.constant 0.000000e+00 : f32
    %31 = vector.broadcast %cst_15 : f32 to vector<256x256xf32>
    %32 = arith.subf %31, %10 : vector<256x256xf32>
    %33 = arith.mulf %32, %10 : vector<256x256xf32>
    %34 = math.exp %33 : vector<256x256xf32>
    %35 = arith.mulf %30, %34 : vector<256x256xf32>
    %cst_16 = arith.constant 1.000000e+00 : f32
    %36 = vector.broadcast %cst_16 : f32 to vector<256x256xf32>
    %37 = arith.subf %36, %35 : vector<256x256xf32>
    %cst_17 = arith.constant 0.000000e+00 : f32
    %38 = vector.broadcast %cst_17 : f32 to vector<256x256xf32>
    %39 = arith.cmpf oge, %9, %38 : vector<256x256xf32>
    %cst_18 = arith.constant 0.000000e+00 : f32
    %40 = vector.broadcast %cst_18 : f32 to vector<256x256xf32>
    %41 = arith.subf %40, %37 : vector<256x256xf32>
    %42 = arith.select %39, %37, %41 : vector<256x256xi1>, vector<256x256xf32>
    %cst_19 = arith.constant 1.000000e+00 : f32
    %43 = vector.broadcast %cst_19 : f32 to vector<256x256xf32>
    %44 = arith.addf %43, %42 : vector<256x256xf32>
    %45 = arith.mulf %7, %44 : vector<256x256xf32>
    %c0_20 = arith.constant 0 : index
    %c0_21 = arith.constant 0 : index
    %46 = vector.load %arg4[%c0_20, %c0_21] : memref<256x128xf32, #tpu.memory_space<vmem>>, vector<256x128xf32>
    %cst_22 = arith.constant dense<0.000000e+00> : vector<256x128xf32>
    %47 = tpu.matmul %45, %46, %cst_22 {dimension_numbers = #tpu.dot_dimension_numbers<[1], [0], [0], [1], [0, 0, 1, 1], [], []>} : vector<256x256xf32>, vector<256x128xf32>, vector<256x128xf32> -> vector<256x128xf32>
    %c0_23 = arith.constant 0 : index
    %c0_24 = arith.constant 0 : index
    %48 = vector.load %arg5[%c0_23, %c0_24] : memref<1x128xf32, #tpu.memory_space<vmem>>, vector<1x128xf32>
    %49 = vector.broadcast %48 : vector<1x128xf32> to vector<256x128xf32>
    %50 = arith.addf %47, %49 : vector<256x128xf32>
    %c0_25 = arith.constant 0 : index
    %c0_26 = arith.constant 0 : index
    %51 = vector.load %arg6[%c0_25, %c0_26] : memref<256x128xf32, #tpu.memory_space<vmem>>, vector<256x128xf32>
    tpu.vector_store %arg6[%c0_25, %c0_26], %50 {strides = array<i32>} : memref<256x128xf32, #tpu.memory_space<vmem>>, vector<256x128xf32>,
    return
  }
  func.func @transform_0(%arg0: i32) -> (i32, i32) {
    %c0_i32 = arith.constant 0 : i32
    %c0_i32_0 = arith.constant 0 : i32
    return %arg0, %c0_i32 : i32, i32
  }
  func.func @transform_1(%arg0: i32) -> (i32, i32) {
    %c0_i32 = arith.constant 0 : i32
    %c0_i32_0 = arith.constant 0 : i32
    %c0_i32_1 = arith.constant 0 : i32
    return %c0_i32, %c0_i32_0 : i32, i32
  }
  func.func @transform_2(%arg0: i32) -> (i32, i32) {
    %c0_i32 = arith.constant 0 : i32
    %c0_i32_0 = arith.constant 0 : i32
    %c0_i32_1 = arith.constant 0 : i32
    return %c0_i32, %c0_i32_0 : i32, i32
  }
  func.func @transform_3(%arg0: i32) -> (i32, i32) {
    %c0_i32 = arith.constant 0 : i32
    %c0_i32_0 = arith.constant 0 : i32
    %c0_i32_1 = arith.constant 0 : i32
    return %c0_i32, %c0_i32_0 : i32, i32
  }
  func.func @transform_4(%arg0: i32) -> (i32, i32) {
    %c0_i32 = arith.constant 0 : i32
    %c0_i32_0 = arith.constant 0 : i32
    %c0_i32_1 = arith.constant 0 : i32
    return %c0_i32, %c0_i32_0 : i32, i32
  }
  func.func @transform_5(%arg0: i32) -> (i32, i32) {
    %c0_i32 = arith.constant 0 : i32
    %c0_i32_0 = arith.constant 0 : i32
    return %arg0, %c0_i32 : i32, i32
  }
}

</mosaic_0001>

<bundles_post_ra>
// kernel: tpu_custom_call.1
= control target key start
LH: loop header
LB: loop body
LE: loop exit
PB: predicated region body
PF: predicated region fallthrough
CT: control target
= control target key end

     0   :  { %10 = vsyncpa [#allocation3], 0  ;;  %s5467_s0 = inlined_call_operand.hbm [shape: f32[512,128], index: 0, kind: input, shape index: {}]   ;;  %s5468_s1 = inlined_call_operand.hbm [shape: f32[128,256], index: 1, kind: input, shape index: {}]   ;;  %s5469_s2 = inlined_call_operand.vmem [shape: f32[1,256], index: 2, kind: input, shape index: {}]   ;;  %s5470_s3 = inlined_call_operand.hbm [shape: f32[256,128], index: 3, kind: input, shape index: {}]   ;;  %s5471_s4 = inlined_call_operand.vmem [shape: f32[1,128], index: 4, kind: input, shape index: {}]   ;;  %s5472_s5 = inlined_call_operand.hbm [shape: f32[512,128], index: 5, kind: output, shape index: {}]  }
   0x1   :  { %12 = vsyncpa [#allocation3 + $0x1], 0 }
   0x2   :  { %13 = vsyncpa [#allocation6], 0 }
   0x3   :  { %14 = vsyncpa [#allocation4], 0 }
   0x4   :  { %16 = vsyncpa [#allocation4 + $0x1], 0  ;;  %s3402_s18 = smov 0   ;;  %s3404_s19 = smov 0  }
   0x5   :  { %s3406_s20 = smov 0   ;;  %s3408_s21 = smov 0  }
   0x6 LB: > { %s3423_s22 = sadd.s32 4294967295, %s3358_s21   ;;  %s2737_s23 = sadd.s32 4294967294, %s3358_s21   ;;  %s3358_s21 = sphi %s3408_s21, %s6001_s21   ;;  %s3354_s20 = sphi %s3406_s20, %s6000_s20   ;;  %s3350_s19 = sphi %s3404_s19, %s5999_s19   ;;  %s3346_s18 = sphi %s3402_s18, %s5998_s18  }
   0x7   : > { %p42_p0 = scmp.ne.s32.totalorder %s3350_s19, %s3346_s18  ;;  %p5473_p1 = scmp.eq.s32.totalorder %s3423_s22, 0 }
   0x8   : > { %p156_p3 = scmp.eq.s32.totalorder %s2737_s23, 1  ;;  %p2738_p5 = scmp.ge.s32.totalorder %s3358_s21, 1 }
   0x9   : > { %p3432_p4 = por %p5473_p1, %p42_p0  ;;  %p163_p7 = scmp.lt.s32.totalorder %s3358_s21, 3 }
   0xa   : > { %p3437_p6 = por %p156_p3, %p42_p0  ;;  %s3360_s27 = smov [#allocation5]  }
   0xb   : > { %s5611_s24 = scalar_select %p3432_p4, 1, 0 }
   0xc   : > { %s5612_s25 = scalar_select %p3437_p6, 1, 0 }
   0xd   : > { %p3442_p8 = pnand %p2738_p5, %p163_p7  ;;  %s175_s28 = sshll.u32 %s3360_s27, 4  ;;  %s3446_s28 = int_to_ptr.vmem [resolvable:$true] %s175_s28 }
   0xe   : > { %s3361_s30 = smov [#allocation7]   ;;  %s3202_s9 = scalar_lea.hbm %s5468_s1, 4096 }
   0xf   : > { %p2882_p9 = pneg %p3442_p8  ;;  %s191_s6 = sshll.u32 %s3361_s30, 4  ;;  %s3457_s6 = int_to_ptr.vmem [resolvable:$true] %s191_s6 }
  0x10   : > { %p3203_p12 = scmp.ne.s32.totalorder %s5468_s1, %s3202_s9  ;;  %p3209_p5 = scmp.lt.u32.totalorder %s3202_s9, %s5468_s1 }
  0x11   : > { %p3453_p11 = pnand %p2882_p9, %p5473_p1 }
  0x13   : > { %p3204_p13 = pneg %p3453_p11 }
  0x15   : > { %p3205_p0 = pnand %p3204_p13, %p3203_p12 }
  0x17   : > { %p3206_p3 = pneg %p3205_p0 }
  0x19   : > { %p3211_p7 = pnand %p3209_p5, %p3206_p3 }
  0x1b   : > { %3214 = shalt.err (!%p3211_p7)
}
  0x1c   : > { %s3215_s14 = scalar_lea.vmem %s3446_s28, 4096  ;;  %p3223_p2 = scmp.lt.s32.totalorder %s3446_s28, %s3446_s28 }
  0x1d   : > { %p3216_p9 = scmp.ne.s32.totalorder %s3446_s28, %s3215_s14  ;;  %p3224_p12 = scmp.lt.s32.totalorder %s3215_s14, %s3215_s14 }
  0x1f   : > { %p3218_p10 = pnand %p3216_p9, %p3204_p13  ;;  %p3225_p0 = por %p3224_p12, %p3223_p2 }
  0x21   : > { %p3219_p1 = pneg %p3218_p10 }
  0x23   : > { %p3226_p6 = pnand %p3225_p0, %p3219_p1 }
  0x25   : > { %3229 = shalt.err (!%p3226_p6)
}
  0x26   : > { %s3362_s15 = smov 256   ;;  %s3363_s16 = smov 16  }
  0x27   : > { %2885 = dma.hbm_to_vmem [thread:$0]  (!%p3453_p11), %s5468_s1, 4096, %s3446_s28, [#allocation6], %s3362_s15, %s3362_s15, %s3363_s16  }
  0x28   : > { %s3230_s7 = scalar_lea.hbm %s5470_s3, 4096 }
  0x29   : > { %p3231_p2 = scmp.ne.s32.totalorder %s5470_s3, %s3230_s7  ;;  %p3237_p10 = scmp.lt.u32.totalorder %s3230_s7, %s5470_s3 }
  0x2b   : > { %p3233_p1 = pnand %p3231_p2, %p3204_p13 }
  0x2d   : > { %p3234_p6 = pneg %p3233_p1 }
  0x2f   : > { %p3239_p3 = pnand %p3237_p10, %p3234_p6 }
  0x31   : > { %3242 = shalt.err (!%p3239_p3)
}
  0x32   : > { %s3243_s28 = scalar_lea.vmem %s3457_s6, 4096  ;;  %p3251_p12 = scmp.lt.s32.totalorder %s3457_s6, %s3457_s6 }
  0x33   : > { %p3244_p5 = scmp.ne.s32.totalorder %s3457_s6, %s3243_s28  ;;  %p3252_p0 = scmp.lt.s32.totalorder %s3243_s28, %s3243_s28 }
  0x35   : > { %p3246_p7 = pnand %p3244_p5, %p3204_p13  ;;  %p3253_p2 = por %p3252_p0, %p3251_p12 }
  0x37   : > { %p3247_p9 = pneg %p3246_p7 }
  0x39   : > { %p3254_p1 = pnand %p3253_p2, %p3247_p9 }
  0x3b   : > { %3257 = shalt.err (!%p3254_p1)
}
  0x3c   : > { %s3364_s12 = smov 128   ;;  %s3365_s13 = smov 8  }
  0x3d   : > { %2888 = dma.hbm_to_vmem [thread:$0]  (!%p3453_p11), %s5470_s3, 4096, %s3457_s6, [#allocation6], %s3364_s12, %s3364_s12, %s3365_s13  }
  0x3e   : > { %s3515_s16 = sadd.s32 1, %s3358_s21   ;;  %s29_s23 = sadd.s32 1, %s3354_s20 }
  0x3f   : > { %s26_s17 = ssub.s32 %s3358_s21, %s3515_s16  ;;  %p36_p6 = scmp.ne.s32.totalorder %s3354_s20, %s3350_s19 }
  0x40   : > { %p27_p13 = scmp.eq.s32.totalorder %s26_s17, 0  ;;  %p37_p10 = scmp.eq.s32.totalorder %s3358_s21, 0 }
  0x41   : > { %p5615_p5 = scmp.eq.s32.totalorder %s3423_s22, 1  ;;  %p2899_p9 = scmp.lt.s32.totalorder %s3358_s21, 2 }
  0x42   : > { %s3524_s27 = scalar_select %p27_p13, %s3354_s20, %s29_s23  }
  0x43   : > { %p38_p3 = por %p37_p10, %p36_p6  ;;  %p3528_p7 = por %p5615_p5, %p36_p6 }
  0x44   : > { %s208_s30 = sand.u32 1, %s3354_s20   ;;  %s2756_s6 = sshll.u32 %s3358_s21, 12 }
  0x45   : > { %s5616_s29 = scalar_select %p3528_p7, 1, 0 }
  0x46   : > { %s2742_s7 = sshll.u32 %s208_s30, 8  ;;  %s3538_s10 = scalar_lea.hbm %s5467_s0, %s2756_s6 }
  0x47   : > { %s212_s11 = scalar_lea.vmem [#allocation2], %s2742_s7  ;;  %p3542_p11 = pnand %p2899_p9, %p38_p3 }
  0x48   : > { %s219_s28 = sshll.u32 %s212_s11, 4  ;;  %s3546_s15 = scalar_lea.sflag [#allocation3], %s208_s30  ;;  %s3540_s28 = int_to_ptr.vmem [resolvable:$true] %s219_s28 }
  0x49   : > { %s3258_s17 = scalar_lea.hbm %s3538_s10, 4096  ;;  %p3260_p0 = pneg %p3542_p11 }
  0x4a   : > { %p3259_p12 = scmp.ne.s32.totalorder %s3538_s10, %s3258_s17  ;;  %s3263_s6 = scalar_lea.hbm %s5467_s0, 8192 }
  0x4b   : > { %p3264_p13 = scmp.lt.u32.totalorder %s3538_s10, %s5467_s0  ;;  %p3265_p6 = scmp.lt.u32.totalorder %s3263_s6, %s3258_s17 }
  0x4c   : > { %p3261_p2 = pnand %p3260_p0, %p3259_p12  ;;  %p3267_p3 = scmp.lt.u32.totalorder %s3258_s17, %s3538_s10 }
  0x4d   : > { %p3266_p10 = por %p3265_p6, %p3264_p13 }
  0x4e   : > { %p3262_p1 = pneg %p3261_p2 }
  0x4f   : > { %p3268_p5 = por %p3267_p3, %p3266_p10 }
  0x51   : > { %p3269_p9 = pnand %p3268_p5, %p3262_p1 }
  0x53   : > { %3272 = shalt.err (!%p3269_p9)
}
  0x54   : > { %s3273_s30 = scalar_lea.vmem %s3540_s28, 4096  ;;  %s3366_s11 = smov [#allocation2]  }
  0x55   : > { %p3274_p12 = scmp.ne.s32.totalorder %s3540_s28, %s3273_s30  ;;  %s3278_s23 = sshll.u32 %s3366_s11, 4  ;;  %s3279_s23 = int_to_ptr.vmem [resolvable:$false] %s3278_s23 }
  0x56   : > { %s3280_s7 = scalar_lea.vmem %s3279_s23, 8192  ;;  %p3281_p4 = scmp.lt.s32.totalorder %s3540_s28, %s3279_s23 }
  0x57   : > { %p3276_p2 = pnand %p3274_p12, %p3260_p0  ;;  %p3282_p13 = scmp.lt.s32.totalorder %s3280_s7, %s3273_s30 }
  0x59   : > { %p3277_p7 = pneg %p3276_p2  ;;  %p3283_p6 = por %p3282_p13, %p3281_p4 }
  0x5b   : > { %p3284_p10 = pnand %p3283_p6, %p3277_p7 }
  0x5d   : > { %3287 = shalt.err (!%p3284_p10)
}
  0x5e   : > { %2892 = dma.hbm_to_vmem [thread:$0]  (!%p3542_p11), %s3538_s10, 4096, %s3540_s28, %s3546_s15, %s3364_s12, %s3364_s12, %s3365_s13  }
  0x5f   : > { %231 = sbr.rel (%p3442_p8) target bundleno = 1043 (0x413), region = 40 }
  0x66   : > { %s3580_s17 = sand.u32 1, %s3350_s19   ;;  %p5618_p4 = scmp.ne.s32.totalorder %s5611_s24, 0 }
  0x67   : > { %s2746_s6 = sshll.u32 %s3580_s17, 8  ;;  %s234_s8 = scalar_lea.sflag [#allocation3], %s3580_s17 }
  0x68   : > { %s3586_s14 = scalar_lea.vmem [#allocation2], %s2746_s6 }
  0x69   : > { %3333 = dma.done.wait (%p5618_p4), %s234_s8, 4096  }
  0x6a   : > { %3335 = vsyncadd (%p5618_p4), %s234_s8, 4294963200  ;;  %p5619_p7 = scmp.eq.s32.totalorder %s3423_s22, 0 }
  0x6c   : > { %3337 = dma.done.wait (%p5619_p7), [#allocation6], 8192   ;;  %p5620_p8 = pmov %p5619_p7 }
  0x6d   : > { %v3367_v0 = vmov 0.0   ;;  %v307_v1 = vld [vmem:[#allocation5 + $0x8] sm:$0xff]  ;;  %v309_v2 = vld [vmem:[#allocation5 + $0x18] sm:$0xff]  ;;  %v306_v3 = vld [vmem:[#allocation5] sm:$0xff]  ;;  %v3368_v53 = vmov 0.0|0.0   ;;  %s5045_s10 = scalar_lea.vmem [#allocation8], %s2746_s6 }
  0x6e   : > { %3339 = vsyncadd (%p5620_p8), [#allocation6], 4294959104  ;;  %414 = vmatprep.mubr.f32.mxu0 %v3367_v0  ;;  %v2758_v4 = vpack.c.bf16 %v309_v2, %v307_v1  ;;  %v308_v5 = vld [vmem:[#allocation5 + $0x10] sm:$0xff]  ;;  %v311_v6 = vld [vmem:[#allocation5 + $0x28] sm:$0xff]  ;;  %2838 = vmatprep.subr.bf16.mxu1 %v3368_v53  ;;  %s2757_s9 = sshll.u32 %s3423_s22, 12  ;;  %s2645_s30 = sshll.u32 %s5045_s10, 4  ;;  %s5421_s30 = int_to_ptr.vmem [resolvable:$true] %s2645_s30 }
  0x6f   : > { %v313_v7 = vld [vmem:[#allocation5 + $0x38] sm:$0xff]  ;;  %v2760_v8 = vpack.c.bf16 %v308_v5, %v306_v3  ;;  %v310_v10 = vld [vmem:[#allocation5 + $0x20] sm:$0xff]  ;;  %v312_v11 = vld [vmem:[#allocation5 + $0x30] sm:$0xff]  ;;  %s5419_s7 = scalar_lea.hbm %s5472_s5, %s2757_s9  ;;  %s2632_s6 = scalar_lea.sflag [#allocation4], %s3580_s17 }
  0x70   : > { %v2762_v9 = vpack.c.bf16 %v313_v7, %v311_v6  ;;  %v315_v12 = vld [vmem:[#allocation5 + $0x48] sm:$0xff]  ;;  %2759 = vmatprep.subr.bf16.mxu0 %v2758_v4  ;;  %v317_v13 = vld [vmem:[#allocation5 + $0x58] sm:$0xff]  ;;  %v2764_v14 = vpack.c.bf16 %v312_v11, %v310_v10  ;;  %v314_v16 = vld [vmem:[#allocation5 + $0x40] sm:$0xff]  ;;  %s3288_s8 = scalar_lea.vmem %s5421_s30, 4096  ;;  %p5995_p0 = scmp.ne.s32.totalorder %s5616_s29, 0 }
  0x71   : > { %2761 = vmatpush1.bf16.msra.mxu0 %v2760_v8  ;;  %v2766_v15 = vpack.c.bf16 %v317_v13, %v315_v12  ;;  %v316_v17 = vld [vmem:[#allocation5 + $0x50] sm:$0xff]  ;;  %v319_v18 = vld [vmem:[#allocation5 + $0x68] sm:$0xff]  ;;  %v321_v19 = vld [vmem:[#allocation5 + $0x78] sm:$0xff]  ;;  %p3289_p11 = scmp.ne.s32.totalorder %s5421_s30, %s3288_s8  ;;  %s3369_s22 = smov [#allocation8]  }
  0x72   : > { %2763 = vmatprep.subr.bf16.mxu0 %v2762_v9  ;;  %v2768_v20 = vpack.c.bf16 %v316_v17, %v314_v16  ;;  %v2770_v21 = vpack.c.bf16 %v321_v19, %v319_v18  ;;  %v318_v22 = vld [vmem:[#allocation5 + $0x60] sm:$0xff]  ;;  %v320_v23 = vld [vmem:[#allocation5 + $0x70] sm:$0xff]  ;;  %v323_v24 = vld [vmem:[#allocation5 + $0x88] sm:$0xff] }
  0x73   : > { %v325_v25 = vld [vmem:[#allocation5 + $0x98] sm:$0xff]  ;;  %v2772_v26 = vpack.c.bf16 %v320_v23, %v318_v22  ;;  %v322_v28 = vld [vmem:[#allocation5 + $0x80] sm:$0xff]  ;;  %v324_v29 = vld [vmem:[#allocation5 + $0x90] sm:$0xff]  ;;  %p3290_p1 = pnand %p3289_p11, %p5995_p0 }
  0x74   : > { %v2774_v27 = vpack.c.bf16 %v325_v25, %v323_v24  ;;  %v327_v30 = vld [vmem:[#allocation5 + $0xa8] sm:$0xff]  ;;  %v329_v31 = vld [vmem:[#allocation5 + $0xb8] sm:$0xff]  ;;  %v2776_v32 = vpack.c.bf16 %v324_v29, %v322_v28  ;;  %v326_v34 = vld [vmem:[#allocation5 + $0xa0] sm:$0xff] }
  0x75   : > { %2765 = vmatpush1.bf16.msra.mxu0 %v2764_v14  ;;  %v2778_v33 = vpack.c.bf16 %v329_v31, %v327_v30  ;;  %v328_v35 = vld [vmem:[#allocation5 + $0xb0] sm:$0xff]  ;;  %v331_v36 = vld [vmem:[#allocation5 + $0xc8] sm:$0xff]  ;;  %v333_v37 = vld [vmem:[#allocation5 + $0xd8] sm:$0xff]  ;;  %p3291_p3 = pneg %p3290_p1 }
  0x76   : > { %2767 = vmatprep.subr.bf16.mxu0 %v2766_v15  ;;  %v2780_v38 = vpack.c.bf16 %v328_v35, %v326_v34  ;;  %v2782_v39 = vpack.c.bf16 %v333_v37, %v331_v36  ;;  %v330_v40 = vld [vmem:[#allocation5 + $0xc0] sm:$0xff]  ;;  %v332_v41 = vld [vmem:[#allocation5 + $0xd0] sm:$0xff]  ;;  %v335_v42 = vld [vmem:[#allocation5 + $0xe8] sm:$0xff] }
  0x77   : > { %v337_v43 = vld [vmem:[#allocation5 + $0xf8] sm:$0xff]  ;;  %v2784_v44 = vpack.c.bf16 %v332_v41, %v330_v40  ;;  %v334_v46 = vld [vmem:[#allocation5 + $0xe0] sm:$0xff]  ;;  %v336_v47 = vld [vmem:[#allocation5 + $0xf0] sm:$0xff] }
  0x78   : > { %v2786_v45 = vpack.c.bf16 %v337_v43, %v335_v42  ;;  %v2788_v48 = vpack.c.bf16 %v336_v47, %v334_v46  ;;  %v2335_v49 = vld [vmem:[#allocation7] sm:$0xff]  ;;  %v2336_v50 = vld [vmem:[#allocation7 + $0x8] sm:$0xff]  ;;  %v2337_v54 = vld [vmem:[#allocation7 + $0x10] sm:$0xff] }
  0x79   : > { %2769 = vmatpush1.bf16.msra.mxu0 %v2768_v20  ;;  %v274_v51 = vld [vmem:[%s3586_s14] sm:$0xff]  ;;  %v2791_v52 = vpack.c.bf16 %v2336_v50, %v2335_v49  ;;  %v2338_v55 = vld [vmem:[#allocation7 + $0x18] sm:$0xff]  ;;  %v275_v56 = vld [vmem:[%s3586_s14 + $0x8] sm:$0xff] }
  0x7a   : > { %2771 = vmatprep.subr.bf16.mxu0 %v2770_v21  ;;  %v2794_v57 = vpack.c.bf16 %v2338_v55, %v2337_v54  ;;  %v2339_v58 = vld [vmem:[#allocation7 + $0x20] sm:$0xff]  ;;  %v2340_v59 = vld [vmem:[#allocation7 + $0x28] sm:$0xff]  ;;  %v276_v60 = vld [vmem:[%s3586_s14 + $0x10] sm:$0xff] }
  0x7b   : > { %2854 = vmatpush1.bf16.msra.mxu1 %v2791_v52  ;;  %v2797_v61 = vpack.c.bf16 %v2340_v59, %v2339_v58  ;;  %v277_v62 = vld [vmem:[%s3586_s14 + $0x18] sm:$0xff]  ;;  %v278_v63 = vld [vmem:[%s3586_s14 + $0x20] sm:$0xff]  ;;  %v279_v1 = vld [vmem:[%s3586_s14 + $0x28] sm:$0xff] }
  0x7c   : > { %2839 = vmatprep.subr.bf16.mxu1 %v3368_v53  ;;  %v280_v2 = vld [vmem:[%s3586_s14 + $0x30] sm:$0xff]  ;;  %v281_v3 = vld [vmem:[%s3586_s14 + $0x38] sm:$0xff]  ;;  %v282_v4 = vld [vmem:[%s3586_s14 + $0x40] sm:$0xff] }
  0x7d   : > { %2773 = vmatpush1.bf16.msra.mxu0 %v2772_v26  ;;  %v283_v5 = vld [vmem:[%s3586_s14 + $0x48] sm:$0xff]  ;;  %v284_v6 = vld [vmem:[%s3586_s14 + $0x50] sm:$0xff]  ;;  %v285_v7 = vld [vmem:[%s3586_s14 + $0x58] sm:$0xff] }
  0x7e   : > { %2775 = vmatprep.subr.bf16.mxu0 %v2774_v27  ;;  %v286_v8 = vld [vmem:[%s3586_s14 + $0x60] sm:$0xff]  ;;  %v287_v9 = vld [vmem:[%s3586_s14 + $0x68] sm:$0xff]  ;;  %v288_v10 = vld [vmem:[%s3586_s14 + $0x70] sm:$0xff] }
  0x7f   : > { %2855 = vmatpush1.bf16.msra.mxu1 %v2794_v57  ;;  %v289_v11 = vld [vmem:[%s3586_s14 + $0x78] sm:$0xff]  ;;  %v290_v12 = vld [vmem:[%s3586_s14 + $0x80] sm:$0xff]  ;;  %v291_v13 = vld [vmem:[%s3586_s14 + $0x88] sm:$0xff] }
  0x80   : > { %2840 = vmatprep.subr.bf16.mxu1 %v3368_v53  ;;  %v292_v14 = vld [vmem:[%s3586_s14 + $0x90] sm:$0xff]  ;;  %v293_v15 = vld [vmem:[%s3586_s14 + $0x98] sm:$0xff]  ;;  %v294_v16 = vld [vmem:[%s3586_s14 + $0xa0] sm:$0xff] }
  0x81   : > { %2777 = vmatpush1.bf16.msra.mxu0 %v2776_v32  ;;  %v295_v17 = vld [vmem:[%s3586_s14 + $0xa8] sm:$0xff]  ;;  %v2341_v18 = vld [vmem:[#allocation7 + $0x30] sm:$0xff]  ;;  %v2342_v19 = vld [vmem:[#allocation7 + $0x38] sm:$0xff] }
  0x82   : > { %2779 = vmatprep.subr.bf16.mxu0 %v2778_v33  ;;  %v2800_v20 = vpack.c.bf16 %v2342_v19, %v2341_v18  ;;  %v296_v21 = vld [vmem:[%s3586_s14 + $0xb0] sm:$0xff]  ;;  %v2343_v22 = vld [vmem:[#allocation7 + $0x40] sm:$0xff]  ;;  %v2344_v23 = vld [vmem:[#allocation7 + $0x48] sm:$0xff] }
  0x83   : > { %2856 = vmatpush1.bf16.msra.mxu1 %v2797_v61  ;;  %v2803_v24 = vpack.c.bf16 %v2344_v23, %v2343_v22  ;;  %v297_v25 = vld [vmem:[%s3586_s14 + $0xb8] sm:$0xff]  ;;  %v298_v26 = vld [vmem:[%s3586_s14 + $0xc0] sm:$0xff]  ;;  %v2345_v27 = vld [vmem:[#allocation7 + $0x50] sm:$0xff] }
  0x84   : > { %2841 = vmatprep.subr.bf16.mxu1 %v3368_v53  ;;  %v2346_v28 = vld [vmem:[#allocation7 + $0x58] sm:$0xff]  ;;  %v299_v30 = vld [vmem:[%s3586_s14 + $0xc8] sm:$0xff]  ;;  %v300_v31 = vld [vmem:[%s3586_s14 + $0xd0] sm:$0xff] }
  0x85   : > { %2781 = vmatpush1.bf16.msra.mxu0 %v2780_v38  ;;  %v2806_v29 = vpack.c.bf16 %v2346_v28, %v2345_v27  ;;  %v2347_v32 = vld [vmem:[#allocation7 + $0x60] sm:$0xff]  ;;  %v2348_v33 = vld [vmem:[#allocation7 + $0x68] sm:$0xff]  ;;  %v301_v35 = vld [vmem:[%s3586_s14 + $0xd8] sm:$0xff] }
  0x86   : > { %2783 = vmatprep.subr.bf16.mxu0 %v2782_v39  ;;  %v2809_v34 = vpack.c.bf16 %v2348_v33, %v2347_v32  ;;  %v2349_v36 = vld [vmem:[#allocation7 + $0x70] sm:$0xff]  ;;  %v2350_v37 = vld [vmem:[#allocation7 + $0x78] sm:$0xff]  ;;  %v302_v38 = vld [vmem:[%s3586_s14 + $0xe0] sm:$0xff] }
  0x87   : > { %2857 = vmatpush1.bf16.msra.mxu1 %v2800_v20  ;;  %v2812_v39 = vpack.c.bf16 %v2350_v37, %v2349_v36  ;;  %v303_v40 = vld [vmem:[%s3586_s14 + $0xe8] sm:$0xff]  ;;  %v2351_v41 = vld [vmem:[#allocation7 + $0x80] sm:$0xff]  ;;  %v2353_v46 = vld [vmem:[#allocation7 + $0x90] sm:$0xff] }
  0x88   : > { %2842 = vmatprep.subr.bf16.mxu1 %v3368_v53  ;;  %v2352_v42 = vld [vmem:[#allocation7 + $0x88] sm:$0xff]  ;;  %v2354_v47 = vld [vmem:[#allocation7 + $0x98] sm:$0xff]  ;;  %v2355_v49 = vld [vmem:[#allocation7 + $0xa0] sm:$0xff] }
  0x89   : > { %2785 = vmatpush1.bf16.msra.mxu0 %v2784_v44  ;;  %v2815_v43 = vpack.c.bf16 %v2352_v42, %v2351_v41  ;;  %v304_v44 = vld [vmem:[%s3586_s14 + $0xf0] sm:$0xff]  ;;  %v2356_v50 = vld [vmem:[#allocation7 + $0xa8] sm:$0xff]  ;;  %v2359_v55 = vld [vmem:[#allocation7 + $0xc0] sm:$0xff] }
  0x8a   : > { %2787 = vmatprep.subr.bf16.mxu0 %v2786_v45  ;;  %v305_v45 = vld [vmem:[%s3586_s14 + $0xf8] sm:$0xff]  ;;  %v2361_v58 = vld [vmem:[#allocation7 + $0xd0] sm:$0xff]  ;;  %s3292_s14 = sshll.u32 %s3369_s22, 4  ;;  %s3293_s14 = int_to_ptr.vmem [resolvable:$false] %s3292_s14 }
  0x8b   : > { %2858 = vmatpush1.bf16.msra.mxu1 %v2803_v24  ;;  %v2362_v59 = vld [vmem:[#allocation7 + $0xd8] sm:$0xff]  ;;  %s3294_s24 = scalar_lea.vmem %s3293_s14, 8192  ;;  %p3295_p5 = scmp.lt.s32.totalorder %s5421_s30, %s3293_s14 }
  0x8c   : > { %2843 = vmatprep.subr.bf16.mxu1 %v3368_v53  ;;  %p3296_p9 = scmp.lt.s32.totalorder %s3294_s24, %s3288_s8 }
  0x8d   : > { %2789 = vmatpush1.bf16.msra.mxu0 %v2788_v48  ;;  %v2818_v48 = vpack.c.bf16 %v2354_v47, %v2353_v46 }
  0x8e   : > { %2790 = vmatprep.subr.bf16.mxu0 %v3368_v53  ;;  %p3297_p12 = por %p3296_p9, %p3295_p5 }
  0x8f   : > { %2859 = vmatpush1.bf16.msra.mxu1 %v2806_v29 }
  0x90   : > { %415 = vmatmul.mubr.f32.vlgmr.msra.gmra.mrb[0].mxu0 %v274_v51  ;;  %2844 = vmatprep.subr.bf16.mxu1 %v3368_v53  ;;  %v2821_v51 = vpack.c.bf16 %v2356_v50, %v2355_v49  ;;  %p3298_p2 = pnand %p3297_p12, %p3291_p3 }
  0x91   : > { %420 = vmatprep.mubr.f32.mxu0 %v3367_v0  ;;  %2792 = vmatpush1.bf16.msra.mxu0 %v2791_v52  ;;  %v2358_v52 = vld [vmem:[#allocation7 + $0xb8] sm:$0xff] }
  0x92   : > { %2793 = vmatprep.subr.bf16.mxu0 %v3368_v53 }
  0x93   : > { %2860 = vmatpush1.bf16.msra.mxu1 %v2809_v34 }
  0x94   : > { %421 = vmatmul.mubr.f32.gmra.mrb[2].mxu0 %v275_v56  ;;  %2845 = vmatprep.subr.bf16.mxu1 %v3368_v53  ;;  %v2360_v56 = vld [vmem:[#allocation7 + $0xc8] sm:$0xff] }
  0x95   : > { %426 = vmatprep.mubr.f32.mxu0 %v3367_v0  ;;  %2795 = vmatpush1.bf16.msra.mxu0 %v2794_v57  ;;  %v2827_v57 = vpack.c.bf16 %v2360_v56, %v2359_v55 }
  0x96   : > { %2796 = vmatprep.subr.bf16.mxu0 %v3368_v53 }
  0x97   : > { %2861 = vmatpush1.bf16.msra.mxu1 %v2812_v39 }
  0x98   : > { %427 = vmatmul.mubr.f32.gmra.mrb[4].mxu0 %v276_v60  ;;  %2846 = vmatprep.subr.bf16.mxu1 %v3368_v53  ;;  %v2830_v60 = vpack.c.bf16 %v2362_v59, %v2361_v58 }
  0x99   : > { %432 = vmatprep.mubr.f32.mxu0 %v3367_v0  ;;  %2798 = vmatpush1.bf16.msra.mxu0 %v2797_v61  ;;  %v2363_v61 = vld [vmem:[#allocation7 + $0xe0] sm:$0xff] }
  0x9a   : > { %2799 = vmatprep.subr.bf16.mxu0 %v3368_v53 }
  0x9b   : > { %2862 = vmatpush1.bf16.msra.mxu1 %v2815_v43 }
  0x9c   : > { %433 = vmatmul.mubr.f32.gmra.mrb[6].mxu0 %v277_v62  ;;  %2847 = vmatprep.subr.bf16.mxu1 %v3368_v53  ;;  %v2364_v62 = vld [vmem:[#allocation7 + $0xe8] sm:$0xff] }
  0x9d   : > { %438 = vmatprep.mubr.f32.mxu0 %v3367_v0  ;;  %2801 = vmatpush1.bf16.msra.mxu0 %v2800_v20 }
  0x9e   : > { %2802 = vmatprep.subr.bf16.mxu0 %v3368_v53 }
  0x9f   : > { %2863 = vmatpush1.bf16.msra.mxu1 %v2818_v48 }
  0xa0   : > { %439 = vmatmul.mubr.f32.gmra.mrb[8].mxu0 %v278_v63  ;;  %2848 = vmatprep.subr.bf16.mxu1 %v3368_v53  ;;  %v2833_v63 = vpack.c.bf16 %v2364_v62, %v2363_v61 }
  0xa1   : > { %444 = vmatprep.mubr.f32.mxu0 %v3367_v0  ;;  %2804 = vmatpush1.bf16.msra.mxu0 %v2803_v24 }
  0xa2   : > { %2805 = vmatprep.subr.bf16.mxu0 %v3368_v53 }
  0xa3   : > { %2864 = vmatpush1.bf16.msra.mxu1 %v2821_v51 }
  0xa4   : > { %445 = vmatmul.mubr.f32.gmra.mrb[10].mxu0 %v279_v1  ;;  %2849 = vmatprep.subr.bf16.mxu1 %v3368_v53  ;;  %v2365_v1 = vld [vmem:[#allocation7 + $0xf0] sm:$0xff] }
  0xa5   : > { %450 = vmatprep.mubr.f32.mxu0 %v3367_v0  ;;  %2807 = vmatpush1.bf16.msra.mxu0 %v2806_v29 }
  0xa6   : > { %2808 = vmatprep.subr.bf16.mxu0 %v3368_v53 }
  0xa8   : > { %451 = vmatmul.mubr.f32.gmra.mrb[12].mxu0 %v280_v2  ;;  %v2366_v2 = vld [vmem:[#allocation7 + $0xf8] sm:$0xff] }
  0xa9   : > { %456 = vmatprep.mubr.f32.mxu0 %v3367_v0  ;;  %2810 = vmatpush1.bf16.msra.mxu0 %v2809_v34 }
  0xaa   : > { %2811 = vmatprep.subr.bf16.mxu0 %v3368_v53 }
  0xac   : > { %457 = vmatmul.mubr.f32.gmra.mrb[14].mxu0 %v281_v3  ;;  %v2836_v3 = vpack.c.bf16 %v2366_v2, %v2365_v1 }
  0xad   : > { %462 = vmatprep.mubr.f32.mxu0 %v3367_v0  ;;  %2813 = vmatpush1.bf16.msra.mxu0 %v2812_v39 }
  0xae   : > { %2814 = vmatprep.subr.bf16.mxu0 %v3368_v53 }
  0xb0   : > { %463 = vmatmul.mubr.f32.gmra.mrb[16].mxu0 %v282_v4  ;;  %v340_v4 = vlaneseq }
  0xb1   : > { %468 = vmatprep.mubr.f32.mxu0 %v3367_v0  ;;  %2816 = vmatpush1.bf16.msra.mxu0 %v2815_v43 }
  0xb2   : > { %2817 = vmatprep.subr.bf16.mxu0 %v3368_v53 }
  0xb4   : > { %469 = vmatmul.mubr.f32.gmra.mrb[18].mxu0 %v283_v5  ;;  %v341_v5 = vshrl.u32 %v340_v4, 7 }
  0xb5   : > { %474 = vmatprep.mubr.f32.mxu0 %v3367_v0  ;;  %2819 = vmatpush1.bf16.msra.mxu0 %v2818_v48 }
  0xb6   : > { %2820 = vmatprep.subr.bf16.mxu0 %v3368_v53 }
  0xb8   : > { %475 = vmatmul.mubr.f32.gmra.mrb[20].mxu0 %v284_v6  ;;  %v342_v6 = vsub.s32 0, %v341_v5 }
  0xb9   : > { %480 = vmatprep.mubr.f32.mxu0 %v3367_v0  ;;  %2822 = vmatpush1.bf16.msra.mxu0 %v2821_v51 }
  0xba   : > { %2823 = vmatprep.subr.bf16.mxu0 %v3368_v53 }
  0xbc   : > { %481 = vmatmul.mubr.f32.gmra.mrb[22].mxu0 %v285_v7  ;;  %v338_v7 = vld [vmem:[%s5469_s2] sm:$0x3] }
  0xbd   : > { %486 = vmatprep.mubr.f32.mxu0 %v3367_v0 }
  0xc0   : > { %487 = vmatmul.mubr.f32.gmra.mrb[24].mxu0 %v286_v8  ;;  %v3695_v8 = vrot.slane %v338_v7, %v342_v6 }
  0xc1   : > { %492 = vmatprep.mubr.f32.mxu0 %v3367_v0 }
  0xc4   : > { %493 = vmatmul.mubr.f32.gmra.mrb[26].mxu0 %v287_v9 }
  0xc5   : > { %498 = vmatprep.mubr.f32.mxu0 %v3367_v0 }
  0xc8   : > { %499 = vmatmul.mubr.f32.gmra.mrb[28].mxu0 %v288_v10 }
  0xc9   : > { %504 = vmatprep.mubr.f32.mxu0 %v3367_v0 }
  0xcc   : > { %505 = vmatmul.mubr.f32.gmra.mrb[30].mxu0 %v289_v11 }
  0xcd   : > { %510 = vmatprep.mubr.f32.mxu0 %v3367_v0 }
  0xd0   : > { %511 = vmatmul.mubr.f32.gmra.mrb[32].mxu0 %v290_v12 }
  0xd1   : > { %516 = vmatprep.mubr.f32.mxu0 %v3367_v0 }
  0xd4   : > { %517 = vmatmul.mubr.f32.gmra.mrb[34].mxu0 %v291_v13 }
  0xd5   : > { %522 = vmatprep.mubr.f32.mxu0 %v3367_v0 }
  0xd8   : > { %523 = vmatmul.mubr.f32.gmra.mrb[36].mxu0 %v292_v14 }
  0xd9   : > { %528 = vmatprep.mubr.f32.mxu0 %v3367_v0 }
  0xdc   : > { %529 = vmatmul.mubr.f32.gmra.mrb[38].mxu0 %v293_v15 }
  0xdd   : > { %534 = vmatprep.mubr.f32.mxu0 %v3367_v0 }
  0xe0   : > { %535 = vmatmul.mubr.f32.gmra.mrb[40].mxu0 %v294_v16 }
  0xe1   : > { %540 = vmatprep.mubr.f32.mxu0 %v3367_v0 }
  0xe4   : > { %541 = vmatmul.mubr.f32.gmra.mrb[42].mxu0 %v295_v17 }
  0xe5   : > { %546 = vmatprep.mubr.f32.mxu0 %v3367_v0 }
  0xe8   : > { %547 = vmatmul.mubr.f32.gmra.mrb[44].mxu0 %v296_v21 }
  0xe9   : > { %552 = vmatprep.mubr.f32.mxu0 %v3367_v0 }
  0xec   : > { %553 = vmatmul.mubr.f32.gmra.mrb[46].mxu0 %v297_v25 }
  0xed   : > { %558 = vmatprep.mubr.f32.mxu0 %v3367_v0 }
  0xf0   : > { %559 = vmatmul.mubr.f32.gmra.mrb[48].mxu0 %v298_v26 }
  0xf1   : > { %564 = vmatprep.mubr.f32.mxu0 %v3367_v0 }
  0xf4   : > { %565 = vmatmul.mubr.f32.gmra.mrb[50].mxu0 %v299_v30 }
  0xf5   : > { %570 = vmatprep.mubr.f32.mxu0 %v3367_v0 }
  0xf8   : > { %571 = vmatmul.mubr.f32.gmra.mrb[52].mxu0 %v300_v31 }
  0xf9   : > { %576 = vmatprep.mubr.f32.mxu0 %v3367_v0 }
  0xfc   : > { %577 = vmatmul.mubr.f32.gmra.mrb[54].mxu0 %v301_v35 }
  0xfd   : > { %582 = vmatprep.mubr.f32.mxu0 %v3367_v0 }
 0x100   : > { %583 = vmatmul.mubr.f32.gmra.mrb[56].mxu0 %v302_v38 }
 0x101   : > { %588 = vmatprep.mubr.f32.mxu0 %v3367_v0 }
 0x104   : > { %589 = vmatmul.mubr.f32.gmra.mrb[58].mxu0 %v303_v40 }
 0x105   : > { %594 = vmatprep.mubr.f32.mxu0 %v3367_v0 }
 0x108   : > { %595 = vmatmul.mubr.f32.gmra.mrb[60].mxu0 %v304_v44 }
 0x109   : > { %600 = vmatprep.mubr.f32.mxu0 %v3367_v0  ;;  %v2357_v0 = vld [vmem:[#allocation7 + $0xb0] sm:$0xff] }
 0x10a   : > { %v2824_v54 = vpack.c.bf16 %v2358_v52, %v2357_v0 }
 0x10c   : > { %601 = vmatmul.mubr.f32.gmra.mrb[62].mxu0 %v305_v45  ;;  %2865 = vmatpush1.bf16.msra.mxu1 %v2824_v54 }
 0x10d   : > { %2825 = vmatpush1.bf16.msra.mxu0 %v2824_v54  ;;  %2850 = vmatprep.subr.bf16.mxu1 %v3368_v53 }
 0x10e   : > { %2826 = vmatprep.subr.bf16.mxu0 %v3368_v53 }
 0x110   : > { %2866 = vmatpush1.bf16.msra.mxu1 %v2827_v57 }
 0x111   : > { %2828 = vmatpush1.bf16.msra.mxu0 %v2827_v57  ;;  %2851 = vmatprep.subr.bf16.mxu1 %v3368_v53 }
 0x112   : > { %2829 = vmatprep.subr.bf16.mxu0 %v3368_v53 }
 0x114   : > { %2867 = vmatpush1.bf16.msra.mxu1 %v2830_v60 }
 0x115   : > { %2831 = vmatpush1.bf16.msra.mxu0 %v2830_v60  ;;  %2852 = vmatprep.subr.bf16.mxu1 %v3368_v53 }
 0x116   : > { %2832 = vmatprep.subr.bf16.mxu0 %v3368_v53 }
 0x118   : > { %2868 = vmatpush1.bf16.msra.mxu1 %v2833_v63 }
 0x119   : > { %2834 = vmatpush1.bf16.msra.mxu0 %v2833_v63  ;;  %2853 = vmatprep.subr.bf16.mxu1 %v3368_v53 }
 0x11a   : > { %2835 = vmatprep.subr.bf16.mxu0 %v3368_v53  ;;  %v346_v53 = vsub.s32 1, %v341_v5 }
 0x11c   : > { %2869 = vmatpush1.bf16.msra.mxu1 %v2836_v3  ;;  %v3701_v17 = vrot.slane %v338_v7, %v346_v53 }
 0x11d   : > { %2837 = vmatpush1.bf16.msra.mxu0 %v2836_v3 }
 0x163   : > { %v416_v9 = vpop.f32.mrb[0].mxu0 }
 0x164   : > { %v417_v10 = vadd.f32 %v416_v9, %v3695_v8  ;;  %v418_v11 = vpop.f32.mrb[1].mxu0 }
 0x165   : > { %v419_v21 = vadd.f32 %v418_v11, %v3701_v17 }
 0x166   : > { %v3698_v12 = vmul.f32 0.70710677, %v417_v10  ;;  %v3751_v63 = vmul.f32 0.5, %v417_v10 }
 0x167   : > { %v422_v13 = vpop.f32.mrb[2].mxu0  ;;  %v3704_v24 = vmul.f32 0.70710677, %v419_v21  ;;  %v3753_v1 = vmul.f32 0.5, %v419_v21 }
 0x168   : > { %v735_v14 = vand.u32 2147483647, %v3698_v12  ;;  %v424_v15 = vpop.f32.mrb[3].mxu0  ;;  %v423_v25 = vadd.f32 %v422_v13, %v3695_v8  ;;  %vm2015_vm0 = vcmp.ge.f32.partialorder %v3698_v12, 0.0 }
 0x169   : > { %v425_v27 = vadd.f32 %v424_v15, %v3701_v17  ;;  %v736_v29 = vand.u32 2147483647, %v3704_v24  ;;  %vm2016_vm1 = vcmp.ge.f32.partialorder %v3704_v24, 0.0 }
 0x16a   : > { %v799_v16 = vmul.f32 0.3275911, %v735_v14  ;;  %v3709_v30 = vmul.f32 0.70710677, %v423_v25  ;;  %v1631_v33 = vsub.f32 0.0, %v735_v14  ;;  %v3756_v5 = vmul.f32 0.5, %v423_v25 }
 0x16b   : > { %v428_v19 = vpop.f32.mrb[4].mxu0  ;;  %v3716_v34 = vmul.f32 0.70710677, %v425_v27  ;;  %v800_v39 = vmul.f32 0.3275911, %v736_v29  ;;  %v1632_v40 = vsub.f32 0.0, %v736_v29 }
 0x16c   : > { %v863_v18 = vadd.f32 1.0, %v799_v16  ;;  %v430_v20 = vpop.f32.mrb[5].mxu0  ;;  %v3712_v31 = vadd.f32 %v428_v19, %v3695_v8  ;;  %v737_v41 = vand.u32 2147483647, %v3709_v30  ;;  %v1695_v44 = vmul.f32 %v1631_v33, %v735_v14  ;;  %5623 = vst [vmem:[#allocation14_spill] sm:$0xff] %v3756_v5 }
 0x16d   : > { %v3720_v37 = vadd.f32 %v430_v20, %v3701_v17  ;;  %v738_v45 = vand.u32 2147483647, %v3716_v34  ;;  %v864_v51 = vadd.f32 1.0, %v800_v39  ;;  %v1696_v0 = vmul.f32 %v1632_v40, %v736_v29 }
 0x16e   : > { %2945 = vrcp.f32 %v863_v18  ;;  %v3726_v43 = vmul.f32 0.70710677, %v3712_v31  ;;  %v801_v52 = vmul.f32 0.3275911, %v737_v41  ;;  %v1633_v54 = vsub.f32 0.0, %v737_v41 }
 0x16f   : > { %v434_v22 = vpop.f32.mrb[6].mxu0  ;;  %v3736_v49 = vmul.f32 0.70710677, %v3720_v37  ;;  %v1759_v59 = vmul.f32 1.442695, %v1695_v44  ;;  %v1634_v60 = vsub.f32 0.0, %v738_v45  ;;  %2947 = vrcp.f32 %v864_v51 }
 0x170   : > { %v436_v23 = vpop.f32.mrb[7].mxu0  ;;  %5621 = vst [vmem:[#allocation12_spill] sm:$0xff] %v3726_v43  ;;  %v3730_v46 = vadd.f32 %v434_v22, %v3695_v8  ;;  %v739_v56 = vand.u32 2147483647, %v3726_v43  ;;  %v802_v2 = vmul.f32 0.3275911, %v738_v45  ;;  %v1697_v6 = vmul.f32 %v1633_v54, %v737_v41 }
 0x171   : > { %v3742_v57 = vadd.f32 %v436_v23, %v3701_v17  ;;  %v740_v3 = vand.u32 2147483647, %v3736_v49  ;;  %v1761_v4 = vmul.f32 1.442695, %v1696_v0  ;;  %v865_v9 = vadd.f32 1.0, %v801_v52 }
 0x172   : > { %v3747_v61 = vmul.f32 0.70710677, %v3730_v46  ;;  %v1635_v11 = vsub.f32 0.0, %v739_v56  ;;  %2949 = vpow2.f32 %v1759_v59  ;;  %v1698_v10 = vmul.f32 %v1634_v60, %v738_v45 }
 0x173   : > { %v440_v26 = vpop.f32.mrb[8].mxu0  ;;  %v3760_v53 = vmul.f32 0.70710677, %v3742_v57  ;;  %v866_v16 = vadd.f32 1.0, %v802_v2  ;;  %v803_v18 = vmul.f32 0.3275911, %v739_v56  ;;  %2951 = vpow2.f32 %v1761_v4 }
 0x174   : > { %v442_v28 = vpop.f32.mrb[9].mxu0  ;;  %5622 = vst [vmem:[#allocation13_spill] sm:$0xff] %v3747_v61  ;;  %v741_v13 = vand.u32 2147483647, %v3747_v61  ;;  %v3764_v14 = vadd.f32 %v440_v26, %v3695_v8  ;;  %v1636_v19 = vsub.f32 0.0, %v740_v3  ;;  %v3773_v23 = vmul.f32 0.5, %v425_v27 }
 0x175   : > { %5624 = vst [vmem:[#allocation15_spill] sm:$0xff] %v3760_v53  ;;  %v3769_v20 = vadd.f32 %v442_v28, %v3701_v17  ;;  %v1763_v22 = vmul.f32 1.442695, %v1697_v6  ;;  %v804_v25 = vmul.f32 0.3275911, %v740_v3  ;;  %2953 = vrcp.f32 %v865_v9 }
 0x176   : > { %v1699_v33 = vmul.f32 %v1635_v11, %v739_v56  ;;  %v742_v26 = vand.u32 2147483647, %v3760_v53  ;;  %v1765_v39 = vmul.f32 1.442695, %v1698_v10  ;;  %v1637_v40 = vsub.f32 0.0, %v741_v13 }
 0x177   : > { %v446_v35 = vpop.f32.mrb[10].mxu0  ;;  %5625 = vst [vmem:[#allocation16_spill] sm:$0xff] %v3769_v20  ;;  %v3779_v41 = vmul.f32 0.70710677, %v3764_v14  ;;  %2955 = vrcp.f32 %v866_v16  ;;  %v867_v27 = vadd.f32 1.0, %v803_v18  ;;  %v1700_v44 = vmul.f32 %v1636_v19, %v740_v3 }
 0x178   : > { %v3714_v32 = vpop.eup %2945  ;;  %v3722_v38 = vpop.f32.mrb[11].mxu0  ;;  %v3782_v28 = vadd.f32 %v446_v35, %v3695_v8  ;;  %v3787_v45 = vmul.f32 0.70710677, %v3769_v20  ;;  %2957 = vpow2.f32 %v1763_v22  ;;  %v868_v51 = vadd.f32 1.0, %v804_v25 }
 0x179   : > { %v1055_v36 = vmul.f32 1.0614054, %v3714_v32  ;;  %5626 = vst [vmem:[#allocation17_spill] sm:$0xff] %v3779_v41  ;;  %v805_v0 = vmul.f32 0.3275911, %v741_v13  ;;  %v3795_v35 = vadd.f32 %v3722_v38, %v3701_v17  ;;  %v3799_v59 = vpop.eup %2947  ;;  %2959 = vpow2.f32 %v1765_v39 }
 0x17a   : > { %5627 = vst [vmem:[#allocation18_spill] sm:$0xff] %v3787_v45  ;;  %v1767_v54 = vmul.f32 1.442695, %v1699_v33  ;;  %v1701_v60 = vmul.f32 %v1637_v40, %v741_v13  ;;  %v743_v2 = vand.u32 2147483647, %v3779_v41  ;;  %2961 = vrcp.f32 %v867_v27 }
 0x17b   : > { %v1119_v42 = vadd.f32 -1.4531521, %v1055_v36  ;;  %v3732_v47 = vpop.f32.mrb[12].mxu0  ;;  %v1769_v4 = vmul.f32 1.442695, %v1700_v44  ;;  %v1638_v6 = vsub.f32 0.0, %v742_v26  ;;  %2963 = vrcp.f32 %v868_v51 }
 0x17c   : > { %v3738_v50 = vpop.f32.mrb[13].mxu0  ;;  %v2950_v38 = vpop.eup %2949  ;;  %v3809_v9 = vmul.f32 0.5, %v3720_v37  ;;  %v3812_v11 = vmul.f32 0.5, %v3730_v46  ;;  %v869_v10 = vadd.f32 1.0, %v805_v0  ;;  %v3815_v18 = vmul.f32 0.70710677, %v3795_v35 }
 0x17d   : > { %v1183_v48 = vmul.f32 %v3714_v32, %v1119_v42  ;;  %v3819_v19 = vadd.f32 %v3732_v47, %v3695_v8  ;;  %v3823_v25 = vpop.eup %2951  ;;  %2965 = vpow2.f32 %v1767_v54  ;;  %v1771_v37 = vmul.f32 1.442695, %v1701_v60 }
 0x17e   : > { %5630 = vst [vmem:[#allocation21_spill] sm:$0xff] %v3809_v9  ;;  %5631 = vst [vmem:[#allocation22_spill] sm:$0xff] %v3812_v11  ;;  %2967 = vpow2.f32 %v1769_v4  ;;  %v1702_v40 = vmul.f32 %v1638_v6, %v742_v26  ;;  %v3832_v47 = vadd.f32 %v3738_v50, %v3701_v17  ;;  %v3835_v44 = vmul.f32 0.5, %v3742_v57 }
 0x17f   : > { %v1247_v55 = vadd.f32 1.4214138, %v1183_v48  ;;  %v3744_v58 = vpop.f32.mrb[14].mxu0  ;;  %v3790_v48 = vmul.f32 0.5, %v3712_v31  ;;  %v3803_v31 = vmul.f32 0.70710677, %v3782_v28  ;;  %v3828_v39 = vpop.eup %2953  ;;  %2969 = vrcp.f32 %v869_v10 }
 0x180   : > { %v3749_v62 = vpop.f32.mrb[15].mxu0  ;;  %5632 = vst [vmem:[#allocation23_spill] sm:$0xff] %v3815_v18  ;;  %5633 = vst [vmem:[#allocation24_spill] sm:$0xff] %v3835_v44  ;;  %v807_v51 = vmul.f32 0.3275911, %v743_v2  ;;  %v3850_v6 = vadd.f32 %v3744_v58, %v3695_v8  ;;  %v3867_v58 = vmul.f32 0.5, %v3782_v28 }
 0x181   : > { %v1311_v7 = vmul.f32 %v3714_v32, %v1247_v55  ;;  %5628 = vst [vmem:[#allocation19_spill] sm:$0xff] %v3790_v48  ;;  %v806_v55 = vmul.f32 0.3275911, %v742_v26  ;;  %5629 = vst [vmem:[#allocation20_spill] sm:$0xff] %v3803_v31  ;;  %v745_v46 = vand.u32 2147483647, %v3803_v31  ;;  %v3859_v31 = vadd.f32 %v3749_v62, %v3701_v17 }
 0x182   : > { %v3842_v26 = vmul.f32 0.70710677, %v3819_v19  ;;  %5637 = vst [vmem:[#allocation28_spill] sm:$0xff] %v3867_v58  ;;  %v3882_v28 = vmul.f32 0.70710677, %v3850_v6  ;;  %v3934_v53 = vmul.f32 0.5, %v3832_v47 }
 0x183   : > { %v3766_v15 = vpop.f32.mrb[16].mxu0  ;;  %v1375_v29 = vadd.f32 -0.28449672, %v1311_v7  ;;  %v744_v7 = vand.u32 2147483647, %v3787_v45  ;;  %v870_v16 = vadd.f32 1.0, %v806_v55 }
 0x184   : > { %v3771_v21 = vpop.f32.mrb[17].mxu0  ;;  %v746_v55 = vand.u32 2147483647, %v3815_v18  ;;  %5634 = vst [vmem:[#allocation25_spill] sm:$0xff] %v3842_v26  ;;  %v1641_v57 = vsub.f32 0.0, %v745_v46  ;;  %5639 = vst [vmem:[#allocation30_spill] sm:$0xff] %v3882_v28 }
 0x185   : > { %v1439_v52 = vmul.f32 %v3714_v32, %v1375_v29  ;;  %v1639_v29 = vsub.f32 0.0, %v743_v2  ;;  %v1640_v27 = vsub.f32 0.0, %v744_v7  ;;  %v808_v0 = vmul.f32 0.3275911, %v744_v7  ;;  %5647 = vst [vmem:[#allocation38_spill] sm:$0xff] %v3934_v53 }
 0x186   : > { %2971 = vrcp.f32 %v870_v16  ;;  %v3855_v16 = vmul.f32 0.70710677, %v3832_v47  ;;  %v747_v45 = vand.u32 2147483647, %v3842_v26  ;;  %vm2018_vm2 = vcmp.ge.f32.partialorder %v3716_v34, 0.0 }
 0x187   : > { %v3776_v36 = vpop.f32.mrb[18].mxu0  ;;  %v1503_v13 = vadd.f32 0.2548296, %v1439_v52  ;;  %v3837_v52 = vpop.eup %2955  ;;  %2973 = vpow2.f32 %v1771_v37  ;;  %v1703_v4 = vmul.f32 %v1639_v29, %v743_v2  ;;  %v3864_v2 = vmul.f32 0.5, %v3764_v14 }
 0x188   : > { %v3784_v42 = vpop.f32.mrb[19].mxu0  ;;  %v3846_v50 = vpop.eup %2957  ;;  %5635 = vst [vmem:[#allocation26_spill] sm:$0xff] %v3855_v16  ;;  %v871_v37 = vadd.f32 1.0, %v807_v51  ;;  %v809_v29 = vmul.f32 0.3275911, %v745_v46  ;;  %v1705_v14 = vmul.f32 %v1641_v57, %v745_v46  ;;  %v3879_v51 = vmul.f32 0.5, %v3795_v35 }
 0x189   : > { %v1567_v54 = vmul.f32 %v3714_v32, %v1503_v13  ;;  %v1773_v32 = vmul.f32 1.442695, %v1702_v40  ;;  %v1704_v13 = vmul.f32 %v1640_v27, %v744_v7  ;;  %v3861_v18 = vpop.eup %2959  ;;  %5636 = vst [vmem:[#allocation27_spill] sm:$0xff] %v3864_v2  ;;  %v872_v40 = vadd.f32 1.0, %v808_v0 }
 0x18a   : > { %v3869_v41 = vpop.eup %2961  ;;  %v1642_v27 = vsub.f32 0.0, %v746_v55  ;;  %v1775_v20 = vmul.f32 1.442695, %v1703_v4  ;;  %5638 = vst [vmem:[#allocation29_spill] sm:$0xff] %v3879_v51  ;;  %v748_v0 = vand.u32 2147483647, %v3855_v16  ;;  %v3894_v35 = vadd.f32 %v3766_v15, %v3695_v8 }
 0x18b   : > { %v3797_v56 = vpop.f32.mrb[20].mxu0  ;;  %v3871_v7 = vmul.f32 %v2950_v38, %v1567_v54  ;;  %v3876_v11 = vpop.eup %2963  ;;  %2975 = vpow2.f32 %v1773_v32  ;;  %v1777_v38 = vmul.f32 1.442695, %v1704_v13  ;;  %v3888_v54 = vmul.f32 0.70710677, %v3859_v31 }
 0x18c   : > { %v3805_v3 = vpop.f32.mrb[21].mxu0  ;;  %v3890_v26 = vpop.eup %2965  ;;  %2977 = vrcp.f32 %v871_v37  ;;  %v873_v4 = vadd.f32 1.0, %v809_v29  ;;  %v810_v46 = vmul.f32 0.3275911, %v746_v55  ;;  %v1706_v32 = vmul.f32 %v1642_v27, %v746_v55 }
 0x18d   : > { %5640 = vst [vmem:[#allocation31_spill] sm:$0xff] %v3888_v54  ;;  %5641 = vst [vmem:[#allocation32_spill] sm:$0xff] %v3890_v26  ;;  %v3896_v57 = vpop.eup %2967  ;;  %v1951_v51 = vsub.f32 1.0, %v3871_v7  ;;  %2979 = vrcp.f32 %v872_v40  ;;  %v1643_v13 = vsub.f32 0.0, %v747_v45  ;;  %v1779_v37 = vmul.f32 1.442695, %v1705_v14 }
 0x18e   : > { %v3902_v2 = vpop.eup %2969  ;;  %2981 = vpow2.f32 %v1775_v20  ;;  %v749_v29 = vand.u32 2147483647, %v3882_v28  ;;  %v3907_v15 = vadd.f32 %v3771_v21, %v3701_v17  ;;  %v811_v40 = vmul.f32 0.3275911, %v747_v45 }
 0x18f   : > { %v3821_v22 = vpop.f32.mrb[22].mxu0  ;;  %5642 = vst [vmem:[#allocation33_spill] sm:$0xff] %v3902_v2  ;;  %2983 = vpow2.f32 %v1777_v38  ;;  %v1644_v55 = vsub.f32 0.0, %v748_v0  ;;  %v750_v27 = vand.u32 2147483647, %v3888_v54  ;;  %v874_v61 = vadd.f32 1.0, %v810_v46 }
 0x190   : > { %v3826_v33 = vpop.f32.mrb[23].mxu0  ;;  %v3911_v7 = vpop.eup %2971  ;;  %v3917_v20 = vmul.f32 0.5, %v3819_v19  ;;  %v3920_v14 = vmul.f32 0.70710677, %v3894_v35  ;;  %v3924_v21 = vadd.f32 %v3776_v36, %v3695_v8  ;;  %v2079_v28 = vsub.f32 0.0, %v1951_v51 }
 0x191   : > { %v3914_v48 = vpop.eup %2973  ;;  %2985 = vrcp.f32 %v873_v4  ;;  %v1781_v38 = vmul.f32 1.442695, %v1706_v32  ;;  %v1707_v26 = vmul.f32 %v1643_v13, %v747_v45  ;;  %v812_v54 = vmul.f32 0.3275911, %v748_v0 }
 0x192   : > { %5643 = vst [vmem:[#allocation34_spill] sm:$0xff] %v3914_v48  ;;  %5644 = vst [vmem:[#allocation35_spill] sm:$0xff] %v3917_v20  ;;  %2987 = vpow2.f32 %v1779_v37  ;;  %v1645_v48 = vsub.f32 0.0, %v749_v29  ;;  %v3929_v46 = vmul.f32 0.70710677, %v3907_v15  ;;  %v875_v20 = vadd.f32 1.0, %v811_v40 }
 0x193   : > { %v3844_v60 = vpop.f32.mrb[24].mxu0  ;;  %5645 = vst [vmem:[#allocation36_spill] sm:$0xff] %v3920_v14  ;;  %v1708_v36 = vmul.f32 %v1644_v55, %v748_v0  ;;  %v1646_v43 = vsub.f32 0.0, %v750_v27  ;;  %2989 = vrcp.f32 %v874_v61  ;;  %v813_v4 = vmul.f32 0.3275911, %v749_v29 }
 0x194   : > { %v3852_v10 = vpop.f32.mrb[25].mxu0  ;;  %5646 = vst [vmem:[#allocation37_spill] sm:$0xff] %v3929_v46  ;;  %v751_v45 = vand.u32 2147483647, %v3920_v14  ;;  %v3938_v32 = vmul.f32 0.70710677, %v3924_v21  ;;  %2991 = vpow2.f32 %v1781_v38  ;;  %v3944_v40 = vadd.f32 %v3784_v42, %v3701_v17 }
 0x195   : > { %v3940_v13 = vpop.eup %2975  ;;  %v1783_v37 = vmul.f32 1.442695, %v1707_v26  ;;  %v814_v2 = vmul.f32 0.3275911, %v750_v27  ;;  %v2143_v61 = vsel %vm2015_vm0, %v1951_v51, %v2079_v28  ;;  %v876_v55 = vadd.f32 1.0, %v812_v54 }
 0x196   : > { %5648 = vst [vmem:[#allocation39_spill] sm:$0xff] %v3938_v32  ;;  %5649 = vst [vmem:[#allocation40_spill] sm:$0xff] %v3940_v13  ;;  %v3948_v0 = vpop.eup %2977  ;;  %v1709_v14 = vmul.f32 %v1645_v48, %v749_v29  ;;  %v752_v53 = vand.u32 2147483647, %v3929_v46  ;;  %2993 = vrcp.f32 %v875_v20  ;;  %v1785_v26 = vmul.f32 1.442695, %v1708_v36 }
 0x197   : > { %v3874_v62 = vpop.f32.mrb[26].mxu0  ;;  %5651 = vst [vmem:[#allocation42_spill] sm:$0xff] %v3948_v0  ;;  %v3955_v38 = vpop.eup %2979  ;;  %v1710_v13 = vmul.f32 %v1646_v43, %v750_v27  ;;  %v3959_v42 = vadd.f32 %v3797_v56, %v3695_v8  ;;  %v877_v0 = vadd.f32 1.0, %v813_v4  ;;  %v815_v12 = vmul.f32 0.3275911, %v751_v45 }
 0x198   : > { %v3884_v58 = vpop.f32.mrb[27].mxu0  ;;  %v1647_v51 = vsub.f32 0.0, %v751_v45  ;;  %v753_v48 = vand.u32 2147483647, %v3938_v32  ;;  %2995 = vpow2.f32 %v1783_v37  ;;  %v878_v54 = vadd.f32 1.0, %v814_v2 }
 0x199   : > { %v3967_v29 = vmul.f32 0.70710677, %v3944_v40  ;;  %v3971_v43 = vadd.f32 %v3805_v3, %v3701_v17  ;;  %2997 = vrcp.f32 %v876_v55  ;;  %v1787_v27 = vmul.f32 1.442695, %v1709_v14 }
 0x19a   : > { %v816_v20 = vmul.f32 0.3275911, %v752_v53  ;;  %v1648_v36 = vsub.f32 0.0, %v752_v53  ;;  %v2207_v46 = vadd.f32 1.0, %v2143_v61  ;;  %2999 = vpow2.f32 %v1785_v26 }
 0x19b   : > { %v3900_v16 = vpop.f32.mrb[28].mxu0  ;;  %5654 = vst [vmem:[#allocation45_spill] sm:$0xff] %v3967_v29  ;;  %v1789_v2 = vmul.f32 1.442695, %v1710_v13  ;;  %v3980_v37 = vmul.f32 0.70710677, %v3959_v42  ;;  %3001 = vrcp.f32 %v877_v0  ;;  %v3990_v61 = vadd.f32 %v3821_v22, %v3695_v8 }
 0x19c   : > { %v3909_v44 = vpop.f32.mrb[29].mxu0  ;;  %v879_v3 = vadd.f32 1.0, %v815_v12  ;;  %3003 = vrcp.f32 %v878_v54  ;;  %v754_v14 = vand.u32 2147483647, %v3967_v29  ;;  %v3986_v55 = vmul.f32 0.70710677, %v3971_v43 }
 0x19d   : > { %5657 = vst [vmem:[#allocation48_spill] sm:$0xff] %v3980_v37  ;;  %v3995_v26 = vmul.f32 0.5, %v3850_v6  ;;  %3005 = vpow2.f32 %v1787_v27  ;;  %v880_v0 = vadd.f32 1.0, %v816_v20  ;;  %v1712_v12 = vmul.f32 %v1648_v36, %v752_v53 }
 0x19e   : > { %5659 = vst [vmem:[#allocation50_spill] sm:$0xff] %v3986_v55  ;;  %v4002_v54 = vmul.f32 0.5, %v3859_v31  ;;  %3007 = vpow2.f32 %v1789_v2  ;;  %v817_v29 = vmul.f32 0.3275911, %v753_v48  ;;  %v755_v22 = vand.u32 2147483647, %v3980_v37 }
 0x19f   : > { %v3926_v9 = vpop.f32.mrb[30].mxu0  ;;  %5660 = vst [vmem:[#allocation51_spill] sm:$0xff] %v3995_v26  ;;  %3009 = vrcp.f32 %v879_v3  ;;  %v1650_v20 = vsub.f32 0.0, %v754_v14  ;;  %v756_v36 = vand.u32 2147483647, %v3986_v55  ;;  %v4018_v2 = vadd.f32 %v3826_v33, %v3701_v17 }
 0x1a0   : > { %v3931_v19 = vpop.f32.mrb[31].mxu0  ;;  %5661 = vst [vmem:[#allocation52_spill] sm:$0xff] %v4002_v54  ;;  %v4014_v31 = vmul.f32 0.70710677, %v3990_v61  ;;  %3011 = vrcp.f32 %v880_v0  ;;  %v881_v3 = vadd.f32 1.0, %v817_v29  ;;  %v1651_v26 = vsub.f32 0.0, %v755_v22 }
 0x1a1   : > { %v818_v55 = vmul.f32 0.3275911, %v754_v14  ;;  %v4034_v33 = vadd.f32 %v3844_v60, %v3695_v8  ;;  %v1056_v0 = vmul.f32 1.0614054, %v3799_v59  ;;  %vm2017_vm3 = vcmp.ge.f32.partialorder %v3709_v30, 0.0 }
 0x1a2   : > { %5662 = vst [vmem:[#allocation53_spill] sm:$0xff] %v4014_v31  ;;  %v757_v29 = vand.u32 2147483647, %v4014_v31  ;;  %v1715_v31 = vmul.f32 %v1651_v26, %v755_v22  ;;  %vm2020_vm4 = vcmp.ge.f32.partialorder %v3736_v49, 0.0  ;;  %v5711_v49 = vld [vmem:[#allocation15_spill] sm:$0xff] }
 0x1a3   : > { %v3946_v47 = vpop.f32.mrb[32].mxu0  ;;  %vm2022_vm6 = vcmp.ge.f32.partialorder %v5711_v49, 0.0 }
 0x1a4   : > { %5650 = vst [vmem:[#allocation41_spill] sm:$0xff] %v3946_v47  ;;  %v3953_v5 = vpop.f32.mrb[33].mxu0  ;;  %v3961_v47 = vpop.eup %2981 }
 0x1a5   : > { %5652 = vst [vmem:[#allocation43_spill] sm:$0xff] %v3961_v47  ;;  %v3964_v28 = vpop.eup %2983 }
 0x1a6   : > { %5653 = vst [vmem:[#allocation44_spill] sm:$0xff] %v3964_v28  ;;  %v3977_v32 = vpop.eup %2985  ;;  %v1711_v28 = vmul.f32 %v1647_v51, %v751_v45 }
 0x1a7   : > { %v3973_v56 = vpop.f32.mrb[34].mxu0  ;;  %5656 = vst [vmem:[#allocation47_spill] sm:$0xff] %v3977_v32  ;;  %v3982_v47 = vpop.eup %2987  ;;  %v4008_v32 = vmul.f32 %v2207_v46, %v3751_v63  ;;  %v4023_v63 = vmul.f32 0.5, %v3894_v35  ;;  %v4026_v46 = vmul.f32 0.5, %v3907_v15  ;;  %v4039_v35 = vmul.f32 0.5, %v3924_v21 }
 0x1a8   : > { %5655 = vst [vmem:[#allocation46_spill] sm:$0xff] %v3973_v56  ;;  %v3975_v4 = vpop.f32.mrb[35].mxu0  ;;  %5658 = vst [vmem:[#allocation49_spill] sm:$0xff] %v3982_v47  ;;  %v1649_v56 = vsub.f32 0.0, %v753_v48  ;;  %v3992_v13 = vpop.eup %2989  ;;  %v1791_v6 = vmul.f32 1.442695, %v1711_v28 }
 0x1a9   : > { %v3999_v51 = vpop.eup %2991  ;;  %5663 = vst [vmem:[#allocation54_spill] sm:$0xff] %v4023_v63  ;;  %5664 = vst [vmem:[#allocation55_spill] sm:$0xff] %v4026_v46  ;;  %v1714_v63 = vmul.f32 %v1650_v20, %v754_v14  ;;  %v1652_v46 = vsub.f32 0.0, %v756_v36  ;;  %v4053_v21 = vmul.f32 0.5, %v3944_v40  ;;  %v882_v20 = vadd.f32 1.0, %v818_v55 }
 0x1aa   : > { %v1713_v27 = vmul.f32 %v1649_v56, %v753_v48  ;;  %v4010_v53 = vpop.eup %2993  ;;  %v1793_v48 = vmul.f32 1.442695, %v1712_v12  ;;  %3013 = vpow2.f32 %v1791_v6  ;;  %5667 = vst [vmem:[#allocation58_spill] sm:$0xff] %v4039_v35  ;;  %v4056_v6 = vmul.f32 0.5, %v3959_v42 }
 0x1ab   : > { %v3997_v45 = vpop.f32.mrb[36].mxu0  ;;  %v4030_v56 = vpop.eup %2995  ;;  %5672 = vst [vmem:[#allocation63_spill] sm:$0xff] %v4053_v21  ;;  %v4069_v40 = vadd.f32 %v3852_v10, %v3701_v17  ;;  %v1120_v42 = vadd.f32 -1.4531521, %v1056_v0  ;;  %v1797_v21 = vmul.f32 1.442695, %v1714_v63  ;;  %v4088_v63 = vadd.f32 %v3874_v62, %v3695_v8 }
 0x1ac   : > { %v4005_v47 = vpop.f32.mrb[37].mxu0  ;;  %5666 = vst [vmem:[#allocation57_spill] sm:$0xff] %v4030_v56  ;;  %v4036_v54 = vpop.eup %2997  ;;  %v1795_v15 = vmul.f32 1.442695, %v1713_v27  ;;  %v4046_v56 = vmul.f32 0.70710677, %v4018_v2  ;;  %3015 = vpow2.f32 %v1793_v48 }
 0x1ad   : > { %v4042_v12 = vpop.eup %2999  ;;  %5673 = vst [vmem:[#allocation64_spill] sm:$0xff] %v4056_v6  ;;  %v819_v27 = vmul.f32 0.3275911, %v755_v22  ;;  %3017 = vrcp.f32 %v881_v3  ;;  %v820_v48 = vmul.f32 0.3275911, %v756_v36  ;;  %v4077_v3 = vmul.f32 0.5, %v3971_v43 }
 0x1ae   : > { %5668 = vst [vmem:[#allocation59_spill] sm:$0xff] %v4042_v12  ;;  %5669 = vst [vmem:[#allocation60_spill] sm:$0xff] %v4046_v56  ;;  %v4063_v12 = vmul.f32 0.70710677, %v4034_v33  ;;  %3019 = vpow2.f32 %v1795_v15  ;;  %v758_v55 = vand.u32 2147483647, %v4046_v56 }
 0x1af   : > { %v4020_v37 = vpop.f32.mrb[38].mxu0  ;;  %v883_v22 = vadd.f32 1.0, %v819_v27  ;;  %5679 = vst [vmem:[#allocation70_spill] sm:$0xff] %v4077_v3  ;;  %v821_v15 = vmul.f32 0.3275911, %v757_v29  ;;  %v4083_v0 = vmul.f32 0.5, %v3990_v61  ;;  %3021 = vrcp.f32 %v882_v20 }
 0x1b0   : > { %v4028_v28 = vpop.f32.mrb[39].mxu0  ;;  %5676 = vst [vmem:[#allocation67_spill] sm:$0xff] %v4063_v12  ;;  %v1799_v10 = vmul.f32 1.442695, %v1715_v31  ;;  %v884_v43 = vadd.f32 1.0, %v820_v48  ;;  %3023 = vpow2.f32 %v1797_v21  ;;  %v1654_v3 = vsub.f32 0.0, %v758_v55 }
 0x1b1   : > { %5665 = vst [vmem:[#allocation56_spill] sm:$0xff] %v4028_v28  ;;  %v4050_v28 = vpop.eup %3001  ;;  %5680 = vst [vmem:[#allocation71_spill] sm:$0xff] %v4083_v0  ;;  %v4093_v27 = vmul.f32 0.70710677, %v4069_v40  ;;  %3025 = vrcp.f32 %v883_v22  ;;  %v822_v62 = vmul.f32 0.3275911, %v758_v55 }
 0x1b2   : > { %5671 = vst [vmem:[#allocation62_spill] sm:$0xff] %v4050_v28  ;;  %v4060_v14 = vpop.eup %3003  ;;  %v1653_v28 = vsub.f32 0.0, %v757_v29  ;;  %3027 = vpow2.f32 %v1799_v10  ;;  %v4101_v48 = vmul.f32 0.70710677, %v4088_v63  ;;  %v1718_v10 = vmul.f32 %v1654_v3, %v758_v55 }
 0x1b3   : > { %v4048_v60 = vpop.f32.mrb[40].mxu0  ;;  %5675 = vst [vmem:[#allocation66_spill] sm:$0xff] %v4060_v14  ;;  %5681 = vst [vmem:[#allocation72_spill] sm:$0xff] %v4093_v27  ;;  %3029 = vrcp.f32 %v884_v43  ;;  %v4124_v3 = vadd.f32 %v3884_v58, %v3701_v17 }
 0x1b4   : > { %5670 = vst [vmem:[#allocation61_spill] sm:$0xff] %v4048_v60  ;;  %v4058_v35 = vpop.f32.mrb[41].mxu0  ;;  %v4065_v60 = vpop.eup %3005  ;;  %v1717_v31 = vmul.f32 %v1653_v28, %v757_v29  ;;  %5684 = vst [vmem:[#allocation75_spill] sm:$0xff] %v4101_v48  ;;  %v4107_v28 = vmul.f32 0.5, %v4018_v2 }
 0x1b5   : > { %5674 = vst [vmem:[#allocation65_spill] sm:$0xff] %v4058_v35  ;;  %5677 = vst [vmem:[#allocation68_spill] sm:$0xff] %v4065_v60  ;;  %v4071_v6 = vpop.eup %3007  ;;  %v1716_v35 = vmul.f32 %v1652_v46, %v756_v36  ;;  %v1184_v60 = vmul.f32 %v3799_v59, %v1120_v42  ;;  %v759_v36 = vand.u32 2147483647, %v4063_v12  ;;  %v885_v12 = vadd.f32 1.0, %v821_v15 }
 0x1b6   : > { %v4074_v26 = vpop.eup %3009  ;;  %5686 = vst [vmem:[#allocation77_spill] sm:$0xff] %v4107_v28  ;;  %v1803_v15 = vmul.f32 1.442695, %v1717_v31  ;;  %v886_v28 = vadd.f32 1.0, %v822_v62 }
 0x1b7   : > { %5678 = vst [vmem:[#allocation69_spill] sm:$0xff] %v4074_v26  ;;  %v4080_v14 = vpop.f32.mrb[42].mxu0  ;;  %v4090_v46 = vpop.eup %3011  ;;  %v1248_v42 = vadd.f32 1.4214138, %v1184_v60  ;;  %v1801_v56 = vmul.f32 1.442695, %v1716_v35 }
 0x1b8   : > { %v4095_v61 = vpop.f32.mrb[43].mxu0  ;;  %v4097_v0 = vpop.eup %3013  ;;  %v1655_v20 = vsub.f32 0.0, %v759_v36  ;;  %v1058_v60 = vmul.f32 1.0614054, %v3837_v52  ;;  %v760_v35 = vand.u32 2147483647, %v4093_v27 }
 0x1b9   : > { %5682 = vst [vmem:[#allocation73_spill] sm:$0xff] %v4095_v61  ;;  %5683 = vst [vmem:[#allocation74_spill] sm:$0xff] %v4097_v0  ;;  %v1312_v26 = vmul.f32 %v3799_v59, %v1248_v42  ;;  %v4104_v21 = vpop.eup %3015  ;;  %3031 = vpow2.f32 %v1801_v56  ;;  %v823_v43 = vmul.f32 0.3275911, %v759_v36 }
 0x1ba   : > { %5685 = vst [vmem:[#allocation76_spill] sm:$0xff] %v4104_v21  ;;  %v4110_v22 = vpop.eup %3017  ;;  %v1122_v42 = vadd.f32 -1.4531521, %v1058_v60  ;;  %3033 = vrcp.f32 %v885_v12  ;;  %v4117_v21 = vmul.f32 0.5, %v4034_v33  ;;  %v1719_v27 = vmul.f32 %v1655_v20, %v759_v36 }
 0x1bb   : > { %v1376_v29 = vadd.f32 -0.28449672, %v1312_v26  ;;  %v4112_v0 = vpop.f32.mrb[44].mxu0  ;;  %v4114_v61 = vpop.eup %3019  ;;  %v761_v26 = vand.u32 2147483647, %v4101_v48  ;;  %v1656_v31 = vsub.f32 0.0, %v760_v35  ;;  %3035 = vpow2.f32 %v1803_v15 }
 0x1bc   : > { %5687 = vst [vmem:[#allocation78_spill] sm:$0xff] %v4114_v61  ;;  %5688 = vst [vmem:[#allocation79_spill] sm:$0xff] %v4117_v21  ;;  %v1186_v56 = vmul.f32 %v3837_v52, %v1122_v42  ;;  %v1057_v12 = vmul.f32 1.0614054, %v3828_v39  ;;  %v1805_v33 = vmul.f32 1.442695, %v1718_v10  ;;  %v4128_v62 = vpop.eup %3021  ;;  %3037 = vrcp.f32 %v886_v28 }
 0x1bd   : > { %v1440_v2 = vmul.f32 %v3799_v59, %v1376_v29  ;;  %v824_v60 = vmul.f32 0.3275911, %v760_v35  ;;  %v887_v36 = vadd.f32 1.0, %v823_v43  ;;  %v4131_v20 = vmul.f32 0.5, %v4069_v40  ;;  %v4134_v21 = vpop.eup %3023 }
 0x1be   : > { %v1250_v29 = vadd.f32 1.4214138, %v1186_v56  ;;  %v1807_v58 = vmul.f32 1.442695, %v1719_v27  ;;  %v1657_v48 = vsub.f32 0.0, %v761_v26  ;;  %v4137_v15 = vpop.eup %3025  ;;  %v1720_v10 = vmul.f32 %v1656_v31, %v760_v35 }
 0x1bf   : > { %v1504_v55 = vadd.f32 0.2548296, %v1440_v2  ;;  %5689 = vst [vmem:[#allocation80_spill] sm:$0xff] %v4131_v20  ;;  %v1121_v2 = vadd.f32 -1.4531521, %v1057_v12  ;;  %5690 = vst [vmem:[#allocation81_spill] sm:$0xff] %v4137_v15  ;;  %v4144_v20 = vpop.eup %3027  ;;  %3039 = vpow2.f32 %v1805_v33  ;;  %v501_v27 = vadd.f32 %v3900_v16, %v3695_v8 }
 0x1c0   : > { %v1314_v61 = vmul.f32 %v3837_v52, %v1250_v29  ;;  %v4141_v43 = vmul.f32 0.70710677, %v4124_v3  ;;  %5692 = vst [vmem:[#allocation83_spill] sm:$0xff] %v4144_v20  ;;  %3041 = vrcp.f32 %v887_v36  ;;  %v825_v12 = vmul.f32 0.3275911, %v761_v26 }
 0x1c1   : > { %v1568_v42 = vmul.f32 %v3799_v59, %v1504_v55  ;;  %v1185_v40 = vmul.f32 %v3828_v39, %v1121_v2  ;;  %v888_v59 = vadd.f32 1.0, %v824_v60  ;;  %v4148_v55 = vpop.eup %3029  ;;  %3043 = vpow2.f32 %v1807_v58 }
 0x1c2   : > { %5691 = vst [vmem:[#allocation82_spill] sm:$0xff] %v4141_v43  ;;  %v1378_v28 = vadd.f32 -0.28449672, %v1314_v61  ;;  %v1060_v33 = vmul.f32 1.0614054, %v3876_v11 }
 0x1c3   : > { %v1888_v56 = vmul.f32 %v3823_v25, %v1568_v42  ;;  %v1249_v31 = vadd.f32 1.4214138, %v1185_v40  ;;  %v4150_v25 = vpop.f32.mrb[45].mxu0  ;;  %v4152_v29 = vpop.eup %3031  ;;  %v1721_v42 = vmul.f32 %v1657_v48, %v761_v26  ;;  %v1809_v16 = vmul.f32 1.442695, %v1720_v10 }
 0x1c4   : > { %5693 = vst [vmem:[#allocation84_spill] sm:$0xff] %v4152_v29  ;;  %v1442_v2 = vmul.f32 %v3837_v52, %v1378_v28  ;;  %v4156_v60 = vpop.eup %3033  ;;  %v762_v20 = vand.u32 2147483647, %v4141_v43  ;;  %3045 = vrcp.f32 %v888_v59  ;;  %v4163_v40 = vmul.f32 0.70710677, %v501_v27  ;;  %v4165_v48 = vpop.f32.mrb[46].mxu0 }
 0x1c5   : > { %v1952_v35 = vsub.f32 1.0, %v1888_v56  ;;  %5694 = vst [vmem:[#allocation85_spill] sm:$0xff] %v4156_v60  ;;  %v1313_v36 = vmul.f32 %v3828_v39, %v1249_v31  ;;  %v4161_v56 = vmul.f32 0.5, %v4088_v63  ;;  %v889_v26 = vadd.f32 1.0, %v825_v12  ;;  %v4170_v43 = vpop.eup %3035 }
 0x1c6   : > { %5696 = vst [vmem:[#allocation87_spill] sm:$0xff] %v4163_v40  ;;  %v1506_v58 = vadd.f32 0.2548296, %v1442_v2  ;;  %v1124_v60 = vadd.f32 -1.4531521, %v1060_v33  ;;  %3047 = vpow2.f32 %v1809_v16  ;;  %v4177_v15 = vpop.eup %3037 }
 0x1c7   : > { %v2080_v61 = vsub.f32 0.0, %v1952_v35  ;;  %5695 = vst [vmem:[#allocation86_spill] sm:$0xff] %v4161_v56  ;;  %v1377_v28 = vadd.f32 -0.28449672, %v1313_v36  ;;  %v1811_v31 = vmul.f32 1.442695, %v1721_v42  ;;  %v503_v56 = vadd.f32 %v3909_v44, %v3701_v17 }
 0x1c8   : > { %v1570_v63 = vmul.f32 %v3837_v52, %v1506_v58  ;;  %v826_v2 = vmul.f32 0.3275911, %v762_v20  ;;  %v1188_v12 = vmul.f32 %v3876_v11, %v1124_v60  ;;  %v763_v33 = vand.u32 2147483647, %v4163_v40 }
 0x1c9   : > { %v2144_v10 = vsel %vm2016_vm1, %v1952_v35, %v2080_v61  ;;  %v1441_v29 = vmul.f32 %v3828_v39, %v1377_v28  ;;  %v1658_v35 = vsub.f32 0.0, %v762_v20  ;;  %3049 = vrcp.f32 %v889_v26  ;;  %v4185_v61 = vpop.eup %3039 }
 0x1ca   : > { %v2208_v59 = vadd.f32 1.0, %v2144_v10  ;;  %v1890_v42 = vmul.f32 %v3861_v18, %v1570_v63  ;;  %v4183_v52 = vmul.f32 0.5, %v4124_v3  ;;  %v1252_v16 = vadd.f32 1.4214138, %v1188_v12  ;;  %v4192_v58 = vpop.eup %3041  ;;  %v4202_v63 = vpop.f32.mrb[47].mxu0 }
 0x1cb   : > { %v1505_v44 = vadd.f32 0.2548296, %v1441_v29  ;;  %3051 = vpow2.f32 %v1811_v31  ;;  %v4188_v60 = vmul.f32 0.5, %v501_v27  ;;  %v4190_v36 = vmul.f32 0.70710677, %v503_v56  ;;  %v4199_v10 = vpop.eup %3043 }
 0x1cc   : > { %v2272_v24 = vmul.f32 %v2208_v59, %v3753_v1  ;;  %5697 = vst [vmem:[#allocation88_spill] sm:$0xff] %v4183_v52  ;;  %v1954_v1 = vsub.f32 1.0, %v1890_v42  ;;  %v890_v18 = vadd.f32 1.0, %v826_v2  ;;  %v507_v29 = vadd.f32 %v3926_v9, %v3695_v8 }
 0x1cd   : > { %5698 = vst [vmem:[#allocation89_spill] sm:$0xff] %v4188_v60  ;;  %5699 = vst [vmem:[#allocation90_spill] sm:$0xff] %v4190_v36  ;;  %v1569_v3 = vmul.f32 %v3828_v39, %v1505_v44  ;;  %v1316_v26 = vmul.f32 %v3876_v11, %v1252_v16  ;;  %v1722_v28 = vmul.f32 %v1658_v35, %v762_v20  ;;  %v827_v27 = vmul.f32 0.3275911, %v763_v33 }
 0x1ce   : > { %2438 = vmatprep.mubr.f32.mxu0 %v2272_v24  ;;  %v2082_v31 = vsub.f32 0.0, %v1954_v1  ;;  %v1059_v59 = vmul.f32 1.0614054, %v3869_v41  ;;  %v1659_v12 = vsub.f32 0.0, %v763_v33  ;;  %v4204_v2 = vmul.f32 0.5, %v503_v56  ;;  %v4207_v24 = vpop.eup %3045 }
 0x1cf   : > { %2439 = vmatmul.mubr.f32.vlgmr.msra.gmra.mrb[64].mxu0 %v4008_v32  ;;  %v1889_v32 = vmul.f32 %v3846_v50, %v1569_v3  ;;  %v1380_v39 = vadd.f32 -0.28449672, %v1316_v26  ;;  %v764_v42 = vand.u32 2147483647, %v4190_v36  ;;  %v1062_v35 = vmul.f32 1.0614054, %v3911_v7 }
 0x1d0   : > { %5700 = vst [vmem:[#allocation91_spill] sm:$0xff] %v4204_v2  ;;  %v2146_v9 = vsel %vm2018_vm2, %v1954_v1, %v2082_v31  ;;  %v1123_v20 = vadd.f32 -1.4531521, %v1059_v59  ;;  %v4213_v60 = vmul.f32 0.70710677, %v507_v29  ;;  %v891_v40 = vadd.f32 1.0, %v827_v27  ;;  %v4221_v1 = vpop.eup %3047 }
 0x1d1   : > { %v2210_v44 = vadd.f32 1.0, %v2146_v9  ;;  %v1953_v16 = vsub.f32 1.0, %v1889_v32  ;;  %v1444_v56 = vmul.f32 %v3876_v11, %v1380_v39  ;;  %v1813_v2 = vmul.f32 1.442695, %v1722_v28 }
 0x1d2   : > { %5701 = vst [vmem:[#allocation92_spill] sm:$0xff] %v4213_v60  ;;  %v4218_v50 = vadd.f32 %v3931_v19, %v3701_v17  ;;  %v1187_v34 = vmul.f32 %v3869_v41, %v1123_v20  ;;  %v1126_v59 = vadd.f32 -1.4531521, %v1062_v35  ;;  %3053 = vrcp.f32 %v890_v18 }
 0x1d3   : > { %v2274_v3 = vmul.f32 %v2210_v44, %v3773_v23  ;;  %v2081_v26 = vsub.f32 0.0, %v1953_v16  ;;  %v1508_v31 = vadd.f32 0.2548296, %v1444_v56  ;;  %v1723_v32 = vmul.f32 %v1659_v12, %v763_v33  ;;  %v4225_v27 = vpop.eup %3049  ;;  %v4232_v44 = vpop.f32.mrb[48].mxu0 }
 0x1d4   : > { %v1660_v39 = vsub.f32 0.0, %v764_v42  ;;  %v1251_v28 = vadd.f32 1.4214138, %v1187_v34  ;;  %v765_v9 = vand.u32 2147483647, %v4213_v60  ;;  %v1190_v23 = vmul.f32 %v3911_v7, %v1126_v59 }
 0x1d5   : > { %2443 = vmatprep.mubr.f32.mxu0 %v2274_v3  ;;  %v2145_v19 = vsel %vm2017_vm3, %v1953_v16, %v2081_v26  ;;  %v1572_v20 = vmul.f32 %v3876_v11, %v1508_v31  ;;  %v4234_v35 = vpop.eup %3051  ;;  %3055 = vpow2.f32 %v1813_v2  ;;  %v828_v33 = vmul.f32 0.3275911, %v764_v42  ;;  %v5704_v11 = vld [vmem:[#allocation14_spill] sm:$0xff]  ;;  %v5705_v31 = vld [vmem:[#allocation41_spill] sm:$0xff] }
 0x1d6   : > { %5702 = vst [vmem:[#allocation93_spill] sm:$0xff] %v4234_v35  ;;  %v2209_v18 = vadd.f32 1.0, %v2145_v19  ;;  %v1315_v12 = vmul.f32 %v3869_v41, %v1251_v28  ;;  %3057 = vrcp.f32 %v891_v40  ;;  %v4239_v30 = vmul.f32 0.70710677, %v4218_v50 }
 0x1d7   : > { %v1892_v56 = vmul.f32 %v3896_v57, %v1572_v20  ;;  %v1254_v16 = vadd.f32 1.4214138, %v1190_v23  ;;  %v1815_v34 = vmul.f32 1.442695, %v1723_v32  ;;  %v4244_v59 = vadd.f32 %v5705_v31, %v3695_v8  ;;  %v5707_v23 = vld [vmem:[#allocation33_spill] sm:$0xff] }
 0x1d8   : > { %5703 = vst [vmem:[#allocation94_spill] sm:$0xff] %v4239_v30  ;;  %v2273_v3 = vmul.f32 %v2209_v18, %v5704_v11  ;;  %v1379_v26 = vadd.f32 -0.28449672, %v1315_v12  ;;  %v1724_v2 = vmul.f32 %v1660_v39, %v764_v42  ;;  %v1661_v60 = vsub.f32 0.0, %v765_v9 }
 0x1d9   : > { %v1956_v19 = vsub.f32 1.0, %v1892_v56  ;;  %v1318_v28 = vmul.f32 %v3911_v7, %v1254_v16  ;;  %v4247_v40 = vmul.f32 0.5, %v507_v29  ;;  %v829_v57 = vmul.f32 0.3275911, %v765_v9  ;;  %v5709_v56 = vld [vmem:[#allocation12_spill] sm:$0xff] }
 0x1da   : > { %2444 = vmatmul.mubr.f32.gmra.mrb[66].mxu0 %v2273_v3  ;;  %v1443_v20 = vmul.f32 %v3869_v41, %v1379_v26  ;;  %v1061_v32 = vmul.f32 1.0614054, %v5707_v23  ;;  %v892_v52 = vadd.f32 1.0, %v828_v33  ;;  %v766_v12 = vand.u32 2147483647, %v4239_v30 }
 0x1db   : > { %5706 = vst [vmem:[#allocation14_spill] sm:$0xff] %v4247_v40  ;;  %v2084_v18 = vsub.f32 0.0, %v1956_v19  ;;  %v1382_v11 = vadd.f32 -0.28449672, %v1318_v28  ;;  %3059 = vpow2.f32 %v1815_v34  ;;  %v4253_v42 = vmul.f32 0.70710677, %v4244_v59 }
 0x1dc   : > { %v1507_v31 = vadd.f32 0.2548296, %v1443_v20  ;;  %v1125_v39 = vadd.f32 -1.4531521, %v1061_v32  ;;  %vm2019_vm5 = vcmp.ge.f32.partialorder %v5709_v56, 0.0  ;;  %v1725_v16 = vmul.f32 %v1661_v60, %v765_v9  ;;  %v4259_v33 = vpop.eup %3053  ;;  %v4263_v20 = vpop.f32.mrb[49].mxu0 }
 0x1dd   : > { %5708 = vst [vmem:[#allocation41_spill] sm:$0xff] %v4253_v42  ;;  %v1817_v29 = vmul.f32 1.442695, %v1724_v2  ;;  %v2148_v3 = vsel %vm2020_vm4, %v1956_v19, %v2084_v18  ;;  %v1446_v26 = vmul.f32 %v3911_v7, %v1382_v11  ;;  %v893_v40 = vadd.f32 1.0, %v829_v57  ;;  %v5712_v2 = vld [vmem:[#allocation21_spill] sm:$0xff]  ;;  %v5713_v18 = vld [vmem:[#allocation32_spill] sm:$0xff] }
 0x1de   : > { %v2212_v30 = vadd.f32 1.0, %v2148_v3  ;;  %v1571_v34 = vmul.f32 %v3869_v41, %v1507_v31  ;;  %v1189_v28 = vmul.f32 %v5707_v23, %v1125_v39  ;;  %3061 = vrcp.f32 %v892_v52  ;;  %v4275_v35 = vpop.f32.mrb[50].mxu0  ;;  %v5722_v56 = vld [vmem:[#allocation13_spill] sm:$0xff] }
 0x1df   : > { %v830_v32 = vmul.f32 0.3275911, %v766_v12  ;;  %v1510_v36 = vadd.f32 0.2548296, %v1446_v26  ;;  %v1064_v60 = vmul.f32 1.0614054, %v3955_v38  ;;  %v4266_v9 = vpop.eup %3055  ;;  %3063 = vpow2.f32 %v1817_v29 }
 0x1e0   : > { %5710 = vst [vmem:[#allocation33_spill] sm:$0xff] %v4266_v9  ;;  %v2276_v19 = vmul.f32 %v2212_v30, %v5712_v2  ;;  %v1891_v57 = vmul.f32 %v5713_v18, %v1571_v34  ;;  %v767_v11 = vand.u32 2147483647, %v4253_v42  ;;  %v1253_v41 = vadd.f32 1.4214138, %v1189_v28  ;;  %v4272_v31 = vpop.eup %3057  ;;  %v5716_v2 = vld [vmem:[#allocation40_spill] sm:$0xff] }
 0x1e1   : > { %5714 = vst [vmem:[#allocation12_spill] sm:$0xff] %v4272_v31  ;;  %v1819_v39 = vmul.f32 1.442695, %v1725_v16  ;;  %v1662_v3 = vsub.f32 0.0, %v766_v12  ;;  %v1574_v52 = vmul.f32 %v3911_v7, %v1510_v36  ;;  %v1128_v26 = vadd.f32 -1.4531521, %v1064_v60 }
 0x1e2   : > { %2448 = vmatprep.mubr.f32.mxu0 %v2276_v19  ;;  %v1955_v9 = vsub.f32 1.0, %v1891_v57  ;;  %v515_v30 = vadd.f32 %v3953_v5, %v3701_v17  ;;  %v1317_v34 = vmul.f32 %v5707_v23, %v1253_v41  ;;  %3065 = vrcp.f32 %v893_v40 }
 0x1e3   : > { %v4281_v28 = vmul.f32 0.5, %v4218_v50  ;;  %v1894_v16 = vmul.f32 %v5716_v2, %v1574_v52  ;;  %v1192_v18 = vmul.f32 %v3955_v38, %v1128_v26  ;;  %v894_v7 = vadd.f32 1.0, %v830_v32  ;;  %v5719_v32 = vld [vmem:[#allocation46_spill] sm:$0xff] }
 0x1e4   : > { %v2083_v36 = vsub.f32 0.0, %v1955_v9  ;;  %v1663_v60 = vsub.f32 0.0, %v767_v11  ;;  %v1381_v42 = vadd.f32 -0.28449672, %v1317_v34  ;;  %3067 = vpow2.f32 %v1819_v39  ;;  %v5720_v34 = vld [vmem:[#allocation42_spill] sm:$0xff] }
 0x1e5   : > { %5715 = vst [vmem:[#allocation15_spill] sm:$0xff] %v4281_v28  ;;  %v1726_v29 = vmul.f32 %v1662_v3, %v766_v12  ;;  %v1958_v19 = vsub.f32 1.0, %v1894_v16  ;;  %v1256_v57 = vadd.f32 1.4214138, %v1192_v18  ;;  %v4285_v31 = vpop.eup %3059  ;;  %v831_v40 = vmul.f32 0.3275911, %v767_v11 }
 0x1e6   : > { %5717 = vst [vmem:[#allocation21_spill] sm:$0xff] %v4285_v31  ;;  %v2147_v5 = vsel %vm2019_vm5, %v1955_v9, %v2083_v36  ;;  %v4289_v50 = vmul.f32 0.70710677, %v515_v30  ;;  %v1445_v41 = vmul.f32 %v5707_v23, %v1381_v42  ;;  %v519_v2 = vadd.f32 %v5719_v32, %v3695_v8  ;;  %v5723_v36 = vld [vmem:[#allocation19_spill] sm:$0xff] }
 0x1e7   : > { %v2211_v52 = vadd.f32 1.0, %v2147_v5  ;;  %v2086_v26 = vsub.f32 0.0, %v1958_v19  ;;  %v1320_v39 = vmul.f32 %v3955_v38, %v1256_v57  ;;  %3069 = vrcp.f32 %v894_v7 }
 0x1e8   : > { %5718 = vst [vmem:[#allocation32_spill] sm:$0xff] %v4289_v50  ;;  %v1727_v12 = vmul.f32 %v1663_v60, %v767_v11  ;;  %v1509_v3 = vadd.f32 0.2548296, %v1445_v41  ;;  %v1063_v16 = vmul.f32 1.0614054, %v5720_v34  ;;  %v4296_v18 = vpop.eup %3061  ;;  %vm2021_vm7 = vcmp.ge.f32.partialorder %v5722_v56, 0.0 }
 0x1e9   : > { %5721 = vst [vmem:[#allocation40_spill] sm:$0xff] %v4296_v18  ;;  %v1821_v9 = vmul.f32 1.442695, %v1726_v29  ;;  %v2275_v28 = vmul.f32 %v2211_v52, %v5723_v36  ;;  %v2150_v42 = vsel %vm2022_vm6, %v1958_v19, %v2086_v26  ;;  %v1384_v5 = vadd.f32 -0.28449672, %v1320_v39  ;;  %v4308_v18 = vpop.f32.mrb[51].mxu0  ;;  %v4310_v52 = vpop.eup %3063 }
 0x1ea   : > { %v2214_v31 = vadd.f32 1.0, %v2150_v42  ;;  %v768_v32 = vand.u32 2147483647, %v4289_v50  ;;  %v1573_v7 = vmul.f32 %v5707_v23, %v1509_v3  ;;  %v1127_v11 = vadd.f32 -1.4531521, %v1063_v16  ;;  %5725 = vst [vmem:[#allocation42_spill] sm:$0xff] %v4310_v52 }
 0x1eb   : > { %2449 = vmatmul.mubr.f32.gmra.mrb[68].mxu0 %v2275_v28  ;;  %v895_v60 = vadd.f32 1.0, %v831_v40  ;;  %v4304_v57 = vmul.f32 0.70710677, %v519_v2  ;;  %v1448_v41 = vmul.f32 %v3955_v38, %v1384_v5  ;;  %v1066_v29 = vmul.f32 1.0614054, %v3992_v13  ;;  %v5726_v19 = vld [vmem:[#allocation24_spill] sm:$0xff] }
 0x1ec   : > { %v1823_v49 = vmul.f32 1.442695, %v1727_v12  ;;  %v2278_v26 = vmul.f32 %v2214_v31, %v5726_v19  ;;  %v5727_v39 = vld [vmem:[#allocation34_spill] sm:$0xff]  ;;  %v1191_v23 = vmul.f32 %v5720_v34, %v1127_v11  ;;  %v4315_v3 = vpop.eup %3065  ;;  %3071 = vpow2.f32 %v1821_v9 }
 0x1ed   : > { %5724 = vst [vmem:[#allocation46_spill] sm:$0xff] %v4304_v57  ;;  %v1893_v36 = vmul.f32 %v5727_v39, %v1573_v7  ;;  %5728 = vst [vmem:[#allocation13_spill] sm:$0xff] %v4315_v3  ;;  %v4318_v28 = vmul.f32 0.5, %v4244_v59  ;;  %v1512_v40 = vadd.f32 0.2548296, %v1448_v41  ;;  %v4322_v16 = vadd.f32 %v3975_v4, %v3701_v17  ;;  %v4331_v39 = vpop.f32.mrb[52].mxu0 }
 0x1ee   : > { %2453 = vmatprep.mubr.f32.mxu0 %v2278_v26  ;;  %v4324_v42 = vmul.f32 0.5, %v515_v30  ;;  %v1664_v12 = vsub.f32 0.0, %v768_v32  ;;  %v1255_v5 = vadd.f32 1.4214138, %v1191_v23  ;;  %v4326_v7 = vpop.eup %3067  ;;  %3073 = vrcp.f32 %v895_v60  ;;  %v5732_v30 = vld [vmem:[#allocation44_spill] sm:$0xff]  ;;  %v5738_v3 = vld [vmem:[#allocation22_spill] sm:$0xff] }
 0x1ef   : > { %5729 = vst [vmem:[#allocation19_spill] sm:$0xff] %v4318_v28  ;;  %v1957_v31 = vsub.f32 1.0, %v1893_v36  ;;  %5731 = vst [vmem:[#allocation34_spill] sm:$0xff] %v4326_v7  ;;  %v769_v11 = vand.u32 2147483647, %v4304_v57  ;;  %v1576_v9 = vmul.f32 %v3955_v38, %v1512_v40  ;;  %3075 = vpow2.f32 %v1823_v49  ;;  %v5736_v28 = vld [vmem:[#allocation47_spill] sm:$0xff] }
 0x1f0   : > { %5730 = vst [vmem:[#allocation24_spill] sm:$0xff] %v4324_v42  ;;  %v1130_v59 = vadd.f32 -1.4531521, %v1066_v29  ;;  %v832_v41 = vmul.f32 0.3275911, %v768_v32  ;;  %v1319_v4 = vmul.f32 %v5720_v34, %v1255_v5  ;;  %v4339_v60 = vadd.f32 %v3997_v45, %v3695_v8  ;;  %v5737_v7 = vld [vmem:[#allocation16_spill] sm:$0xff] }
 0x1f1   : > { %v2085_v19 = vsub.f32 0.0, %v1957_v31  ;;  %v1896_v26 = vmul.f32 %v5732_v30, %v1576_v9  ;;  %v4335_v36 = vmul.f32 0.70710677, %v4322_v16  ;;  %v4342_v38 = vpop.eup %3069  ;;  %v1728_v29 = vmul.f32 %v1664_v12, %v768_v32 }
 0x1f2   : > { %v1194_v23 = vmul.f32 %v3992_v13, %v1130_v59  ;;  %5734 = vst [vmem:[#allocation95_spill] sm:$0xff] %v4342_v38  ;;  %v4346_v40 = vmul.f32 0.5, %v519_v2  ;;  %v1383_v5 = vadd.f32 -0.28449672, %v1319_v4  ;;  %v1665_v9 = vsub.f32 0.0, %v769_v11 }
 0x1f3   : > { %5733 = vst [vmem:[#allocation44_spill] sm:$0xff] %v4335_v36  ;;  %v2149_v49 = vsel %vm2021_vm7, %v1957_v31, %v2085_v19  ;;  %v1960_v30 = vsub.f32 1.0, %v1896_v26  ;;  %v1065_v42 = vmul.f32 1.0614054, %v5736_v28  ;;  %v896_v50 = vadd.f32 1.0, %v832_v41  ;;  %v5740_v31 = vld [vmem:[#allocation18_spill] sm:$0xff] }
 0x1f4   : > { %5735 = vst [vmem:[#allocation96_spill] sm:$0xff] %v4346_v40  ;;  %v2213_v57 = vadd.f32 1.0, %v2149_v49  ;;  %v616_v45 = vmul.f32 0.5, %v5737_v7  ;;  %v1447_v52 = vmul.f32 %v5720_v34, %v1383_v5  ;;  %v1258_v59 = vadd.f32 1.4214138, %v1194_v23  ;;  %v5742_v7 = vld [vmem:[#allocation17_spill] sm:$0xff] }
 0x1f5   : > { %v2088_v32 = vsub.f32 0.0, %v1960_v30  ;;  %v770_v56 = vand.u32 2147483647, %v4335_v36  ;;  %v4354_v2 = vmul.f32 0.70710677, %v4339_v60  ;;  %vm2024_vm8 = vcmp.ge.f32.partialorder %v5740_v31, 0.0 }
 0x1f6   : > { %v2277_v38 = vmul.f32 %v2213_v57, %v5738_v3  ;;  %v1825_v12 = vmul.f32 1.442695, %v1728_v29  ;;  %v1511_v19 = vadd.f32 0.2548296, %v1447_v52  ;;  %v1322_v4 = vmul.f32 %v3992_v13, %v1258_v59  ;;  %v4358_v41 = vpop.eup %3071 }
 0x1f7   : > { %5739 = vst [vmem:[#allocation47_spill] sm:$0xff] %v4354_v2  ;;  %5741 = vst [vmem:[#allocation16_spill] sm:$0xff] %v4358_v41  ;;  %vm2023_vm9 = vcmp.ge.f32.partialorder %v5742_v7, 0.0  ;;  %v833_v26 = vmul.f32 0.3275911, %v769_v11  ;;  %v1729_v23 = vmul.f32 %v1665_v9, %v769_v11  ;;  %v2152_v57 = vsel %vm2024_vm8, %v1960_v30, %v2088_v32  ;;  %v4366_v41 = vpop.f32.mrb[53].mxu0 }
 0x1f8   : > { %2454 = vmatmul.mubr.f32.gmra.mrb[70].mxu0 %v2277_v38  ;;  %v1129_v3 = vadd.f32 -1.4531521, %v1065_v42  ;;  %3077 = vrcp.f32 %v896_v50  ;;  %v2216_v49 = vadd.f32 1.0, %v2152_v57  ;;  %v1575_v5 = vmul.f32 %v5720_v34, %v1511_v19  ;;  %v4362_v29 = vpop.eup %3073  ;;  %v5745_v42 = vld [vmem:[#allocation43_spill] sm:$0xff] }
 0x1f9   : > { %v1386_v40 = vadd.f32 -0.28449672, %v1322_v4  ;;  %5743 = vst [vmem:[#allocation22_spill] sm:$0xff] %v4362_v29  ;;  %v834_v31 = vmul.f32 0.3275911, %v770_v56  ;;  %v1666_v52 = vsub.f32 0.0, %v770_v56  ;;  %v4368_v38 = vpop.eup %3075  ;;  %3079 = vpow2.f32 %v1825_v12 }
 0x1fa   : > { %v771_v59 = vand.u32 2147483647, %v4354_v2  ;;  %v1193_v36 = vmul.f32 %v5736_v28, %v1129_v3  ;;  %5744 = vst [vmem:[#allocation18_spill] sm:$0xff] %v4368_v38  ;;  %v2280_v11 = vmul.f32 %v2216_v49, %v616_v45  ;;  %v1895_v50 = vmul.f32 %v5745_v42, %v1575_v5  ;;  %v5747_v12 = vld [vmem:[#allocation23_spill] sm:$0xff] }
 0x1fb   : > { %v1450_v9 = vmul.f32 %v3992_v13, %v1386_v40  ;;  %v897_v34 = vadd.f32 1.0, %v833_v26  ;;  %v1827_v30 = vmul.f32 1.442695, %v1729_v23  ;;  %v527_v32 = vadd.f32 %v4005_v47, %v3701_v17  ;;  %v4380_v26 = vpop.f32.mrb[54].mxu0 }
 0x1fc   : > { %v1257_v19 = vadd.f32 1.4214138, %v1193_v36  ;;  %2458 = vmatprep.mubr.f32.mxu1 %v2280_v11  ;;  %v4375_v4 = vmul.f32 0.5, %v4322_v16  ;;  %v1959_v57 = vsub.f32 1.0, %v1895_v50  ;;  %v1068_v2 = vmul.f32 1.0614054, %v4036_v54 }
 0x1fd   : > { %v1514_v3 = vadd.f32 0.2548296, %v1450_v9  ;;  %vm2026_vm10 = vcmp.ge.f32.partialorder %v5747_v12, 0.0  ;;  %v898_v45 = vadd.f32 1.0, %v834_v31  ;;  %v1730_v49 = vmul.f32 %v1666_v52, %v770_v56 }
 0x1fe   : > { %5746 = vst [vmem:[#allocation17_spill] sm:$0xff] %v4375_v4  ;;  %v835_v5 = vmul.f32 0.3275911, %v771_v59  ;;  %v1321_v40 = vmul.f32 %v5736_v28, %v1257_v19  ;;  %v2087_v23 = vsub.f32 0.0, %v1959_v57  ;;  %v4385_v16 = vadd.f32 %v4020_v37, %v3695_v8 }
 0x1ff   : > { %v1578_v47 = vmul.f32 %v3992_v13, %v1514_v3  ;;  %v1132_v36 = vadd.f32 -1.4531521, %v1068_v2  ;;  %3081 = vrcp.f32 %v897_v34  ;;  %v1667_v11 = vsub.f32 0.0, %v771_v59 }
 0x200   : > { %v4387_v42 = vmul.f32 0.70710677, %v527_v32  ;;  %v1385_v50 = vadd.f32 -0.28449672, %v1321_v40  ;;  %v2151_v56 = vsel %vm2023_vm9, %v1959_v57, %v2087_v23  ;;  %v1067_v9 = vmul.f32 1.0614054, %v4010_v53 }
 0x201   : > { %v1898_v31 = vmul.f32 %v3999_v51, %v1578_v47  ;;  %v1196_v52 = vmul.f32 %v4036_v54, %v1132_v36  ;;  %3083 = vpow2.f32 %v1827_v30  ;;  %v1829_v13 = vmul.f32 1.442695, %v1730_v49  ;;  %v5750_v57 = vld [vmem:[#allocation27_spill] sm:$0xff]  ;;  %v5752_v30 = vld [vmem:[#allocation20_spill] sm:$0xff] }
 0x202   : > { %5748 = vst [vmem:[#allocation43_spill] sm:$0xff] %v4387_v42  ;;  %v2215_v19 = vadd.f32 1.0, %v2151_v56  ;;  %v1449_v37 = vmul.f32 %v5736_v28, %v1385_v50  ;;  %v4395_v2 = vpop.eup %3077  ;;  %3085 = vrcp.f32 %v898_v45  ;;  %v4398_v3 = vmul.f32 0.70710677, %v4385_v16 }
 0x203   : > { %v1962_v34 = vsub.f32 1.0, %v1898_v31  ;;  %v1260_v7 = vadd.f32 1.4214138, %v1196_v52  ;;  %v899_v51 = vadd.f32 1.0, %v835_v5  ;;  %v1131_v47 = vadd.f32 -1.4531521, %v1067_v9  ;;  %v4401_v36 = vpop.eup %3079 }
 0x204   : > { %5749 = vst [vmem:[#allocation23_spill] sm:$0xff] %v4398_v3  ;;  %v2279_v40 = vmul.f32 %v2215_v19, %v5750_v57  ;;  %v1513_v23 = vadd.f32 0.2548296, %v1449_v37  ;;  %5751 = vst [vmem:[#allocation27_spill] sm:$0xff] %v4401_v36  ;;  %vm2025_vm11 = vcmp.ge.f32.partialorder %v5752_v30, 0.0  ;;  %v1731_v49 = vmul.f32 %v1667_v11, %v771_v59  ;;  %v5754_v19 = vld [vmem:[#allocation66_spill] sm:$0xff] }
 0x205   : > { %v2090_v56 = vsub.f32 0.0, %v1962_v34  ;;  %v772_v50 = vand.u32 2147483647, %v4387_v42  ;;  %v1324_v45 = vmul.f32 %v4036_v54, %v1260_v7  ;;  %v4407_v31 = vmul.f32 0.5, %v4339_v60  ;;  %v4412_v37 = vpop.f32.mrb[55].mxu0  ;;  %v5756_v60 = vld [vmem:[#allocation49_spill] sm:$0xff] }
 0x206   : > { %2459 = vmatmul.mubr.f32.vlgmr.msra.gmra.mrb[0].mxu1 %v2279_v40  ;;  %v1577_v52 = vmul.f32 %v5736_v28, %v1513_v23  ;;  %v1195_v5 = vmul.f32 %v4010_v53, %v1131_v47  ;;  %v1070_v9 = vmul.f32 1.0614054, %v5754_v19  ;;  %3087 = vpow2.f32 %v1829_v13  ;;  %v5758_v13 = vld [vmem:[#allocation29_spill] sm:$0xff]  ;;  %v4444_v36 = vpop.f32.mrb[56].mxu0 }
 0x207   : > { %5753 = vst [vmem:[#allocation20_spill] sm:$0xff] %v4407_v31  ;;  %v2154_v59 = vsel %vm2026_vm10, %v1962_v34, %v2090_v56  ;;  %v773_v11 = vand.u32 2147483647, %v4398_v3  ;;  %v1388_v57 = vadd.f32 -0.28449672, %v1324_v45  ;;  %v4417_v40 = vmul.f32 0.5, %v527_v32 }
 0x208   : > { %v2218_v7 = vadd.f32 1.0, %v2154_v59  ;;  %v1897_v31 = vmul.f32 %v5756_v60, %v1577_v52  ;;  %v1259_v42 = vadd.f32 1.4214138, %v1195_v5  ;;  %3089 = vrcp.f32 %v899_v51 }
 0x209   : > { %5755 = vst [vmem:[#allocation66_spill] sm:$0xff] %v4417_v40  ;;  %v1831_v28 = vmul.f32 1.442695, %v1731_v49  ;;  %v1668_v23 = vsub.f32 0.0, %v772_v50  ;;  %v1452_v47 = vmul.f32 %v4036_v54, %v1388_v57  ;;  %v4421_v4 = vpop.eup %3081  ;;  %v1134_v56 = vadd.f32 -1.4531521, %v1070_v9 }
 0x20a   : > { %5757 = vst [vmem:[#allocation49_spill] sm:$0xff] %v4421_v4  ;;  %v2282_v38 = vmul.f32 %v2218_v7, %v5758_v13  ;;  %v1961_v12 = vsub.f32 1.0, %v1897_v31  ;;  %v1323_v34 = vmul.f32 %v4010_v53, %v1259_v42  ;;  %v836_v45 = vmul.f32 0.3275911, %v772_v50  ;;  %v5759_v40 = vld [vmem:[#allocation56_spill] sm:$0xff]  ;;  %v5761_v49 = vld [vmem:[#allocation26_spill] sm:$0xff] }
 0x20b   : > { %v1669_v59 = vsub.f32 0.0, %v773_v11  ;;  %v1516_v32 = vadd.f32 0.2548296, %v1452_v47  ;;  %v4427_v52 = vadd.f32 %v5759_v40, %v3701_v17  ;;  %v4429_v51 = vpop.eup %3083  ;;  %vm2028_vm12 = vcmp.ge.f32.partialorder %v5761_v49, 0.0  ;;  %v5762_v7 = vld [vmem:[#allocation61_spill] sm:$0xff]  ;;  %v5764_v47 = vld [vmem:[#allocation62_spill] sm:$0xff] }
 0x20c   : > { %5760 = vst [vmem:[#allocation29_spill] sm:$0xff] %v4429_v51  ;;  %2463 = vmatprep.mubr.f32.mxu1 %v2282_v38  ;;  %v2089_v5 = vsub.f32 0.0, %v1961_v12  ;;  %v1387_v57 = vadd.f32 -0.28449672, %v1323_v34  ;;  %v4434_v31 = vadd.f32 %v5762_v7, %v3695_v8  ;;  %v1198_v42 = vmul.f32 %v5754_v19, %v1134_v56  ;;  %v4437_v9 = vpop.eup %3085  ;;  %v5765_v56 = vld [vmem:[#allocation59_spill] sm:$0xff] }
 0x20d   : > { %5763 = vst [vmem:[#allocation56_spill] sm:$0xff] %v4437_v9  ;;  %3091 = vpow2.f32 %v1831_v28  ;;  %v1732_v60 = vmul.f32 %v1668_v23, %v772_v50  ;;  %v1580_v40 = vmul.f32 %v4036_v54, %v1516_v32  ;;  %v1069_v13 = vmul.f32 1.0614054, %v5764_v47  ;;  %v5769_v32 = vld [vmem:[#allocation25_spill] sm:$0xff] }
 0x20e   : > { %v2153_v3 = vsel %vm2025_vm11, %v1961_v12, %v2089_v5  ;;  %v837_v38 = vmul.f32 0.3275911, %v773_v11  ;;  %v1451_v34 = vmul.f32 %v4010_v53, %v1387_v57  ;;  %v1262_v51 = vadd.f32 1.4214138, %v1198_v42  ;;  %v5770_v57 = vld [vmem:[#allocation28_spill] sm:$0xff] }
 0x20f   : > { %v2217_v7 = vadd.f32 1.0, %v2153_v3  ;;  %v1733_v4 = vmul.f32 %v1669_v59, %v773_v11  ;;  %v1900_v29 = vmul.f32 %v5765_v56, %v1580_v40  ;;  %v4448_v28 = vmul.f32 0.70710677, %v4427_v52  ;;  %v5771_v59 = vld [vmem:[#allocation65_spill] sm:$0xff] }
 0x210   : > { %v1515_v50 = vadd.f32 0.2548296, %v1451_v34  ;;  %v4451_v54 = vmul.f32 0.70710677, %v4434_v31  ;;  %v1326_v30 = vmul.f32 %v5754_v19, %v1262_v51  ;;  %v1133_v23 = vadd.f32 -1.4531521, %v1069_v13  ;;  %v4454_v12 = vpop.eup %3087 }
 0x211   : > { %5766 = vst [vmem:[#allocation26_spill] sm:$0xff] %v4448_v28  ;;  %5768 = vst [vmem:[#allocation62_spill] sm:$0xff] %v4454_v12  ;;  %vm2027_vm13 = vcmp.ge.f32.partialorder %v5769_v32, 0.0  ;;  %v900_v5 = vadd.f32 1.0, %v836_v45  ;;  %v2281_v3 = vmul.f32 %v2217_v7, %v5770_v57  ;;  %v1964_v11 = vsub.f32 1.0, %v1900_v29  ;;  %v5774_v57 = vld [vmem:[#allocation57_spill] sm:$0xff] }
 0x212   : > { %5767 = vst [vmem:[#allocation61_spill] sm:$0xff] %v4451_v54  ;;  %v4460_v42 = vadd.f32 %v5771_v59, %v3701_v17  ;;  %v1833_v40 = vmul.f32 1.442695, %v1732_v60  ;;  %v4463_v34 = vmul.f32 0.5, %v4385_v16  ;;  %v1579_v56 = vmul.f32 %v4010_v53, %v1515_v50  ;;  %v4466_v13 = vpop.eup %3089 }
 0x213   : > { %v1390_v51 = vadd.f32 -0.28449672, %v1326_v30  ;;  %5773 = vst [vmem:[#allocation25_spill] sm:$0xff] %v4466_v13  ;;  %2464 = vmatmul.mubr.f32.gmra.mrb[2].mxu1 %v2281_v3  ;;  %v901_v12 = vadd.f32 1.0, %v837_v38  ;;  %v2092_v9 = vsub.f32 0.0, %v1964_v11  ;;  %v1197_v29 = vmul.f32 %v5764_v47, %v1133_v23  ;;  %v4478_v30 = vpop.f32.mrb[57].mxu0 }
 0x214   : > { %5772 = vst [vmem:[#allocation59_spill] sm:$0xff] %v4463_v34  ;;  %v774_v45 = vand.u32 2147483647, %v4448_v28  ;;  %v1835_v7 = vmul.f32 1.442695, %v1733_v4  ;;  %v1899_v59 = vmul.f32 %v5774_v57, %v1579_v56  ;;  %3093 = vrcp.f32 %v900_v5  ;;  %v5777_v56 = vld [vmem:[#allocation31_spill] sm:$0xff] }
 0x215   : > { %v775_v60 = vand.u32 2147483647, %v4451_v54  ;;  %v1454_v16 = vmul.f32 %v5754_v19, %v1390_v51  ;;  %v2156_v53 = vsel %vm2028_vm12, %v1964_v11, %v2092_v9  ;;  %v4476_v50 = vmul.f32 0.70710677, %v4460_v42  ;;  %v5778_v9 = vld [vmem:[#allocation38_spill] sm:$0xff]  ;;  %v4486_v28 = vpop.f32.mrb[58].mxu0 }
 0x216   : > { %v1261_v38 = vadd.f32 1.4214138, %v1197_v29  ;;  %3095 = vpow2.f32 %v1833_v40  ;;  %v2220_v3 = vadd.f32 1.0, %v2156_v53  ;;  %v1963_v23 = vsub.f32 1.0, %v1899_v59 }
 0x217   : > { %5775 = vst [vmem:[#allocation28_spill] sm:$0xff] %v4476_v50  ;;  %v1518_v4 = vadd.f32 0.2548296, %v1454_v16  ;;  %v4480_v34 = vpop.eup %3091  ;;  %vm2030_vm14 = vcmp.ge.f32.partialorder %v5777_v56, 0.0  ;;  %3097 = vrcp.f32 %v901_v12  ;;  %v838_v51 = vmul.f32 0.3275911, %v774_v45 }
 0x218   : > { %5776 = vst [vmem:[#allocation65_spill] sm:$0xff] %v4480_v34  ;;  %v1670_v5 = vsub.f32 0.0, %v774_v45  ;;  %v1325_v49 = vmul.f32 %v5764_v47, %v1261_v38  ;;  %v2284_v11 = vmul.f32 %v2220_v3, %v5778_v9  ;;  %v2091_v57 = vsub.f32 0.0, %v1963_v23 }
 0x219   : > { %v1671_v54 = vsub.f32 0.0, %v775_v60  ;;  %v1582_v29 = vmul.f32 %v5754_v19, %v1518_v4  ;;  %3099 = vpow2.f32 %v1835_v7  ;;  %v4489_v40 = vmul.f32 0.5, %v4427_v52 }
 0x21a   : > { %v776_v59 = vand.u32 2147483647, %v4476_v50  ;;  %v1389_v16 = vadd.f32 -0.28449672, %v1325_v49  ;;  %2468 = vmatprep.mubr.f32.mxu1 %v2284_v11  ;;  %v2155_v12 = vsel %vm2027_vm13, %v1963_v23, %v2091_v57  ;;  %v4497_v38 = vadd.f32 %v4080_v14, %v3695_v8  ;;  %v5780_v50 = vld [vmem:[#allocation35_spill] sm:$0xff]  ;;  %v5782_v14 = vld [vmem:[#allocation30_spill] sm:$0xff] }
 0x21b   : > { %5779 = vst [vmem:[#allocation57_spill] sm:$0xff] %v4489_v40  ;;  %v1902_v53 = vmul.f32 %v4071_v6, %v1582_v29  ;;  %v1072_v19 = vmul.f32 1.0614054, %v4090_v46  ;;  %v902_v3 = vadd.f32 1.0, %v838_v51  ;;  %v1734_v7 = vmul.f32 %v1670_v5, %v774_v45  ;;  %v5781_v6 = vld [vmem:[#allocation73_spill] sm:$0xff] }
 0x21c   : > { %v2219_v4 = vadd.f32 1.0, %v2155_v12  ;;  %v1453_v52 = vmul.f32 %v5764_v47, %v1389_v16  ;;  %v839_v9 = vmul.f32 0.3275911, %v775_v60  ;;  %v1735_v40 = vmul.f32 %v1671_v54, %v775_v60  ;;  %v5784_v5 = vld [vmem:[#allocation69_spill] sm:$0xff] }
 0x21d   : > { %v1966_v49 = vsub.f32 1.0, %v1902_v53  ;;  %v1136_v11 = vadd.f32 -1.4531521, %v1072_v19  ;;  %v1672_v23 = vsub.f32 0.0, %v776_v59  ;;  %v4504_v29 = vadd.f32 %v5781_v6, %v3701_v17 }
 0x21e   : > { %v2283_v32 = vmul.f32 %v2219_v4, %v5780_v50  ;;  %v1517_v57 = vadd.f32 0.2548296, %v1453_v52  ;;  %vm2029_vm15 = vcmp.ge.f32.partialorder %v5782_v14, 0.0  ;;  %v4508_v45 = vmul.f32 0.70710677, %v4497_v38  ;;  %v4512_v60 = vpop.eup %3093 }
 0x21f   : > { %v2094_v34 = vsub.f32 0.0, %v1966_v49  ;;  %v1200_v51 = vmul.f32 %v4090_v46, %v1136_v11  ;;  %v1071_v54 = vmul.f32 1.0614054, %v5784_v5  ;;  %5785 = vst [vmem:[#allocation38_spill] sm:$0xff] %v4512_v60  ;;  %3101 = vrcp.f32 %v902_v3  ;;  %v5788_v3 = vld [vmem:[#allocation68_spill] sm:$0xff] }
 0x220   : > { %5783 = vst [vmem:[#allocation31_spill] sm:$0xff] %v4508_v45  ;;  %v1837_v50 = vmul.f32 1.442695, %v1734_v7  ;;  %2469 = vmatmul.mubr.f32.gmra.mrb[4].mxu1 %v2283_v32  ;;  %v4515_v16 = vmul.f32 0.5, %v4434_v31  ;;  %v1581_v12 = vmul.f32 %v5764_v47, %v1517_v57  ;;  %v4518_v53 = vpop.eup %3095  ;;  %v903_v19 = vadd.f32 1.0, %v839_v9  ;;  %v4528_v31 = vpop.f32.mrb[59].mxu0 }
 0x221   : > { %5787 = vst [vmem:[#allocation73_spill] sm:$0xff] %v4518_v53  ;;  %v2158_v4 = vsel %vm2030_vm14, %v1966_v49, %v2094_v34  ;;  %v1264_v52 = vadd.f32 1.4214138, %v1200_v51  ;;  %v1135_v11 = vadd.f32 -1.4531521, %v1071_v54  ;;  %v4522_v6 = vpop.eup %3097  ;;  %v1736_v47 = vmul.f32 %v1672_v23, %v776_v59  ;;  %v5791_v49 = vld [vmem:[#allocation52_spill] sm:$0xff] }
 0x222   : > { %5786 = vst [vmem:[#allocation35_spill] sm:$0xff] %v4515_v16  ;;  %v1839_v13 = vmul.f32 1.442695, %v1735_v40  ;;  %v2222_v60 = vadd.f32 1.0, %v2158_v4  ;;  %v1901_v7 = vmul.f32 %v5788_v3, %v1581_v12  ;;  %v4526_v32 = vmul.f32 0.70710677, %v4504_v29 }
 0x223   : > { %v777_v57 = vand.u32 2147483647, %v4508_v45  ;;  %v1328_v9 = vmul.f32 %v4090_v46, %v1264_v52  ;;  %v1199_v34 = vmul.f32 %v5784_v5, %v1135_v11  ;;  %v4533_v56 = vpop.eup %3099  ;;  %3103 = vpow2.f32 %v1837_v50 }
 0x224   : > { %5789 = vst [vmem:[#allocation30_spill] sm:$0xff] %v4526_v32  ;;  %5790 = vst [vmem:[#allocation69_spill] sm:$0xff] %v4533_v56  ;;  %v2286_v40 = vmul.f32 %v2222_v60, %v5791_v49  ;;  %v1965_v51 = vsub.f32 1.0, %v1901_v7  ;;  %v4538_v54 = vadd.f32 %v4112_v0, %v3695_v8  ;;  %3105 = vrcp.f32 %v903_v19  ;;  %v4546_v0 = vpop.f32.mrb[60].mxu0 }
 0x225   : > { %v840_v12 = vmul.f32 0.3275911, %v776_v59  ;;  %v1392_v4 = vadd.f32 -0.28449672, %v1328_v9  ;;  %v1263_v23 = vadd.f32 1.4214138, %v1199_v34  ;;  %3107 = vpow2.f32 %v1839_v13 }
 0x226   : > { %2473 = vmatprep.mubr.f32.mxu1 %v2286_v40  ;;  %v4541_v52 = vmul.f32 0.5, %v4460_v42  ;;  %v2093_v11 = vsub.f32 0.0, %v1965_v51  ;;  %v778_v3 = vand.u32 2147483647, %v4526_v32  ;;  %v1841_v50 = vmul.f32 1.442695, %v1736_v47 }
 0x227   : > { %v1673_v16 = vsub.f32 0.0, %v777_v57  ;;  %v1456_v60 = vmul.f32 %v4090_v46, %v1392_v4  ;;  %v1327_v7 = vmul.f32 %v5784_v5, %v1263_v23  ;;  %v841_v19 = vmul.f32 0.3275911, %v777_v57  ;;  %v5794_v4 = vld [vmem:[#allocation37_spill] sm:$0xff] }
 0x228   : > { %5792 = vst [vmem:[#allocation68_spill] sm:$0xff] %v4541_v52  ;;  %v2157_v59 = vsel %vm2029_vm15, %v1965_v51, %v2093_v11  ;;  %v4551_v13 = vmul.f32 0.70710677, %v4538_v54  ;;  %v1074_v42 = vmul.f32 1.0614054, %v4128_v62  ;;  %v904_v9 = vadd.f32 1.0, %v840_v12 }
 0x229   : > { %v2221_v34 = vadd.f32 1.0, %v2157_v59  ;;  %v1520_v49 = vadd.f32 0.2548296, %v1456_v60  ;;  %v1391_v47 = vadd.f32 -0.28449672, %v1327_v7  ;;  %v4554_v40 = vpop.eup %3101  ;;  %vm2032_vm0 = vcmp.ge.f32.partialorder %v5794_v4, 0.0 }
 0x22a   : > { %5793 = vst [vmem:[#allocation52_spill] sm:$0xff] %v4551_v13  ;;  %v4558_v23 = vmul.f32 0.5, %v4497_v38  ;;  %v1674_v52 = vsub.f32 0.0, %v778_v3  ;;  %v1138_v14 = vadd.f32 -1.4531521, %v1074_v42  ;;  %v5796_v11 = vld [vmem:[#allocation51_spill] sm:$0xff]  ;;  %v1737_v32 = vmul.f32 %v1673_v16, %v777_v57 }
 0x22b   : > { %v1073_v51 = vmul.f32 1.0614054, %v4110_v22  ;;  %v2285_v45 = vmul.f32 %v2221_v34, %v5796_v11  ;;  %v1584_v56 = vmul.f32 %v4090_v46, %v1520_v49  ;;  %v1455_v12 = vmul.f32 %v5784_v5, %v1391_v47  ;;  %v5797_v42 = vld [vmem:[#allocation76_spill] sm:$0xff] }
 0x22c   : > { %5795 = vst [vmem:[#allocation37_spill] sm:$0xff] %v4558_v23  ;;  %v842_v60 = vmul.f32 0.3275911, %v778_v3  ;;  %v779_v7 = vand.u32 2147483647, %v4551_v13  ;;  %v1202_v59 = vmul.f32 %v4128_v62, %v1138_v14  ;;  %v4568_v38 = vadd.f32 %v4150_v25, %v3701_v17  ;;  %v5799_v46 = vld [vmem:[#allocation36_spill] sm:$0xff] }
 0x22d   : > { %3109 = vrcp.f32 %v904_v9  ;;  %2474 = vmatmul.mubr.f32.gmra.mrb[6].mxu1 %v2285_v45  ;;  %v1904_v23 = vmul.f32 %v5797_v42, %v1584_v56  ;;  %v1519_v53 = vadd.f32 0.2548296, %v1455_v12  ;;  %v1137_v34 = vadd.f32 -1.4531521, %v1073_v51  ;;  %v4571_v16 = vpop.eup %3103 }
 0x22e   : > { %5798 = vst [vmem:[#allocation51_spill] sm:$0xff] %v4571_v16  ;;  %vm2031_vm1 = vcmp.ge.f32.partialorder %v5799_v46, 0.0  ;;  %3111 = vpow2.f32 %v1841_v50  ;;  %v905_v57 = vadd.f32 1.0, %v841_v19  ;;  %v1738_v49 = vmul.f32 %v1674_v52, %v778_v3  ;;  %v4574_v11 = vpop.eup %3105  ;;  %v5802_v52 = vld [vmem:[#allocation74_spill] sm:$0xff] }
 0x22f   : > { %v1266_v47 = vadd.f32 1.4214138, %v1202_v59  ;;  %v1843_v14 = vmul.f32 1.442695, %v1737_v32  ;;  %v1968_v13 = vsub.f32 1.0, %v1904_v23  ;;  %v1583_v25 = vmul.f32 %v5784_v5, %v1519_v53  ;;  %v4578_v9 = vpop.eup %3107  ;;  %v4586_v23 = vpop.f32.mrb[61].mxu0 }
 0x230   : > { %v1201_v45 = vmul.f32 %v4110_v22, %v1137_v34  ;;  %5800 = vst [vmem:[#allocation76_spill] sm:$0xff] %v4578_v9  ;;  %v906_v56 = vadd.f32 1.0, %v842_v60  ;;  %v1675_v51 = vsub.f32 0.0, %v779_v7  ;;  %v4582_v42 = vmul.f32 0.70710677, %v4568_v38 }
 0x231   : > { %v1330_v12 = vmul.f32 %v4128_v62, %v1266_v47  ;;  %v2096_v50 = vsub.f32 0.0, %v1968_v13  ;;  %v1903_v3 = vmul.f32 %v5802_v52, %v1583_v25  ;;  %v1076_v32 = vmul.f32 1.0614054, %v4148_v55 }
 0x232   : > { %5801 = vst [vmem:[#allocation36_spill] sm:$0xff] %v4582_v42  ;;  %v1265_v19 = vadd.f32 1.4214138, %v1201_v45  ;;  %3113 = vrcp.f32 %v905_v57  ;;  %v1845_v5 = vmul.f32 1.442695, %v1738_v49  ;;  %v4593_v9 = vadd.f32 %v4165_v48, %v3695_v8  ;;  %v4597_v57 = vpop.f32.mrb[62].mxu0 }
 0x233   : > { %v843_v53 = vmul.f32 0.3275911, %v779_v7  ;;  %v1394_v59 = vadd.f32 -0.28449672, %v1330_v12  ;;  %v2160_v60 = vsel %vm2032_vm0, %v1968_v13, %v2096_v50  ;;  %v1967_v34 = vsub.f32 1.0, %v1903_v3  ;;  %v5803_v13 = vld [vmem:[#allocation55_spill] sm:$0xff] }
 0x234   : > { %v1329_v47 = vmul.f32 %v4110_v22, %v1265_v19  ;;  %v2224_v25 = vadd.f32 1.0, %v2160_v60  ;;  %v1739_v45 = vmul.f32 %v1675_v51, %v779_v7  ;;  %v780_v16 = vand.u32 2147483647, %v4582_v42  ;;  %v5805_v7 = vld [vmem:[#allocation45_spill] sm:$0xff] }
 0x235   : > { %v1458_v52 = vmul.f32 %v4128_v62, %v1394_v59  ;;  %3115 = vpow2.f32 %v1843_v14  ;;  %v2095_v49 = vsub.f32 0.0, %v1967_v34  ;;  %v1140_v4 = vadd.f32 -1.4531521, %v1076_v32 }
 0x236   : > { %v1393_v12 = vadd.f32 -0.28449672, %v1329_v47  ;;  %v2288_v50 = vmul.f32 %v2224_v25, %v5803_v13  ;;  %v4601_v3 = vmul.f32 0.5, %v4504_v29  ;;  %3117 = vrcp.f32 %v906_v56 }
 0x237   : > { %v1522_v48 = vadd.f32 0.2548296, %v1458_v52  ;;  %v4603_v19 = vpop.eup %3109  ;;  %vm2034_vm2 = vcmp.ge.f32.partialorder %v5805_v7, 0.0  ;;  %v2159_v51 = vsel %vm2031_vm1, %v1967_v34, %v2095_v49  ;;  %v4610_v14 = vmul.f32 0.70710677, %v4593_v9  ;;  %v5808_v34 = vld [vmem:[#allocation39_spill] sm:$0xff] }
 0x238   : > { %5804 = vst [vmem:[#allocation74_spill] sm:$0xff] %v4601_v3  ;;  %v1457_v59 = vmul.f32 %v4110_v22, %v1393_v12  ;;  %v1204_v32 = vmul.f32 %v4148_v55, %v1140_v4  ;;  %v4613_v60 = vpop.eup %3111  ;;  %2478 = vmatprep.mubr.f32.mxu1 %v2288_v50  ;;  %v2223_v29 = vadd.f32 1.0, %v2159_v51  ;;  %v907_v56 = vadd.f32 1.0, %v843_v53  ;;  %v5809_v49 = vld [vmem:[#allocation54_spill] sm:$0xff]  ;;  %v5810_v50 = vld [vmem:[#allocation81_spill] sm:$0xff] }
 0x239   : > { %5806 = vst [vmem:[#allocation55_spill] sm:$0xff] %v4610_v14  ;;  %5807 = vst [vmem:[#allocation45_spill] sm:$0xff] %v4613_v60  ;;  %v1847_v47 = vmul.f32 1.442695, %v1739_v45  ;;  %v1586_v25 = vmul.f32 %v4128_v62, %v1522_v48  ;;  %3119 = vpow2.f32 %v1845_v5  ;;  %v1676_v52 = vsub.f32 0.0, %v780_v16 }
 0x23a   : > { %v1521_v13 = vadd.f32 0.2548296, %v1457_v59  ;;  %v1268_v46 = vadd.f32 1.4214138, %v1204_v32  ;;  %vm2033_vm3 = vcmp.ge.f32.partialorder %v5808_v34, 0.0  ;;  %v2287_v12 = vmul.f32 %v2223_v29, %v5809_v49  ;;  %v5813_v29 = vld [vmem:[#allocation78_spill] sm:$0xff] }
 0x23b   : > { %v1906_v42 = vmul.f32 %v4134_v21, %v1586_v25  ;;  %v4621_v4 = vadd.f32 %v4202_v63, %v3701_v17  ;;  %v1075_v51 = vmul.f32 1.0614054, %v5810_v50  ;;  %v844_v53 = vmul.f32 0.3275911, %v780_v16  ;;  %v5822_v34 = vld [vmem:[#allocation58_spill] sm:$0xff] }
 0x23c   : > { %v1585_v45 = vmul.f32 %v4110_v22, %v1521_v13  ;;  %v781_v62 = vand.u32 2147483647, %v4610_v14  ;;  %v1332_v5 = vmul.f32 %v4148_v55, %v1268_v46  ;;  %v4627_v48 = vpop.eup %3113  ;;  %2479 = vmatmul.mubr.f32.gmra.mrb[8].mxu1 %v2287_v12  ;;  %v4630_v59 = vmul.f32 0.5, %v4538_v54 }
 0x23d   : > { %3121 = vrcp.f32 %v907_v56  ;;  %v1970_v21 = vsub.f32 1.0, %v1906_v42  ;;  %v1139_v32 = vadd.f32 -1.4531521, %v1075_v51  ;;  %v4633_v63 = vmul.f32 0.5, %v4568_v38  ;;  %v4643_v51 = vpop.f32.mrb[63].mxu0 }
 0x23e   : > { %5811 = vst [vmem:[#allocation39_spill] sm:$0xff] %v4630_v59  ;;  %3123 = vpow2.f32 %v1847_v47  ;;  %v1905_v25 = vmul.f32 %v5813_v29, %v1585_v45  ;;  %v1396_v22 = vadd.f32 -0.28449672, %v1332_v5  ;;  %v1740_v49 = vmul.f32 %v1676_v52, %v780_v16 }
 0x23f   : > { %5812 = vst [vmem:[#allocation54_spill] sm:$0xff] %v4633_v63  ;;  %v2098_v13 = vsub.f32 0.0, %v1970_v21  ;;  %v4637_v46 = vmul.f32 0.70710677, %v4621_v4  ;;  %v1203_v12 = vmul.f32 %v5810_v50, %v1139_v32  ;;  %v4640_v14 = vpop.eup %3115  ;;  %v908_v54 = vadd.f32 1.0, %v844_v53 }
 0x240   : > { %5815 = vst [vmem:[#allocation78_spill] sm:$0xff] %v4640_v14  ;;  %v1969_v56 = vsub.f32 1.0, %v1905_v25  ;;  %v1677_v42 = vsub.f32 0.0, %v781_v62  ;;  %v1460_v47 = vmul.f32 %v4148_v55, %v1396_v22  ;;  %v4645_v38 = vpop.eup %3117  ;;  %v845_v16 = vmul.f32 0.3275911, %v781_v62  ;;  %v5816_v25 = vld [vmem:[#allocation50_spill] sm:$0xff] }
 0x241   : > { %5814 = vst [vmem:[#allocation81_spill] sm:$0xff] %v4637_v46  ;;  %v2162_v45 = vsel %vm2034_vm2, %v1970_v21, %v2098_v13  ;;  %v1267_v52 = vadd.f32 1.4214138, %v1203_v12  ;;  %v561_v5 = vadd.f32 %v4232_v44, %v3695_v8  ;;  %v1078_v53 = vmul.f32 1.0614054, %v4177_v15  ;;  %v5819_v13 = vld [vmem:[#allocation63_spill] sm:$0xff] }
 0x242   : > { %v2226_v32 = vadd.f32 1.0, %v2162_v45  ;;  %v2097_v29 = vsub.f32 0.0, %v1969_v56  ;;  %v1524_v59 = vadd.f32 0.2548296, %v1460_v47  ;;  %vm2036_vm4 = vcmp.ge.f32.partialorder %v5816_v25, 0.0  ;;  %v5827_v25 = vld [vmem:[#allocation70_spill] sm:$0xff] }
 0x243   : > { %v1849_v22 = vmul.f32 1.442695, %v1740_v49  ;;  %v4654_v63 = vmul.f32 0.5, %v4593_v9  ;;  %v782_v3 = vand.u32 2147483647, %v4637_v46  ;;  %v1331_v7 = vmul.f32 %v5810_v50, %v1267_v52  ;;  %v4658_v21 = vpop.eup %3119 }
 0x244   : > { %5818 = vst [vmem:[#allocation97_spill] sm:$0xff] %v4658_v21  ;;  %v2290_v12 = vmul.f32 %v2226_v32, %v5819_v13  ;;  %v2161_v44 = vsel %vm2033_vm3, %v1969_v56, %v2097_v29  ;;  %v1741_v47 = vmul.f32 %v1677_v42, %v781_v62  ;;  %v1588_v45 = vmul.f32 %v4148_v55, %v1524_v59  ;;  %v5823_v59 = vld [vmem:[#allocation85_spill] sm:$0xff] }
 0x245   : > { %5817 = vst [vmem:[#allocation50_spill] sm:$0xff] %v4654_v63  ;;  %3125 = vrcp.f32 %v908_v54  ;;  %v2225_v14 = vadd.f32 1.0, %v2161_v44  ;;  %v1395_v49 = vadd.f32 -0.28449672, %v1331_v7  ;;  %v4664_v60 = vmul.f32 0.70710677, %v561_v5 }
 0x246   : > { %2483 = vmatprep.mubr.f32.mxu1 %v2290_v12  ;;  %v909_v9 = vadd.f32 1.0, %v845_v16  ;;  %v5821_v63 = vld [vmem:[#allocation84_spill] sm:$0xff]  ;;  %v1142_v52 = vadd.f32 -1.4531521, %v1078_v53  ;;  %v4669_v21 = vadd.f32 %v4263_v20, %v3701_v17  ;;  %v846_v56 = vmul.f32 0.3275911, %v782_v3 }
 0x247   : > { %5820 = vst [vmem:[#allocation63_spill] sm:$0xff] %v4664_v60  ;;  %v1908_v46 = vmul.f32 %v5821_v63, %v1588_v45  ;;  %v4671_v32 = vpop.eup %3121  ;;  %v2289_v62 = vmul.f32 %v2225_v14, %v5822_v34  ;;  %v1459_v55 = vmul.f32 %v5810_v50, %v1395_v49  ;;  %v1077_v54 = vmul.f32 1.0614054, %v5823_v59  ;;  %v5824_v12 = vld [vmem:[#allocation48_spill] sm:$0xff] }
 0x248   : > { %v4676_v42 = vpop.eup %3123  ;;  %v1851_v29 = vmul.f32 1.442695, %v1741_v47  ;;  %v1678_v7 = vsub.f32 0.0, %v782_v3  ;;  %v1206_v63 = vmul.f32 %v4177_v15, %v1142_v52  ;;  %3127 = vpow2.f32 %v1849_v22 }
 0x249   : > { %v1972_v16 = vsub.f32 1.0, %v1908_v46  ;;  %2484 = vmatmul.mubr.f32.gmra.mrb[10].mxu1 %v2289_v62  ;;  %v1523_v20 = vadd.f32 0.2548296, %v1459_v55  ;;  %v783_v53 = vand.u32 2147483647, %v4664_v60  ;;  %vm2035_vm5 = vcmp.ge.f32.partialorder %v5824_v12, 0.0 }
 0x24a   : > { %v1141_v13 = vadd.f32 -1.4531521, %v1077_v54  ;;  %3129 = vrcp.f32 %v909_v9  ;;  %v1270_v44 = vadd.f32 1.4214138, %v1206_v63  ;;  %v4682_v45 = vmul.f32 0.70710677, %v4669_v21 }
 0x24b   : > { %v2100_v14 = vsub.f32 0.0, %v1972_v16  ;;  %v4685_v47 = vmul.f32 0.5, %v4621_v4  ;;  %v910_v46 = vadd.f32 1.0, %v846_v56  ;;  %v1587_v49 = vmul.f32 %v5810_v50, %v1523_v20  ;;  %v5826_v54 = vld [vmem:[#allocation83_spill] sm:$0xff]  ;;  %v5831_v12 = vld [vmem:[#allocation53_spill] sm:$0xff] }
 0x24c   : > { %v1205_v22 = vmul.f32 %v5823_v59, %v1141_v13  ;;  %v1742_v34 = vmul.f32 %v1678_v7, %v782_v3  ;;  %v1334_v62 = vmul.f32 %v4177_v15, %v1270_v44  ;;  %v4694_v9 = vadd.f32 %v4275_v35, %v3695_v8 }
 0x24d   : > { %5825 = vst [vmem:[#allocation84_spill] sm:$0xff] %v4685_v47  ;;  %v2164_v52 = vsel %vm2036_vm4, %v1972_v16, %v2100_v14  ;;  %v1907_v63 = vmul.f32 %v5826_v54, %v1587_v49  ;;  %v1679_v4 = vsub.f32 0.0, %v783_v53  ;;  %3131 = vpow2.f32 %v1851_v29 }
 0x24e   : > { %v2228_v55 = vadd.f32 1.0, %v2164_v52  ;;  %v1269_v47 = vadd.f32 1.4214138, %v1205_v22  ;;  %v847_v56 = vmul.f32 0.3275911, %v783_v53  ;;  %v4701_v7 = vmul.f32 0.5, %v561_v5 }
 0x24f   : > { %v1398_v50 = vadd.f32 -0.28449672, %v1334_v62  ;;  %v784_v20 = vand.u32 2147483647, %v4682_v45  ;;  %v4698_v13 = vpop.eup %3125  ;;  %v1971_v16 = vsub.f32 1.0, %v1907_v63  ;;  %3133 = vrcp.f32 %v910_v46  ;;  %v5830_v46 = vld [vmem:[#allocation60_spill] sm:$0xff] }
 0x250   : > { %v2292_v3 = vmul.f32 %v2228_v55, %v5827_v25  ;;  %5828 = vst [vmem:[#allocation58_spill] sm:$0xff] %v4701_v7  ;;  %v1333_v35 = vmul.f32 %v5823_v59, %v1269_v47  ;;  %v1853_v14 = vmul.f32 1.442695, %v1742_v34  ;;  %v4706_v49 = vmul.f32 0.70710677, %v4694_v9 }
 0x251   : > { %v1462_v44 = vmul.f32 %v4177_v15, %v1398_v50  ;;  %v2099_v29 = vsub.f32 0.0, %v1971_v16  ;;  %v1743_v22 = vmul.f32 %v1679_v4, %v783_v53  ;;  %v1080_v62 = vmul.f32 1.0614054, %v4207_v24 }
 0x252   : > { %5829 = vst [vmem:[#allocation85_spill] sm:$0xff] %v4706_v49  ;;  %2488 = vmatprep.mubr.f32.mxu1 %v2292_v3  ;;  %v1397_v52 = vadd.f32 -0.28449672, %v1333_v35  ;;  %v911_v54 = vadd.f32 1.0, %v847_v56  ;;  %v1680_v63 = vsub.f32 0.0, %v784_v20  ;;  %v4711_v5 = vadd.f32 %v4308_v18, %v3701_v17  ;;  %v4713_v47 = vpop.eup %3127 }
 0x253   : > { %v1526_v55 = vadd.f32 0.2548296, %v1462_v44  ;;  %vm2038_vm6 = vcmp.ge.f32.partialorder %v5830_v46, 0.0  ;;  %v2163_v34 = vsel %vm2035_vm5, %v1971_v16, %v2099_v29  ;;  %v848_v50 = vmul.f32 0.3275911, %v784_v20  ;;  %v5832_v16 = vld [vmem:[#allocation64_spill] sm:$0xff] }
 0x254   : > { %v1461_v53 = vmul.f32 %v5823_v59, %v1397_v52  ;;  %v1144_v4 = vadd.f32 -1.4531521, %v1080_v62  ;;  %v4719_v25 = vpop.eup %3129  ;;  %3135 = vpow2.f32 %v1853_v14  ;;  %v2227_v56 = vadd.f32 1.0, %v2163_v34 }
 0x255   : > { %v1590_v3 = vmul.f32 %v4177_v15, %v1526_v55  ;;  %v785_v18 = vand.u32 2147483647, %v4706_v49  ;;  %v1855_v35 = vmul.f32 1.442695, %v1743_v22  ;;  %v1079_v60 = vmul.f32 1.0614054, %v4192_v58 }
 0x256   : > { %v1525_v44 = vadd.f32 0.2548296, %v1461_v53  ;;  %v1208_v7 = vmul.f32 %v4207_v24, %v1144_v4  ;;  %vm2037_vm7 = vcmp.ge.f32.partialorder %v5831_v12, 0.0  ;;  %v2291_v29 = vmul.f32 %v2227_v56, %v5832_v16 }
 0x257   : > { %v1910_v52 = vmul.f32 %v4185_v61, %v1590_v3  ;;  %v1744_v62 = vmul.f32 %v1680_v63, %v784_v20  ;;  %v4729_v14 = vmul.f32 0.70710677, %v4711_v5  ;;  %3137 = vrcp.f32 %v911_v54  ;;  %v4732_v34 = vpop.eup %3131 }
 0x258   : > { %v912_v15 = vadd.f32 1.0, %v848_v50  ;;  %v1589_v55 = vmul.f32 %v5823_v59, %v1525_v44  ;;  %v1272_v22 = vadd.f32 1.4214138, %v1208_v7  ;;  %2489 = vmatmul.mubr.f32.gmra.mrb[12].mxu1 %v2291_v29  ;;  %v849_v4 = vmul.f32 0.3275911, %v785_v18 }
 0x259   : > { %v1974_v53 = vsub.f32 1.0, %v1910_v52  ;;  %v1143_v49 = vadd.f32 -1.4531521, %v1079_v60  ;;  %v4736_v56 = vadd.f32 %v4331_v39, %v3695_v8  ;;  %3139 = vpow2.f32 %v1855_v35  ;;  %v4740_v63 = vpop.eup %3133 }
 0x25a   : > { %v1909_v61 = vmul.f32 %v4170_v43, %v1589_v55  ;;  %v1681_v20 = vsub.f32 0.0, %v785_v18  ;;  %v1336_v54 = vmul.f32 %v4207_v24, %v1272_v22  ;;  %v1857_v7 = vmul.f32 1.442695, %v1744_v62 }
 0x25b   : > { %v2102_v59 = vsub.f32 0.0, %v1974_v53  ;;  %v786_v50 = vand.u32 2147483647, %v4729_v14  ;;  %v1207_v3 = vmul.f32 %v4192_v58, %v1143_v49  ;;  %v4745_v60 = vmul.f32 0.5, %v4669_v21 }
 0x25c   : > { %3141 = vrcp.f32 %v912_v15  ;;  %v1973_v39 = vsub.f32 1.0, %v1909_v61  ;;  %v1400_v44 = vadd.f32 -0.28449672, %v1336_v54  ;;  %v913_v35 = vadd.f32 1.0, %v849_v4 }
 0x25d   : > { %5833 = vst [vmem:[#allocation48_spill] sm:$0xff] %v4745_v60  ;;  %v2166_v43 = vsel %vm2038_vm6, %v1974_v53, %v2102_v59  ;;  %v1271_v16 = vadd.f32 1.4214138, %v1207_v3  ;;  %v4750_v29 = vmul.f32 0.70710677, %v4736_v56  ;;  %v1745_v55 = vmul.f32 %v1681_v20, %v785_v18  ;;  %v5836_v53 = vld [vmem:[#allocation77_spill] sm:$0xff] }
 0x25e   : > { %v2230_v52 = vadd.f32 1.0, %v2166_v43  ;;  %v2101_v62 = vsub.f32 0.0, %v1973_v39  ;;  %v1464_v22 = vmul.f32 %v4207_v24, %v1400_v44  ;;  %v4753_v49 = vpop.eup %3135  ;;  %3143 = vpow2.f32 %v1857_v7  ;;  %v5837_v18 = vld [vmem:[#allocation72_spill] sm:$0xff] }
 0x25f   : > { %5834 = vst [vmem:[#allocation83_spill] sm:$0xff] %v4750_v29  ;;  %v4756_v21 = vmul.f32 0.5, %v4694_v9  ;;  %v1682_v15 = vsub.f32 0.0, %v786_v50  ;;  %v1335_v46 = vmul.f32 %v4192_v58, %v1271_v16  ;;  %v1082_v59 = vmul.f32 1.0614054, %v4259_v33 }
 0x260   : > { %v2294_v4 = vmul.f32 %v2230_v52, %v5836_v53  ;;  %v2165_v61 = vsel %vm2037_vm7, %v1973_v39, %v2101_v62  ;;  %v1528_v54 = vadd.f32 0.2548296, %v1464_v22  ;;  %vm2040_vm8 = vcmp.ge.f32.partialorder %v5837_v18, 0.0  ;;  %v5838_v39 = vld [vmem:[#allocation71_spill] sm:$0xff]  ;;  %v5847_v18 = vld [vmem:[#allocation80_spill] sm:$0xff] }
 0x261   : > { %5835 = vst [vmem:[#allocation70_spill] sm:$0xff] %v4756_v21  ;;  %v2229_v20 = vadd.f32 1.0, %v2165_v61  ;;  %3145 = vrcp.f32 %v913_v35  ;;  %v1399_v3 = vadd.f32 -0.28449672, %v1335_v46  ;;  %v787_v7 = vand.u32 2147483647, %v4750_v29  ;;  %v4765_v9 = vpop.eup %3137 }
 0x262   : > { %2493 = vmatprep.mubr.f32.mxu1 %v2294_v4  ;;  %v1859_v44 = vmul.f32 1.442695, %v1745_v55  ;;  %v1592_v43 = vmul.f32 %v4207_v24, %v1528_v54  ;;  %v1146_v16 = vadd.f32 -1.4531521, %v1082_v59  ;;  %v4770_v12 = vadd.f32 %v4366_v41, %v3701_v17 }
 0x263   : > { %v2293_v52 = vmul.f32 %v2229_v20, %v5838_v39  ;;  %v850_v62 = vmul.f32 0.3275911, %v786_v50  ;;  %v1463_v22 = vmul.f32 %v4192_v58, %v1399_v3  ;;  %v1081_v35 = vmul.f32 1.0614054, %v4225_v27  ;;  %v4775_v46 = vpop.eup %3139  ;;  %v5841_v3 = vld [vmem:[#allocation67_spill] sm:$0xff] }
 0x264   : > { %5839 = vst [vmem:[#allocation60_spill] sm:$0xff] %v4775_v46  ;;  %v1912_v53 = vmul.f32 %v4221_v1, %v1592_v43  ;;  %v1746_v4 = vmul.f32 %v1682_v15, %v786_v50  ;;  %v1210_v55 = vmul.f32 %v4259_v33, %v1146_v16  ;;  %v4780_v24 = vmul.f32 0.70710677, %v4770_v12 }
 0x265   : > { %2494 = vmatmul.mubr.f32.gmra.mrb[14].mxu1 %v2293_v52  ;;  %v1527_v41 = vadd.f32 0.2548296, %v1463_v22  ;;  %v851_v61 = vmul.f32 0.3275911, %v787_v7  ;;  %v1145_v54 = vadd.f32 -1.4531521, %v1081_v35  ;;  %v4784_v59 = vadd.f32 %v4380_v26, %v3695_v8 }
 0x266   : > { %5840 = vst [vmem:[#allocation53_spill] sm:$0xff] %v4780_v24  ;;  %v4786_v20 = vpop.eup %3141  ;;  %vm2039_vm9 = vcmp.ge.f32.partialorder %v5841_v3, 0.0  ;;  %v1976_v39 = vsub.f32 1.0, %v1912_v53  ;;  %v4790_v1 = vmul.f32 0.5, %v4711_v5  ;;  %v1683_v50 = vsub.f32 0.0, %v787_v7 }
 0x267   : > { %v1274_v15 = vadd.f32 1.4214138, %v1210_v55  ;;  %3147 = vpow2.f32 %v1859_v44  ;;  %v914_v43 = vadd.f32 1.0, %v850_v62  ;;  %v1591_v16 = vmul.f32 %v4192_v58, %v1527_v41  ;;  %v5845_v41 = vld [vmem:[#allocation40_spill] sm:$0xff] }
 0x268   : > { %5842 = vst [vmem:[#allocation64_spill] sm:$0xff] %v4790_v1  ;;  %v1209_v52 = vmul.f32 %v4225_v27, %v1145_v54  ;;  %v2104_v22 = vsub.f32 0.0, %v1976_v39  ;;  %v1861_v35 = vmul.f32 1.442695, %v1746_v4  ;;  %v788_v29 = vand.u32 2147483647, %v4780_v24  ;;  %v4796_v21 = vpop.eup %3143 }
 0x269   : > { %v1338_v26 = vmul.f32 %v4259_v33, %v1274_v15  ;;  %5843 = vst [vmem:[#allocation77_spill] sm:$0xff] %v4796_v21  ;;  %v1911_v53 = vmul.f32 %v4199_v10, %v1591_v16  ;;  %v915_v5 = vadd.f32 1.0, %v851_v61  ;;  %v4800_v55 = vmul.f32 0.70710677, %v4784_v59 }
 0x26a   : > { %v1273_v1 = vadd.f32 1.4214138, %v1209_v52  ;;  %v2168_v58 = vsel %vm2040_vm8, %v1976_v39, %v2104_v22  ;;  %v1747_v44 = vmul.f32 %v1683_v50, %v787_v7  ;;  %v1084_v4 = vmul.f32 1.0614054, %v5845_v41 }
 0x26b   : > { %5844 = vst [vmem:[#allocation72_spill] sm:$0xff] %v4800_v55  ;;  %v1402_v62 = vadd.f32 -0.28449672, %v1338_v26  ;;  %v4805_v54 = vpop.eup %3145  ;;  %v2232_v15 = vadd.f32 1.0, %v2168_v58  ;;  %3149 = vrcp.f32 %v914_v43  ;;  %v1975_v24 = vsub.f32 1.0, %v1911_v53  ;;  %v5848_v53 = vld [vmem:[#allocation82_spill] sm:$0xff] }
 0x26c   : > { %v1337_v60 = vmul.f32 %v4225_v27, %v1273_v1  ;;  %3151 = vpow2.f32 %v1861_v35  ;;  %v4809_v10 = vmul.f32 0.5, %v4736_v56  ;;  %v1684_v16 = vsub.f32 0.0, %v788_v29 }
 0x26d   : > { %v1466_v61 = vmul.f32 %v4259_v33, %v1402_v62  ;;  %v2296_v39 = vmul.f32 %v2232_v15, %v5847_v18  ;;  %v2103_v7 = vsub.f32 0.0, %v1975_v24  ;;  %v789_v52 = vand.u32 2147483647, %v4800_v55  ;;  %v5851_v18 = vld [vmem:[#allocation75_spill] sm:$0xff] }
 0x26e   : > { %5846 = vst [vmem:[#allocation71_spill] sm:$0xff] %v4809_v10  ;;  %v1401_v50 = vadd.f32 -0.28449672, %v1337_v60  ;;  %3153 = vrcp.f32 %v915_v5  ;;  %v1863_v22 = vmul.f32 1.442695, %v1747_v44  ;;  %vm2042_vm10 = vcmp.ge.f32.partialorder %v5848_v53, 0.0 }
 0x26f   : > { %v1530_v26 = vadd.f32 0.2548296, %v1466_v61  ;;  %v1148_v43 = vadd.f32 -1.4531521, %v1084_v4  ;;  %2498 = vmatprep.mubr.f32.mxu1 %v2296_v39  ;;  %v2167_v56 = vsel %vm2039_vm9, %v1975_v24, %v2103_v7  ;;  %v852_v1 = vmul.f32 0.3275911, %v788_v29 }
 0x270   : > { %v1465_v35 = vmul.f32 %v4225_v27, %v1401_v50  ;;  %v4820_v58 = vadd.f32 %v4412_v37, %v3701_v17  ;;  %v2231_v60 = vadd.f32 1.0, %v2167_v56  ;;  %v1748_v5 = vmul.f32 %v1684_v16, %v788_v29  ;;  %v5852_v37 = vld [vmem:[#allocation79_spill] sm:$0xff]  ;;  %v5853_v7 = vld [vmem:[#allocation33_spill] sm:$0xff] }
 0x271   : > { %v1594_v62 = vmul.f32 %v4259_v33, %v1530_v26  ;;  %v1212_v44 = vmul.f32 %v5845_v41, %v1148_v43  ;;  %v4824_v4 = vpop.eup %3147  ;;  %v1685_v61 = vsub.f32 0.0, %v789_v52  ;;  %v4831_v24 = vadd.f32 %v4444_v36, %v3695_v8  ;;  %v5854_v43 = vld [vmem:[#allocation12_spill] sm:$0xff] }
 0x272   : > { %5849 = vst [vmem:[#allocation67_spill] sm:$0xff] %v4824_v4  ;;  %v1529_v15 = vadd.f32 0.2548296, %v1465_v35  ;;  %v4827_v3 = vmul.f32 0.70710677, %v4820_v58  ;;  %vm2041_vm11 = vcmp.ge.f32.partialorder %v5851_v18, 0.0  ;;  %v2295_v39 = vmul.f32 %v2231_v60, %v5852_v37 }
 0x273   : > { %v1914_v33 = vmul.f32 %v5853_v7, %v1594_v62  ;;  %v853_v29 = vmul.f32 0.3275911, %v789_v52  ;;  %v1276_v16 = vadd.f32 1.4214138, %v1212_v44  ;;  %3155 = vpow2.f32 %v1863_v22  ;;  %v5856_v37 = vld [vmem:[#allocation93_spill] sm:$0xff] }
 0x274   : > { %5850 = vst [vmem:[#allocation40_spill] sm:$0xff] %v4827_v3  ;;  %v1593_v50 = vmul.f32 %v4225_v27, %v1529_v15  ;;  %v790_v26 = vand.u32 2147483647, %v4827_v3  ;;  %v1083_v56 = vmul.f32 1.0614054, %v5854_v43  ;;  %2499 = vmatmul.mubr.f32.gmra.mrb[16].mxu1 %v2295_v39  ;;  %v916_v10 = vadd.f32 1.0, %v852_v1 }
 0x275   : > { %v1978_v35 = vsub.f32 1.0, %v1914_v33  ;;  %v1340_v36 = vmul.f32 %v5845_v41, %v1276_v16  ;;  %v4841_v55 = vmul.f32 0.70710677, %v4831_v24  ;;  %v4843_v60 = vpop.eup %3149  ;;  %v1865_v62 = vmul.f32 1.442695, %v1748_v5 }
 0x276   : > { %v1913_v44 = vmul.f32 %v5856_v37, %v1593_v50  ;;  %v1749_v22 = vmul.f32 %v1685_v61, %v789_v52  ;;  %v1147_v7 = vadd.f32 -1.4531521, %v1083_v56  ;;  %v4846_v27 = vpop.eup %3151  ;;  %v917_v3 = vadd.f32 1.0, %v853_v29 }
 0x277   : > { %5855 = vst [vmem:[#allocation80_spill] sm:$0xff] %v4841_v55  ;;  %v2106_v15 = vsub.f32 0.0, %v1978_v35  ;;  %v1404_v4 = vadd.f32 -0.28449672, %v1340_v36  ;;  %v854_v39 = vmul.f32 0.3275911, %v790_v26  ;;  %3157 = vrcp.f32 %v916_v10 }
 0x278   : > { %v4849_v1 = vmul.f32 0.5, %v4770_v12  ;;  %v1977_v33 = vsub.f32 1.0, %v1913_v44  ;;  %v1686_v16 = vsub.f32 0.0, %v790_v26  ;;  %v1211_v46 = vmul.f32 %v5854_v43, %v1147_v7  ;;  %v4852_v21 = vpop.eup %3153  ;;  %v5858_v44 = vld [vmem:[#allocation90_spill] sm:$0xff]  ;;  %v5859_v7 = vld [vmem:[#allocation88_spill] sm:$0xff] }
 0x279   : > { %v2170_v5 = vsel %vm2042_vm10, %v1978_v35, %v2106_v15  ;;  %v1468_v52 = vmul.f32 %v5845_v41, %v1404_v4  ;;  %v791_v61 = vand.u32 2147483647, %v4841_v55  ;;  %3159 = vpow2.f32 %v1865_v62  ;;  %v5860_v35 = vld [vmem:[#allocation95_spill] sm:$0xff] }
 0x27a   : > { %5857 = vst [vmem:[#allocation82_spill] sm:$0xff] %v4849_v1  ;;  %v2234_v29 = vadd.f32 1.0, %v2170_v5  ;;  %v2105_v50 = vsub.f32 0.0, %v1977_v33  ;;  %v1867_v56 = vmul.f32 1.442695, %v1749_v22  ;;  %3161 = vrcp.f32 %v917_v3 }
 0x27b   : > { %v1532_v12 = vadd.f32 0.2548296, %v1468_v52  ;;  %v918_v36 = vadd.f32 1.0, %v854_v39  ;;  %v1275_v37 = vadd.f32 1.4214138, %v1211_v46  ;;  %vm2044_vm12 = vcmp.ge.f32.partialorder %v5858_v44, 0.0 }
 0x27c   : > { %v2298_v1 = vmul.f32 %v2234_v29, %v5859_v7  ;;  %v2169_v53 = vsel %vm2041_vm11, %v1977_v33, %v2105_v50  ;;  %v1750_v10 = vmul.f32 %v1686_v16, %v790_v26  ;;  %v1086_v4 = vmul.f32 1.0614054, %v5860_v35  ;;  %v5862_v29 = vld [vmem:[#allocation13_spill] sm:$0xff]  ;;  %v5863_v33 = vld [vmem:[#allocation86_spill] sm:$0xff] }
 0x27d   : > { %v2233_v15 = vadd.f32 1.0, %v2169_v53  ;;  %v1596_v5 = vmul.f32 %v5845_v41, %v1532_v12  ;;  %v1339_v62 = vmul.f32 %v5854_v43, %v1275_v37  ;;  %v1687_v22 = vsub.f32 0.0, %v791_v61  ;;  %v4865_v3 = vpop.eup %3155  ;;  %v5864_v16 = vld [vmem:[#allocation42_spill] sm:$0xff] }
 0x27e   : > { %5861 = vst [vmem:[#allocation75_spill] sm:$0xff] %v4865_v3  ;;  %2503 = vmatprep.mubr.f32.mxu1 %v2298_v1  ;;  %v855_v46 = vmul.f32 0.3275911, %v791_v61  ;;  %v1150_v39 = vadd.f32 -1.4531521, %v1086_v4  ;;  %v587_v52 = vadd.f32 %v4478_v30, %v3701_v17  ;;  %3163 = vpow2.f32 %v1867_v56 }
 0x27f   : > { %v1085_v18 = vmul.f32 1.0614054, %v5862_v29  ;;  %v2297_v26 = vmul.f32 %v2233_v15, %v5863_v33  ;;  %v1916_v50 = vmul.f32 %v5864_v16, %v1596_v5  ;;  %v1403_v7 = vadd.f32 -0.28449672, %v1339_v62  ;;  %v5867_v16 = vld [vmem:[#allocation87_spill] sm:$0xff] }
 0x280   : > { %v1869_v41 = vmul.f32 1.442695, %v1750_v10  ;;  %v1214_v12 = vmul.f32 %v5860_v35, %v1150_v39  ;;  %v4873_v37 = vmul.f32 0.70710677, %v587_v52  ;;  %v591_v1 = vadd.f32 %v4486_v28, %v3695_v8 }
 0x281   : > { %2504 = vmatmul.mubr.f32.gmra.mrb[18].mxu1 %v2297_v26  ;;  %v1980_v53 = vsub.f32 1.0, %v1916_v50  ;;  %v1467_v30 = vmul.f32 %v5854_v43, %v1403_v7  ;;  %v1751_v4 = vmul.f32 %v1687_v22, %v791_v61  ;;  %v1149_v55 = vadd.f32 -1.4531521, %v1085_v18  ;;  %v4881_v10 = vpop.eup %3157 }
 0x282   : > { %5865 = vst [vmem:[#allocation79_spill] sm:$0xff] %v4873_v37  ;;  %v4879_v15 = vmul.f32 0.5, %v4784_v59  ;;  %3165 = vrcp.f32 %v918_v36  ;;  %v919_v56 = vadd.f32 1.0, %v855_v46  ;;  %v1278_v5 = vadd.f32 1.4214138, %v1214_v12 }
 0x283   : > { %v2108_v62 = vsub.f32 0.0, %v1980_v53  ;;  %v1531_v39 = vadd.f32 0.2548296, %v1467_v30  ;;  %v792_v33 = vand.u32 2147483647, %v4873_v37  ;;  %v1213_v28 = vmul.f32 %v5862_v29, %v1149_v55  ;;  %v4885_v26 = vpop.eup %3159  ;;  %v5870_v30 = vld [vmem:[#allocation21_spill] sm:$0xff] }
 0x284   : > { %5866 = vst [vmem:[#allocation33_spill] sm:$0xff] %v4879_v15  ;;  %vm2043_vm13 = vcmp.ge.f32.partialorder %v5867_v16, 0.0  ;;  %v4889_v61 = vmul.f32 0.5, %v4820_v58  ;;  %3167 = vpow2.f32 %v1869_v41  ;;  %v1342_v59 = vmul.f32 %v5860_v35, %v1278_v5  ;;  %v4894_v22 = vpop.eup %3161  ;;  %v5871_v37 = vld [vmem:[#allocation91_spill] sm:$0xff] }
 0x285   : > { %v4892_v36 = vmul.f32 0.70710677, %v591_v1  ;;  %v2172_v46 = vsel %vm2044_vm12, %v1980_v53, %v2108_v62  ;;  %v1595_v18 = vmul.f32 %v5854_v43, %v1531_v39  ;;  %v1871_v55 = vmul.f32 1.442695, %v1751_v4 }
 0x286   : > { %5868 = vst [vmem:[#allocation12_spill] sm:$0xff] %v4889_v61  ;;  %v1277_v50 = vadd.f32 1.4214138, %v1213_v28  ;;  %v2236_v7 = vadd.f32 1.0, %v2172_v46  ;;  %3169 = vrcp.f32 %v919_v56  ;;  %v1406_v12 = vadd.f32 -0.28449672, %v1342_v59 }
 0x287   : > { %5869 = vst [vmem:[#allocation93_spill] sm:$0xff] %v4892_v36  ;;  %v1088_v58 = vmul.f32 1.0614054, %v4395_v2  ;;  %v1915_v41 = vmul.f32 %v5870_v30, %v1595_v18  ;;  %v856_v15 = vmul.f32 0.3275911, %v792_v33  ;;  %v1688_v5 = vsub.f32 0.0, %v792_v33 }
 0x288   : > { %v1341_v61 = vmul.f32 %v5862_v29, %v1277_v50  ;;  %v2300_v3 = vmul.f32 %v2236_v7, %v5871_v37  ;;  %v1470_v44 = vmul.f32 %v5860_v35, %v1406_v12  ;;  %v793_v53 = vand.u32 2147483647, %v4892_v36  ;;  %v4909_v4 = vpop.eup %3163  ;;  %v5876_v18 = vld [vmem:[#allocation94_spill] sm:$0xff] }
 0x289   : > { %v4907_v43 = vadd.f32 %v4528_v31, %v3701_v17  ;;  %5872 = vst [vmem:[#allocation90_spill] sm:$0xff] %v4909_v4  ;;  %v1979_v56 = vsub.f32 1.0, %v1915_v41  ;;  %v4912_v62 = vmul.f32 0.5, %v4831_v24  ;;  %3171 = vpow2.f32 %v1871_v55  ;;  %v5878_v41 = vld [vmem:[#allocation22_spill] sm:$0xff] }
 0x28a   : > { %v1405_v39 = vadd.f32 -0.28449672, %v1341_v61  ;;  %2508 = vmatprep.mubr.f32.mxu1 %v2300_v3  ;;  %v1534_v28 = vadd.f32 0.2548296, %v1470_v44  ;;  %v4914_v59 = vmul.f32 0.5, %v587_v52  ;;  %v4916_v37 = vmul.f32 0.5, %v591_v1 }
 0x28b   : > { %5873 = vst [vmem:[#allocation88_spill] sm:$0xff] %v4912_v62  ;;  %v1152_v46 = vadd.f32 -1.4531521, %v1088_v58  ;;  %vm2046_vm14 = vcmp.ge.f32.partialorder %v5876_v18, 0.0  ;;  %v2107_v50 = vsub.f32 0.0, %v1979_v56  ;;  %v920_v31 = vadd.f32 1.0, %v856_v15 }
 0x28c   : > { %5874 = vst [vmem:[#allocation95_spill] sm:$0xff] %v4914_v59  ;;  %5875 = vst [vmem:[#allocation13_spill] sm:$0xff] %v4916_v37  ;;  %v1752_v7 = vmul.f32 %v1688_v5, %v792_v33  ;;  %v1469_v12 = vmul.f32 %v5862_v29, %v1405_v39  ;;  %v4920_v30 = vpop.eup %3165  ;;  %v1598_v24 = vmul.f32 %v5860_v35, %v1534_v28  ;;  %v857_v55 = vmul.f32 0.3275911, %v793_v53  ;;  %v5879_v5 = vld [vmem:[#allocation92_spill] sm:$0xff] }
 0x28d   : > { %v1216_v3 = vmul.f32 %v4395_v2, %v1152_v46  ;;  %v4925_v52 = vmul.f32 0.70710677, %v4907_v43  ;;  %v2171_v1 = vsel %vm2043_vm13, %v1979_v56, %v2107_v50  ;;  %v1689_v58 = vsub.f32 0.0, %v793_v53  ;;  %v5880_v39 = vld [vmem:[#allocation16_spill] sm:$0xff]  ;;  %v5882_v50 = vld [vmem:[#allocation89_spill] sm:$0xff] }
 0x28e   : > { %v1533_v61 = vadd.f32 0.2548296, %v1469_v12  ;;  %v1087_v15 = vmul.f32 1.0614054, %v5878_v41  ;;  %v4930_v33 = vpop.eup %3167  ;;  %vm2045_vm15 = vcmp.ge.f32.partialorder %v5879_v5, 0.0  ;;  %v2235_v44 = vadd.f32 1.0, %v2171_v1 }
 0x28f   : > { %5877 = vst [vmem:[#allocation86_spill] sm:$0xff] %v4925_v52  ;;  %v1918_v35 = vmul.f32 %v5880_v39, %v1598_v24  ;;  %v1280_v28 = vadd.f32 1.4214138, %v1216_v3  ;;  %v794_v46 = vand.u32 2147483647, %v4925_v52  ;;  %v4938_v16 = vadd.f32 %v4546_v0, %v3695_v8  ;;  %v5883_v24 = vld [vmem:[#allocation34_spill] sm:$0xff] }
 0x290   : > { %v1873_v37 = vmul.f32 1.442695, %v1752_v7  ;;  %v1597_v62 = vmul.f32 %v5862_v29, %v1533_v61  ;;  %v1151_v59 = vadd.f32 -1.4531521, %v1087_v15  ;;  %v4940_v56 = vpop.eup %3169  ;;  %v2299_v12 = vmul.f32 %v2235_v44, %v5882_v50  ;;  %v5890_v5 = vld [vmem:[#allocation14_spill] sm:$0xff] }
 0x291   : > { %5881 = vst [vmem:[#allocation42_spill] sm:$0xff] %v4938_v16  ;;  %v1982_v36 = vsub.f32 1.0, %v1918_v35  ;;  %3173 = vrcp.f32 %v920_v31  ;;  %v1344_v1 = vmul.f32 %v4395_v2, %v1280_v28  ;;  %v921_v39 = vadd.f32 1.0, %v857_v55 }
 0x292   : > { %v1917_v3 = vmul.f32 %v5883_v24, %v1597_v62  ;;  %v1690_v52 = vsub.f32 0.0, %v794_v46  ;;  %v1215_v7 = vmul.f32 %v5878_v41, %v1151_v59  ;;  %2509 = vmatmul.mubr.f32.gmra.mrb[20].mxu1 %v2299_v12  ;;  %v1753_v61 = vmul.f32 %v1689_v58, %v793_v53  ;;  %v5885_v12 = vld [vmem:[#allocation56_spill] sm:$0xff] }
 0x293   : > { %v2110_v29 = vsub.f32 0.0, %v1982_v36  ;;  %v1408_v15 = vadd.f32 -0.28449672, %v1344_v1  ;;  %v4947_v0 = vmul.f32 0.70710677, %v4938_v16  ;;  %v4949_v4 = vpop.eup %3171  ;;  %3175 = vpow2.f32 %v1873_v37  ;;  %v5886_v16 = vld [vmem:[#allocation32_spill] sm:$0xff] }
 0x294   : > { %v1981_v44 = vsub.f32 1.0, %v1917_v3  ;;  %v858_v31 = vmul.f32 0.3275911, %v794_v46  ;;  %v1279_v35 = vadd.f32 1.4214138, %v1215_v7  ;;  %v1754_v28 = vmul.f32 %v1690_v52, %v794_v46  ;;  %v5887_v7 = vld [vmem:[#allocation15_spill] sm:$0xff] }
 0x295   : > { %5884 = vst [vmem:[#allocation87_spill] sm:$0xff] %v4947_v0  ;;  %v2174_v62 = vsel %vm2046_vm14, %v1982_v36, %v2110_v29  ;;  %v1472_v55 = vmul.f32 %v4395_v2, %v1408_v15  ;;  %v795_v59 = vand.u32 2147483647, %v4947_v0  ;;  %v1090_v1 = vmul.f32 1.0614054, %v5885_v12  ;;  %v5889_v0 = vld [vmem:[#allocation49_spill] sm:$0xff] }
 0x296   : > { %v2238_v50 = vadd.f32 1.0, %v2174_v62  ;;  %v2109_v53 = vsub.f32 0.0, %v1981_v44  ;;  %v1343_v58 = vmul.f32 %v5878_v41, %v1279_v35  ;;  %3177 = vrcp.f32 %v921_v39 }
 0x297   : > { %v1875_v24 = vmul.f32 1.442695, %v1753_v61  ;;  %v1536_v37 = vadd.f32 0.2548296, %v1472_v55  ;;  %v1691_v3 = vsub.f32 0.0, %v795_v59  ;;  %vm2048_vm0 = vcmp.ge.f32.partialorder %v5886_v16, 0.0 }
 0x298   : > { %v2302_v18 = vmul.f32 %v2238_v50, %v5887_v7  ;;  %v2173_v36 = vsel %vm2045_vm15, %v1981_v44, %v2109_v53  ;;  %v922_v52 = vadd.f32 1.0, %v858_v31  ;;  %v1407_v46 = vadd.f32 -0.28449672, %v1343_v58  ;;  %v5891_v31 = vld [vmem:[#allocation27_spill] sm:$0xff] }
 0x299   : > { %v2237_v29 = vadd.f32 1.0, %v2173_v36  ;;  %v1600_v15 = vmul.f32 %v4395_v2, %v1536_v37  ;;  %v1877_v62 = vmul.f32 1.442695, %v1754_v28  ;;  %v859_v35 = vmul.f32 0.3275911, %v795_v59  ;;  %v5893_v37 = vld [vmem:[#allocation41_spill] sm:$0xff] }
 0x29a   : > { %2513 = vmatprep.mubr.f32.mxu1 %v2302_v18  ;;  %v1471_v39 = vmul.f32 %v5878_v41, %v1407_v46  ;;  %v1154_v61 = vadd.f32 -1.4531521, %v1090_v1  ;;  %v4965_v55 = vadd.f32 %v4586_v23, %v3701_v17  ;;  %v1089_v50 = vmul.f32 1.0614054, %v5889_v0 }
 0x29b   : > { %v4968_v7 = vpop.eup %3173  ;;  %v2301_v44 = vmul.f32 %v2237_v29, %v5890_v5  ;;  %3179 = vpow2.f32 %v1875_v24  ;;  %v1920_v53 = vmul.f32 %v5891_v31, %v1600_v15  ;;  %v1755_v2 = vmul.f32 %v1691_v3, %v795_v59 }
 0x29c   : > { %5888 = vst [vmem:[#allocation21_spill] sm:$0xff] %v4965_v55  ;;  %3181 = vrcp.f32 %v922_v52  ;;  %v1535_v28 = vadd.f32 0.2548296, %v1471_v39  ;;  %v1218_v58 = vmul.f32 %v5885_v12, %v1154_v61  ;;  %v4974_v1 = vmul.f32 0.70710677, %v4965_v55 }
 0x29d   : > { %vm2047_vm1 = vcmp.ge.f32.partialorder %v5893_v37, 0.0  ;;  %2514 = vmatmul.mubr.f32.gmra.mrb[22].mxu1 %v2301_v44  ;;  %v1984_v23 = vsub.f32 1.0, %v1920_v53  ;;  %v923_v18 = vadd.f32 1.0, %v859_v35  ;;  %v1153_v36 = vadd.f32 -1.4531521, %v1089_v50  ;;  %v4981_v24 = vpop.eup %3175  ;;  %v5896_v35 = vld [vmem:[#allocation18_spill] sm:$0xff] }
 0x29e   : > { %5892 = vst [vmem:[#allocation91_spill] sm:$0xff] %v4974_v1  ;;  %v4979_v46 = vadd.f32 %v4597_v57, %v3695_v8  ;;  %3183 = vpow2.f32 %v1877_v62  ;;  %v1599_v59 = vmul.f32 %v5878_v41, %v1535_v28  ;;  %v1282_v3 = vadd.f32 1.4214138, %v1218_v58 }
 0x29f   : > { %v796_v52 = vand.u32 2147483647, %v4974_v1  ;;  %v2112_v29 = vsub.f32 0.0, %v1984_v23  ;;  %v1879_v15 = vmul.f32 1.442695, %v1755_v2  ;;  %v1217_v39 = vmul.f32 %v5889_v0, %v1153_v36 }
 0x2a0   : > { %5894 = vst [vmem:[#allocation94_spill] sm:$0xff] %v4979_v46  ;;  %v4987_v61 = vmul.f32 0.70710677, %v4979_v46  ;;  %v1919_v50 = vmul.f32 %v5896_v35, %v1599_v59  ;;  %v1346_v8 = vmul.f32 %v5885_v12, %v1282_v3  ;;  %v4991_v44 = vpop.eup %3177  ;;  %3185 = vrcp.f32 %v923_v18  ;;  %v5897_v46 = vld [vmem:[#allocation24_spill] sm:$0xff] }
 0x2a1   : > { %v860_v57 = vmul.f32 0.3275911, %v796_v52  ;;  %v1692_v5 = vsub.f32 0.0, %v796_v52  ;;  %v2176_v41 = vsel %vm2048_vm0, %v1984_v23, %v2112_v29  ;;  %v1281_v62 = vadd.f32 1.4214138, %v1217_v39 }
 0x2a2   : > { %5895 = vst [vmem:[#allocation22_spill] sm:$0xff] %v4987_v61  ;;  %v797_v31 = vand.u32 2147483647, %v4987_v61  ;;  %v2240_v53 = vadd.f32 1.0, %v2176_v41  ;;  %v1983_v2 = vsub.f32 1.0, %v1919_v50  ;;  %3187 = vpow2.f32 %v1879_v15  ;;  %v2440_v15 = vpop.f32.mrb[64].mxu0 }
 0x2a3   : > { %v1410_v28 = vadd.f32 -0.28449672, %v1346_v8  ;;  %v924_v58 = vadd.f32 1.0, %v860_v57  ;;  %v1756_v36 = vmul.f32 %v1692_v5, %v796_v52  ;;  %v1345_v59 = vmul.f32 %v5889_v0, %v1281_v62  ;;  %v5899_v57 = vld [vmem:[#allocation38_spill] sm:$0xff]  ;;  %v5901_v62 = vld [vmem:[#allocation44_spill] sm:$0xff] }
 0x2a4   : > { %v861_v35 = vmul.f32 0.3275911, %v797_v31  ;;  %v1693_v3 = vsub.f32 0.0, %v797_v31  ;;  %v2304_v55 = vmul.f32 %v2240_v53, %v5897_v46  ;;  %v2111_v1 = vsub.f32 0.0, %v1983_v2 }
 0x2a5   : > { %v1474_v16 = vmul.f32 %v5885_v12, %v1410_v28  ;;  %v4999_v23 = vpop.eup %3179  ;;  %v1881_v18 = vmul.f32 1.442695, %v1756_v36  ;;  %v1409_v29 = vadd.f32 -0.28449672, %v1345_v59  ;;  %v1092_v5 = vmul.f32 1.0614054, %v5899_v57 }
 0x2a6   : > { %5898 = vst [vmem:[#allocation92_spill] sm:$0xff] %v4999_v23  ;;  %v925_v39 = vadd.f32 1.0, %v861_v35  ;;  %v1757_v41 = vmul.f32 %v1693_v3, %v797_v31  ;;  %v5001_v50 = vpop.eup %3181  ;;  %2518 = vmatprep.mubr.f32.mxu1 %v2304_v55  ;;  %v2175_v52 = vsel %vm2047_vm1, %v1983_v2, %v2111_v1  ;;  %v5008_v46 = vadd.f32 %v4643_v51, %v3701_v17  ;;  %v2442_v36 = vpop.f32.mrb[65].mxu0  ;;  %v5903_v17 = vld [vmem:[#allocation19_spill] sm:$0xff]  ;;  %v5906_v3 = vld [vmem:[#allocation46_spill] sm:$0xff] }
 0x2a7   : > { %v1538_v8 = vadd.f32 0.2548296, %v1474_v16  ;;  %vm2050_vm2 = vcmp.ge.f32.partialorder %v5901_v62, 0.0  ;;  %v2239_v53 = vadd.f32 1.0, %v2175_v52  ;;  %3189 = vrcp.f32 %v924_v58  ;;  %v5025_v58 = vld [vmem:[%s5471_s4] ss:$0 sm:$0xff] }
 0x2a8   : > { %5900 = vst [vmem:[#allocation16_spill] sm:$0xff] %v5008_v46  ;;  %v1473_v31 = vmul.f32 %v5889_v0, %v1409_v29  ;;  %v1883_v28 = vmul.f32 1.442695, %v1757_v41  ;;  %v5012_v55 = vpop.eup %3183  ;;  %v5015_v1 = vmul.f32 0.5, %v4907_v43  ;;  %3191 = vpow2.f32 %v1881_v18  ;;  %5905 = vst [vmem:[#allocation56_spill] sm:$0xff] %v5025_v58  ;;  %v5907_v43 = vld [vmem:[#allocation62_spill] sm:$0xff] }
 0x2a9   : > { %v1602_v37 = vmul.f32 %v5885_v12, %v1538_v8  ;;  %v1156_v2 = vadd.f32 -1.4531521, %v1092_v5  ;;  %v2303_v51 = vmul.f32 %v2239_v53, %v5903_v17  ;;  %3193 = vrcp.f32 %v925_v39  ;;  %v5908_v18 = vld [vmem:[#allocation25_spill] sm:$0xff] }
 0x2aa   : > { %5902 = vst [vmem:[#allocation89_spill] sm:$0xff] %v5015_v1  ;;  %v1537_v59 = vadd.f32 0.2548296, %v1473_v31  ;;  %v5020_v35 = vmul.f32 0.70710677, %v5008_v46  ;;  %vm2049_vm3 = vcmp.ge.f32.partialorder %v5906_v3, 0.0  ;;  %v5032_v52 = vpop.eup %3185  ;;  %3195 = vpow2.f32 %v1883_v28 }
 0x2ab   : > { %v1922_v16 = vmul.f32 %v5907_v43, %v1602_v37  ;;  %v1220_v12 = vmul.f32 %v5899_v57, %v1156_v2  ;;  %v1091_v29 = vmul.f32 1.0614054, %v5908_v18  ;;  %v1094_v41 = vmul.f32 1.0614054, %v4554_v40  ;;  %2519 = vmatmul.mubr.f32.gmra.mrb[24].mxu1 %v2303_v51  ;;  %v5909_v2 = vld [vmem:[#allocation29_spill] sm:$0xff] }
 0x2ac   : > { %5904 = vst [vmem:[#allocation34_spill] sm:$0xff] %v5020_v35  ;;  %v1601_v39 = vmul.f32 %v5889_v0, %v1537_v59  ;;  %v798_v8 = vand.u32 2147483647, %v5020_v35  ;;  %v1093_v5 = vmul.f32 1.0614054, %v4522_v6  ;;  %v2441_v37 = vadd.f32 %v5025_v58, %v2440_v15  ;;  %v5039_v1 = vpop.eup %3187 }
 0x2ad   : > { %v1986_v53 = vsub.f32 1.0, %v1922_v16  ;;  %v1284_v31 = vadd.f32 1.4214138, %v1220_v12  ;;  %v1155_v36 = vadd.f32 -1.4531521, %v1091_v29  ;;  %5910 = vst [vmem:[#allocation32_spill] sm:$0xff] %v5039_v1 }
 0x2ae   : > { %v1921_v17 = vmul.f32 %v5909_v2, %v1601_v39  ;;  %v862_v43 = vmul.f32 0.3275911, %v798_v8  ;;  %v1694_v61 = vsub.f32 0.0, %v798_v8  ;;  %v1158_v46 = vadd.f32 -1.4531521, %v1094_v41  ;;  %2599 = vst [vmem:[%s5045_s10] sm:$0xff] %v2441_v37 }
 0x2af   : > { %v2114_v51 = vsub.f32 0.0, %v1986_v53  ;;  %v1348_v0 = vmul.f32 %v5899_v57, %v1284_v31  ;;  %v1219_v28 = vmul.f32 %v5908_v18, %v1155_v36  ;;  %v1157_v59 = vadd.f32 -1.4531521, %v1093_v5 }
 0x2b0   : > { %v1985_v16 = vsub.f32 1.0, %v1921_v17  ;;  %v926_v15 = vadd.f32 1.0, %v862_v43  ;;  %v1758_v12 = vmul.f32 %v1694_v61, %v798_v8  ;;  %v1222_v29 = vmul.f32 %v4554_v40, %v1158_v46 }
 0x2b1   : > { %v2178_v41 = vsel %vm2050_vm2, %v1986_v53, %v2114_v51  ;;  %v1412_v39 = vadd.f32 -0.28449672, %v1348_v0  ;;  %v1283_v2 = vadd.f32 1.4214138, %v1219_v28  ;;  %v1221_v31 = vmul.f32 %v4522_v6, %v1157_v59  ;;  %v5052_v35 = vpop.eup %3189  ;;  %v5913_v53 = vld [vmem:[#allocation17_spill] sm:$0xff]  ;;  %v5064_v0 = vpop.f32.mrb[66].mxu0 }
 0x2b2   : > { %v2242_v5 = vadd.f32 1.0, %v2178_v41  ;;  %v2113_v36 = vsub.f32 0.0, %v1985_v16  ;;  %3197 = vrcp.f32 %v926_v15  ;;  %v1885_v1 = vmul.f32 1.442695, %v1758_v12  ;;  %v5054_v58 = vpop.eup %3191  ;;  %5914 = vst [vmem:[#allocation14_spill] sm:$0xff] %v5064_v0  ;;  %v2447_v41 = vpop.f32.mrb[67].mxu0 }
 0x2b3   : > { %5911 = vst [vmem:[#allocation15_spill] sm:$0xff] %v5054_v58  ;;  %v1476_v37 = vmul.f32 %v5899_v57, %v1412_v39  ;;  %v1347_v61 = vmul.f32 %v5908_v18, %v1283_v2  ;;  %v1286_v46 = vadd.f32 1.4214138, %v1222_v29  ;;  %v1285_v8 = vadd.f32 1.4214138, %v1221_v31  ;;  %v5058_v62 = vpop.eup %3193  ;;  %v5916_v39 = vld [vmem:[#allocation43_spill] sm:$0xff] }
 0x2b4   : > { %5912 = vst [vmem:[#allocation49_spill] sm:$0xff] %v5058_v62  ;;  %v2306_v17 = vmul.f32 %v2242_v5, %v5913_v53  ;;  %v2177_v43 = vsel %vm2049_vm3, %v1985_v16, %v2113_v36  ;;  %3199 = vpow2.f32 %v1885_v1  ;;  %v1096_v51 = vmul.f32 1.0614054, %v4603_v19  ;;  %v5067_v29 = vpop.eup %3195  ;;  %v5917_v31 = vld [vmem:[#allocation96_spill] sm:$0xff]  ;;  %v5919_v0 = vld [vmem:[#allocation47_spill] sm:$0xff] }
 0x2b5   : > { %v2241_v28 = vadd.f32 1.0, %v2177_v43  ;;  %v1540_v59 = vadd.f32 0.2548296, %v1476_v37  ;;  %v1411_v15 = vadd.f32 -0.28449672, %v1347_v61  ;;  %v1350_v12 = vmul.f32 %v4554_v40, %v1286_v46  ;;  %5915 = vst [vmem:[#allocation27_spill] sm:$0xff] %v5067_v29 }
 0x2b6   : > { %vm2052_vm4 = vcmp.ge.f32.partialorder %v5916_v39, 0.0  ;;  %2523 = vmatprep.mubr.f32.mxu1 %v2306_v17  ;;  %v1349_v2 = vmul.f32 %v4522_v6, %v1285_v8  ;;  %v1160_v3 = vadd.f32 -1.4531521, %v1096_v51  ;;  %v1095_v1 = vmul.f32 1.0614054, %v4574_v11  ;;  %v5918_v17 = vld [vmem:[#allocation73_spill] sm:$0xff] }
 0x2b7   : > { %v1098_v16 = vmul.f32 1.0614054, %v4645_v38  ;;  %v2305_v5 = vmul.f32 %v2241_v28, %v5917_v31  ;;  %v1604_v36 = vmul.f32 %v5899_v57, %v1540_v59  ;;  %v1475_v37 = vmul.f32 %v5908_v18, %v1411_v15  ;;  %v5921_v31 = vld [vmem:[#allocation26_spill] sm:$0xff] }
 0x2b8   : > { %v1414_v61 = vadd.f32 -0.28449672, %v1350_v12  ;;  %v1413_v46 = vadd.f32 -0.28449672, %v1349_v2  ;;  %v1224_v53 = vmul.f32 %v4603_v19, %v1160_v3  ;;  %v1159_v43 = vadd.f32 -1.4531521, %v1095_v1 }
 0x2b9   : > { %v1162_v41 = vadd.f32 -1.4531521, %v1098_v16  ;;  %2524 = vmatmul.mubr.f32.gmra.mrb[26].mxu1 %v2305_v5  ;;  %v1924_v8 = vmul.f32 %v5918_v17, %v1604_v36  ;;  %v1539_v51 = vadd.f32 0.2548296, %v1475_v37  ;;  %v1097_v58 = vmul.f32 1.0614054, %v4627_v48 }
 0x2ba   : > { %v1478_v29 = vmul.f32 %v4554_v40, %v1414_v61  ;;  %vm2051_vm5 = vcmp.ge.f32.partialorder %v5919_v0, 0.0  ;;  %v1477_v57 = vmul.f32 %v4522_v6, %v1413_v46  ;;  %v1288_v28 = vadd.f32 1.4214138, %v1224_v53  ;;  %v5922_v46 = vld [vmem:[#allocation23_spill] sm:$0xff] }
 0x2bb   : > { %v1223_v59 = vmul.f32 %v4574_v11, %v1159_v43  ;;  %v1226_v15 = vmul.f32 %v4645_v38, %v1162_v41  ;;  %v1988_v12 = vsub.f32 1.0, %v1924_v8  ;;  %v1603_v2 = vmul.f32 %v5908_v18, %v1539_v51  ;;  %v5923_v43 = vld [vmem:[#allocation65_spill] sm:$0xff] }
 0x2bc   : > { %v1542_v3 = vadd.f32 0.2548296, %v1478_v29  ;;  %v1161_v1 = vadd.f32 -1.4531521, %v1097_v58  ;;  %v5085_v16 = vpop.eup %3197  ;;  %vm2054_vm6 = vcmp.ge.f32.partialorder %v5921_v31, 0.0  ;;  %v1352_v36 = vmul.f32 %v4603_v19, %v1288_v28 }
 0x2bd   : > { %5920 = vst [vmem:[#allocation41_spill] sm:$0xff] %v5085_v16  ;;  %v1541_v5 = vadd.f32 0.2548296, %v1477_v57  ;;  %v1287_v37 = vadd.f32 1.4214138, %v1223_v59  ;;  %vm2053_vm7 = vcmp.ge.f32.partialorder %v5922_v46, 0.0  ;;  %v1923_v17 = vmul.f32 %v5923_v43, %v1603_v2 }
 0x2be   : > { %v1290_v61 = vadd.f32 1.4214138, %v1226_v15  ;;  %v2116_v53 = vsub.f32 0.0, %v1988_v12  ;;  %v1606_v41 = vmul.f32 %v4554_v40, %v1542_v3  ;;  %v1225_v18 = vmul.f32 %v4627_v48, %v1161_v1  ;;  %v5093_v29 = vpop.eup %3199  ;;  %v5925_v15 = vld [vmem:[#allocation51_spill] sm:$0xff]  ;;  %v5926_v40 = vld [vmem:[#allocation69_spill] sm:$0xff]  ;;  %v5115_v0 = vpop.f32.mrb[68].mxu0 }
 0x2bf   : > { %5924 = vst [vmem:[#allocation18_spill] sm:$0xff] %v5093_v29  ;;  %v1605_v58 = vmul.f32 %v4522_v6, %v1541_v5  ;;  %v1416_v8 = vadd.f32 -0.28449672, %v1352_v36  ;;  %v1351_v51 = vmul.f32 %v4574_v11, %v1287_v37  ;;  %v1987_v59 = vsub.f32 1.0, %v1923_v17  ;;  %v5927_v37 = vld [vmem:[#allocation66_spill] sm:$0xff]  ;;  %v5935_v46 = vld [vmem:[#allocation59_spill] sm:$0xff] }
 0x2c0   : > { %v1354_v57 = vmul.f32 %v4645_v38, %v1290_v61  ;;  %v2180_v28 = vsel %vm2052_vm4, %v1988_v12, %v2116_v53  ;;  %v1926_v62 = vmul.f32 %v5925_v15, %v1606_v41  ;;  %v1289_v2 = vadd.f32 1.4214138, %v1225_v18  ;;  %v5928_v53 = vld [vmem:[#allocation28_spill] sm:$0xff] }
 0x2c1   : > { %v2244_v43 = vadd.f32 1.0, %v2180_v28  ;;  %v1925_v3 = vmul.f32 %v5926_v40, %v1605_v58  ;;  %v1480_v1 = vmul.f32 %v4603_v19, %v1416_v8  ;;  %v1415_v29 = vadd.f32 -0.28449672, %v1351_v51 }
 0x2c2   : > { %v2115_v23 = vsub.f32 0.0, %v1987_v59  ;;  %v1990_v6 = vsub.f32 1.0, %v1926_v62  ;;  %v1418_v5 = vadd.f32 -0.28449672, %v1354_v57  ;;  %v1353_v36 = vmul.f32 %v4627_v48, %v1289_v2 }
 0x2c3   : > { %v2308_v61 = vmul.f32 %v2244_v43, %v5927_v37  ;;  %v1989_v16 = vsub.f32 1.0, %v1925_v3  ;;  %v1544_v39 = vadd.f32 0.2548296, %v1480_v1  ;;  %v1479_v12 = vmul.f32 %v4574_v11, %v1415_v29  ;;  %v5931_v43 = vld [vmem:[#allocation20_spill] sm:$0xff]  ;;  %v5932_v1 = vld [vmem:[#allocation45_spill] sm:$0xff] }
 0x2c4   : > { %vm2056_vm8 = vcmp.ge.f32.partialorder %v5928_v53, 0.0  ;;  %v2179_v17 = vsel %vm2051_vm5, %v1987_v59, %v2115_v23  ;;  %v2118_v41 = vsub.f32 0.0, %v1990_v6  ;;  %v1482_v18 = vmul.f32 %v4645_v38, %v1418_v5  ;;  %v5929_v23 = vld [vmem:[#allocation61_spill] sm:$0xff]  ;;  %v5930_v59 = vld [vmem:[#allocation30_spill] sm:$0xff] }
 0x2c5   : > { %v1417_v58 = vadd.f32 -0.28449672, %v1353_v36  ;;  %2528 = vmatprep.mubr.f32.mxu1 %v2308_v61  ;;  %v2243_v62 = vadd.f32 1.0, %v2179_v17  ;;  %v2117_v8 = vsub.f32 0.0, %v1989_v16  ;;  %v1608_v51 = vmul.f32 %v4603_v19, %v1544_v39  ;;  %v5933_v39 = vld [vmem:[#allocation31_spill] sm:$0xff] }
 0x2c6   : > { %v1543_v57 = vadd.f32 0.2548296, %v1479_v12  ;;  %v2182_v28 = vsel %vm2054_vm6, %v1990_v6, %v2118_v41  ;;  %v1546_v15 = vadd.f32 0.2548296, %v1482_v18  ;;  %v1100_v2 = vmul.f32 1.0614054, %v4698_v13 }
 0x2c7   : > { %v1481_v29 = vmul.f32 %v4627_v48, %v1417_v58  ;;  %vm2055_vm9 = vcmp.ge.f32.partialorder %v5929_v23, 0.0  ;;  %vm2058_vm10 = vcmp.ge.f32.partialorder %v5930_v59, 0.0  ;;  %v2307_v40 = vmul.f32 %v2243_v62, %v5931_v43  ;;  %v2452_v6 = vpop.f32.mrb[69].mxu0  ;;  %v5934_v12 = vld [vmem:[#allocation57_spill] sm:$0xff]  ;;  %v5936_v62 = vld [vmem:[#allocation76_spill] sm:$0xff] }
 0x2c8   : > { %v2246_v3 = vadd.f32 1.0, %v2182_v28  ;;  %v2181_v19 = vsel %vm2053_vm7, %v1989_v16, %v2117_v8  ;;  %v1928_v31 = vmul.f32 %v5932_v1, %v1608_v51  ;;  %v1607_v36 = vmul.f32 %v4574_v11, %v1543_v57  ;;  %v5937_v51 = vld [vmem:[#allocation97_spill] sm:$0xff] }
 0x2c9   : > { %v2245_v5 = vadd.f32 1.0, %v2181_v19  ;;  %v1610_v37 = vmul.f32 %v4645_v38, %v1546_v15  ;;  %v1545_v61 = vadd.f32 0.2548296, %v1481_v29  ;;  %vm2057_vm11 = vcmp.ge.f32.partialorder %v5933_v39, 0.0  ;;  %2529 = vmatmul.mubr.f32.gmra.mrb[28].mxu1 %v2307_v40 }
 0x2ca   : > { %v2310_v17 = vmul.f32 %v2246_v3, %v5934_v12  ;;  %v1992_v41 = vsub.f32 1.0, %v1928_v31  ;;  %v1164_v18 = vadd.f32 -1.4531521, %v1100_v2  ;;  %v1099_v58 = vmul.f32 1.0614054, %v4671_v32  ;;  %v5938_v2 = vld [vmem:[#allocation78_spill] sm:$0xff] }
 0x2cb   : > { %v2309_v16 = vmul.f32 %v2245_v5, %v5935_v46  ;;  %v1927_v8 = vmul.f32 %v5936_v62, %v1607_v36  ;;  %v1930_v28 = vmul.f32 %v5937_v51, %v1610_v37  ;;  %v1609_v11 = vmul.f32 %v4627_v48, %v1545_v61  ;;  %v5939_v46 = vld [vmem:[#allocation68_spill] sm:$0xff]  ;;  %v5151_v23 = vpop.f32.mrb[70].mxu0 }
 0x2cc   : > { %2533 = vmatprep.mubr.f32.mxu1 %v2310_v17  ;;  %v2120_v38 = vsub.f32 0.0, %v1992_v41  ;;  %v1228_v57 = vmul.f32 %v4698_v13, %v1164_v18  ;;  %v1163_v15 = vadd.f32 -1.4531521, %v1099_v58  ;;  %v1102_v29 = vmul.f32 1.0614054, %v4740_v63 }
 0x2cd   : > { %v1991_v43 = vsub.f32 1.0, %v1927_v8  ;;  %v1994_v40 = vsub.f32 1.0, %v1930_v28  ;;  %v1929_v3 = vmul.f32 %v5938_v2, %v1609_v11  ;;  %v1101_v19 = vmul.f32 1.0614054, %v4719_v25  ;;  %2534 = vmatmul.mubr.f32.gmra.mrb[30].mxu1 %v2309_v16 }
 0x2ce   : > { %v2184_v1 = vsel %vm2056_vm8, %v1992_v41, %v2120_v38  ;;  %v1292_v31 = vadd.f32 1.4214138, %v1228_v57  ;;  %v1227_v48 = vmul.f32 %v4671_v32, %v1163_v15  ;;  %v1166_v6 = vadd.f32 -1.4531521, %v1102_v29 }
 0x2cf   : > { %v2248_v5 = vadd.f32 1.0, %v2184_v1  ;;  %v2119_v36 = vsub.f32 0.0, %v1991_v43  ;;  %v2122_v37 = vsub.f32 0.0, %v1994_v40  ;;  %v1993_v61 = vsub.f32 1.0, %v1929_v3  ;;  %v2457_v1 = vpop.f32.mrb[71].mxu0 }
 0x2d0   : > { %v1356_v12 = vmul.f32 %v4698_v13, %v1292_v31  ;;  %v1291_v17 = vadd.f32 1.4214138, %v1227_v48  ;;  %v1230_v18 = vmul.f32 %v4740_v63, %v1166_v6  ;;  %v1165_v58 = vadd.f32 -1.4531521, %v1101_v19 }
 0x2d1   : > { %v2312_v62 = vmul.f32 %v2248_v5, %v5939_v46  ;;  %v2183_v53 = vsel %vm2055_vm9, %v1991_v43, %v2119_v36  ;;  %v2186_v41 = vsel %vm2058_vm10, %v1994_v40, %v2122_v37  ;;  %v2121_v16 = vsub.f32 0.0, %v1993_v61  ;;  %v5940_v43 = vld [vmem:[#allocation35_spill] sm:$0xff]  ;;  %v5941_v40 = vld [vmem:[#allocation74_spill] sm:$0xff]  ;;  %v5942_v5 = vld [vmem:[#allocation37_spill] sm:$0xff] }
 0x2d2   : > { %v2247_v8 = vadd.f32 1.0, %v2183_v53  ;;  %v2250_v51 = vadd.f32 1.0, %v2186_v41  ;;  %v1420_v28 = vadd.f32 -0.28449672, %v1356_v12  ;;  %v1355_v11 = vmul.f32 %v4671_v32, %v1291_v17  ;;  %v5943_v17 = vld [vmem:[#allocation36_spill] sm:$0xff] }
 0x2d3   : > { %2538 = vmatprep.mubr.f32.mxu1 %v2312_v62  ;;  %v2185_v38 = vsel %vm2057_vm11, %v1993_v61, %v2121_v16  ;;  %v1294_v57 = vadd.f32 1.4214138, %v1230_v18  ;;  %v1229_v15 = vmul.f32 %v4719_v25, %v1165_v58  ;;  %v1104_v29 = vmul.f32 1.0614054, %v4786_v20 }
 0x2d4   : > { %v2311_v59 = vmul.f32 %v2247_v8, %v5940_v43  ;;  %v2314_v2 = vmul.f32 %v2250_v51, %v5941_v40  ;;  %v2249_v3 = vadd.f32 1.0, %v2185_v38  ;;  %v1484_v19 = vmul.f32 %v4698_v13, %v1420_v28 }
 0x2d5   : > { %v1419_v31 = vadd.f32 -0.28449672, %v1355_v11  ;;  %v1358_v48 = vmul.f32 %v4740_v63, %v1294_v57  ;;  %v1293_v39 = vadd.f32 1.4214138, %v1229_v15  ;;  %v1168_v6 = vadd.f32 -1.4531521, %v1104_v29 }
 0x2d6   : > { %2539 = vmatmul.mubr.f32.gmra.mrb[32].mxu1 %v2311_v59  ;;  %v2313_v36 = vmul.f32 %v2249_v3, %v5942_v5  ;;  %v1548_v37 = vadd.f32 0.2548296, %v1484_v19  ;;  %v1103_v61 = vmul.f32 1.0614054, %v4765_v9  ;;  %v1106_v12 = vmul.f32 1.0614054, %v4843_v60 }
 0x2d7   : > { %vm2060_vm12 = vcmp.ge.f32.partialorder %v5943_v17, 0.0  ;;  %2543 = vmatprep.mubr.f32.mxu1 %v2314_v2  ;;  %v1483_v18 = vmul.f32 %v4671_v32, %v1419_v31  ;;  %v1422_v58 = vadd.f32 -0.28449672, %v1358_v48  ;;  %v1357_v46 = vmul.f32 %v4719_v25, %v1293_v39  ;;  %v5944_v57 = vld [vmem:[#allocation52_spill] sm:$0xff]  ;;  %v5945_v19 = vld [vmem:[#allocation81_spill] sm:$0xff]  ;;  %v5947_v17 = vld [vmem:[#allocation54_spill] sm:$0xff] }
 0x2d8   : > { %v1232_v62 = vmul.f32 %v4786_v20, %v1168_v6  ;;  %v1612_v53 = vmul.f32 %v4698_v13, %v1548_v37  ;;  %v1167_v41 = vadd.f32 -1.4531521, %v1103_v61  ;;  %v1170_v16 = vadd.f32 -1.4531521, %v1106_v12  ;;  %v5946_v37 = vld [vmem:[#allocation55_spill] sm:$0xff] }
 0x2d9   : > { %v1105_v8 = vmul.f32 1.0614054, %v4805_v54  ;;  %v1547_v51 = vadd.f32 0.2548296, %v1483_v18  ;;  %v1486_v28 = vmul.f32 %v4740_v63, %v1422_v58  ;;  %v1421_v11 = vadd.f32 -0.28449672, %v1357_v46 }
 0x2da   : > { %v1296_v38 = vadd.f32 1.4214138, %v1232_v62  ;;  %vm2059_vm13 = vcmp.ge.f32.partialorder %v5944_v57, 0.0  ;;  %2544 = vmatmul.mubr.f32.gmra.mrb[34].mxu1 %v2313_v36  ;;  %v1932_v15 = vmul.f32 %v4713_v47, %v1612_v53  ;;  %v1231_v29 = vmul.f32 %v4765_v9, %v1167_v41  ;;  %v5949_v57 = vld [vmem:[#allocation39_spill] sm:$0xff] }
 0x2db   : > { %v1234_v43 = vmul.f32 %v4843_v60, %v1170_v16  ;;  %v1169_v59 = vadd.f32 -1.4531521, %v1105_v8  ;;  %v1611_v13 = vmul.f32 %v4671_v32, %v1547_v51  ;;  %v1550_v40 = vadd.f32 0.2548296, %v1486_v28 }
 0x2dc   : > { %v1485_v2 = vmul.f32 %v4719_v25, %v1421_v11  ;;  %v1360_v3 = vmul.f32 %v4786_v20, %v1296_v38  ;;  %vm2062_vm14 = vcmp.ge.f32.partialorder %v5945_v19, 0.0  ;;  %v1996_v1 = vsub.f32 1.0, %v1932_v15  ;;  %v5188_v38 = vpop.f32.mrb[0].mxu1 }
 0x2dd   : > { %v1295_v31 = vadd.f32 1.4214138, %v1231_v29  ;;  %v1298_v48 = vadd.f32 1.4214138, %v1234_v43  ;;  %v1233_v39 = vmul.f32 %v4805_v54, %v1169_v59  ;;  %v1931_v47 = vmul.f32 %v4676_v42, %v1611_v13  ;;  %v2462_v43 = vpop.f32.mrb[1].mxu1 }
 0x2de   : > { %v1614_v6 = vmul.f32 %v4740_v63, %v1550_v40  ;;  %v1549_v5 = vadd.f32 0.2548296, %v1485_v2  ;;  %v1424_v36 = vadd.f32 -0.28449672, %v1360_v3  ;;  %vm2061_vm15 = vcmp.ge.f32.partialorder %v5946_v37, 0.0  ;;  %v5955_v43 = vld [vmem:[#allocation67_spill] sm:$0xff] }
 0x2df   : > { %v2124_v32 = vsub.f32 0.0, %v1996_v1  ;;  %v1359_v61 = vmul.f32 %v4765_v9, %v1295_v31  ;;  %v1362_v12 = vmul.f32 %v4843_v60, %v1298_v48  ;;  %v1297_v18 = vadd.f32 1.4214138, %v1233_v39  ;;  %v5948_v48 = vld [vmem:[#allocation63_spill] sm:$0xff] }
 0x2e0   : > { %v1995_v58 = vsub.f32 1.0, %v1931_v47  ;;  %v1934_v46 = vmul.f32 %v4753_v49, %v1614_v6  ;;  %v1613_v62 = vmul.f32 %v4719_v25, %v1549_v5  ;;  %v1488_v53 = vmul.f32 %v4786_v20, %v1424_v36 }
 0x2e1   : > { %v2188_v42 = vsel %vm2060_vm12, %v1996_v1, %v2124_v32  ;;  %v1423_v63 = vadd.f32 -0.28449672, %v1359_v61  ;;  %v1426_v41 = vadd.f32 -0.28449672, %v1362_v12  ;;  %v1361_v16 = vmul.f32 %v4805_v54, %v1297_v18  ;;  %v5950_v61 = vld [vmem:[#allocation77_spill] sm:$0xff] }
 0x2e2   : > { %v2252_v8 = vadd.f32 1.0, %v2188_v42  ;;  %v2123_v51 = vsub.f32 0.0, %v1995_v58  ;;  %v1998_v28 = vsub.f32 1.0, %v1934_v46  ;;  %v1933_v11 = vmul.f32 %v4732_v34, %v1613_v62  ;;  %v5951_v62 = vld [vmem:[#allocation85_spill] sm:$0xff] }
 0x2e3   : > { %v1552_v15 = vadd.f32 0.2548296, %v1488_v53  ;;  %v1487_v49 = vmul.f32 %v4765_v9, %v1423_v63  ;;  %v1490_v25 = vmul.f32 %v4843_v60, %v1426_v41  ;;  %v1425_v29 = vadd.f32 -0.28449672, %v1361_v16  ;;  %v5952_v53 = vld [vmem:[#allocation84_spill] sm:$0xff] }
 0x2e4   : > { %vm2064_vm0 = vcmp.ge.f32.partialorder %v4682_v45, 0.0  ;;  %v2316_v59 = vmul.f32 %v2252_v8, %v5947_v17  ;;  %v2187_v13 = vsel %vm2059_vm13, %v1995_v58, %v2123_v51  ;;  %v2126_v40 = vsub.f32 0.0, %v1998_v28  ;;  %v5953_v16 = vld [vmem:[#allocation60_spill] sm:$0xff] }
 0x2e5   : > { %v1997_v2 = vsub.f32 1.0, %v1933_v11  ;;  %v2251_v3 = vadd.f32 1.0, %v2187_v13  ;;  %v1616_v34 = vmul.f32 %v4786_v20, %v1552_v15  ;;  %v1551_v1 = vadd.f32 0.2548296, %v1487_v49  ;;  %v5956_v45 = vld [vmem:[#allocation48_spill] sm:$0xff] }
 0x2e6   : > { %v1554_v31 = vadd.f32 0.2548296, %v1490_v25  ;;  %vm2063_vm1 = vcmp.ge.f32.partialorder %v5948_v48, 0.0  ;;  %2548 = vmatprep.mubr.f32.mxu1 %v2316_v59  ;;  %v2190_v39 = vsel %vm2062_vm14, %v1998_v28, %v2126_v40  ;;  %v1489_v6 = vmul.f32 %v4805_v54, %v1425_v29 }
 0x2e7   : > { %v2125_v47 = vsub.f32 0.0, %v1997_v2  ;;  %v1108_v5 = vmul.f32 1.0614054, %v4881_v10  ;;  %vm2066_vm2 = vcmp.ge.f32.partialorder %v4729_v14, 0.0  ;;  %v2315_v36 = vmul.f32 %v2251_v3, %v5949_v57  ;;  %v5227_v57 = vpop.f32.mrb[2].mxu1 }
 0x2e8   : > { %v2254_v32 = vadd.f32 1.0, %v2190_v39  ;;  %v1936_v20 = vmul.f32 %v5950_v61, %v1616_v34  ;;  %v1615_v12 = vmul.f32 %v4765_v9, %v1551_v1  ;;  %v1618_v19 = vmul.f32 %v4843_v60, %v1554_v31  ;;  %v5954_v60 = vld [vmem:[#allocation50_spill] sm:$0xff] }
 0x2e9   : > { %v2189_v18 = vsel %vm2061_vm15, %v1997_v2, %v2125_v47  ;;  %v1553_v58 = vadd.f32 0.2548296, %v1489_v6  ;;  %v1172_v46 = vadd.f32 -1.4531521, %v1108_v5  ;;  %vm2065_vm3 = vcmp.ge.f32.partialorder %v5951_v62, 0.0  ;;  %2549 = vmatmul.mubr.f32.gmra.mrb[36].mxu1 %v2315_v36  ;;  %v5959_v62 = vld [vmem:[#allocation70_spill] sm:$0xff] }
 0x2ea   : > { %v2318_v42 = vmul.f32 %v2254_v32, %v5952_v53  ;;  %v2253_v63 = vadd.f32 1.0, %v2189_v18  ;;  %v2000_v41 = vsub.f32 1.0, %v1936_v20  ;;  %v1935_v8 = vmul.f32 %v5953_v16, %v1615_v12  ;;  %v2467_v12 = vpop.f32.mrb[3].mxu1  ;;  %v5958_v16 = vld [vmem:[#allocation64_spill] sm:$0xff] }
 0x2eb   : > { %v1938_v51 = vmul.f32 %v4846_v27, %v1618_v19  ;;  %v1617_v9 = vmul.f32 %v4805_v54, %v1553_v58  ;;  %v1236_v37 = vmul.f32 %v4881_v10, %v1172_v46  ;;  %v1107_v28 = vmul.f32 1.0614054, %v4852_v21  ;;  %v5957_v46 = vld [vmem:[#allocation58_spill] sm:$0xff]  ;;  %v5962_v12 = vld [vmem:[#allocation40_spill] sm:$0xff] }
 0x2ec   : > { %2553 = vmatprep.mubr.f32.mxu1 %v2318_v42  ;;  %v2317_v11 = vmul.f32 %v2253_v63, %v5954_v60  ;;  %v2128_v15 = vsub.f32 0.0, %v2000_v41  ;;  %v1999_v49 = vsub.f32 1.0, %v1935_v8  ;;  %v1110_v25 = vmul.f32 1.0614054, %v4920_v30 }
 0x2ed   : > { %v2002_v29 = vsub.f32 1.0, %v1938_v51  ;;  %v1937_v17 = vmul.f32 %v5955_v43, %v1617_v9  ;;  %v1300_v59 = vadd.f32 1.4214138, %v1236_v37  ;;  %v1171_v13 = vadd.f32 -1.4531521, %v1107_v28  ;;  %v5960_v43 = vld [vmem:[#allocation53_spill] sm:$0xff] }
 0x2ee   : > { %2554 = vmatmul.mubr.f32.gmra.mrb[38].mxu1 %v2317_v11  ;;  %v2192_v54 = vsel %vm2064_vm0, %v2000_v41, %v2128_v15  ;;  %v2127_v27 = vsub.f32 0.0, %v1999_v49  ;;  %v1174_v40 = vadd.f32 -1.4531521, %v1110_v25  ;;  %v1109_v2 = vmul.f32 1.0614054, %v4894_v22 }
 0x2ef   : > { %v2256_v3 = vadd.f32 1.0, %v2192_v54  ;;  %v2130_v34 = vsub.f32 0.0, %v2002_v29  ;;  %v2001_v1 = vsub.f32 1.0, %v1937_v17  ;;  %v1364_v31 = vmul.f32 %v4881_v10, %v1300_v59 }
 0x2f0   : > { %v2191_v39 = vsel %vm2063_vm1, %v1999_v49, %v2127_v27  ;;  %v1235_v47 = vmul.f32 %v4852_v21, %v1171_v13  ;;  %v1238_v6 = vmul.f32 %v4920_v30, %v1174_v40  ;;  %v1173_v5 = vadd.f32 -1.4531521, %v1109_v2 }
 0x2f1   : > { %v2320_v36 = vmul.f32 %v2256_v3, %v5956_v45  ;;  %v2255_v32 = vadd.f32 1.0, %v2191_v39  ;;  %v2194_v61 = vsel %vm2066_vm2, %v2002_v29, %v2130_v34  ;;  %v2129_v20 = vsub.f32 0.0, %v2001_v1 }
 0x2f2   : > { %v2258_v18 = vadd.f32 1.0, %v2194_v61  ;;  %v1428_v19 = vadd.f32 -0.28449672, %v1364_v31  ;;  %v1299_v58 = vadd.f32 1.4214138, %v1235_v47  ;;  %v1237_v48 = vmul.f32 %v4894_v22, %v1173_v5 }
 0x2f3   : > { %2558 = vmatprep.mubr.f32.mxu1 %v2320_v36  ;;  %v2319_v53 = vmul.f32 %v2255_v32, %v5957_v46  ;;  %v2193_v42 = vsel %vm2065_vm3, %v2001_v1, %v2129_v20  ;;  %v1302_v63 = vadd.f32 1.4214138, %v1238_v6  ;;  %v1112_v41 = vmul.f32 1.0614054, %v4968_v7  ;;  %v5961_v36 = vld [vmem:[#allocation83_spill] sm:$0xff] }
 0x2f4   : > { %v2322_v8 = vmul.f32 %v2258_v18, %v5958_v16  ;;  %v2257_v14 = vadd.f32 1.0, %v2193_v42  ;;  %v1492_v51 = vmul.f32 %v4881_v10, %v1428_v19  ;;  %v1363_v9 = vmul.f32 %v4852_v21, %v1299_v58  ;;  %v5963_v16 = vld [vmem:[#allocation72_spill] sm:$0xff] }
 0x2f5   : > { %2559 = vmatmul.mubr.f32.gmra.mrb[40].mxu1 %v2319_v53  ;;  %v1366_v37 = vmul.f32 %v4920_v30, %v1302_v63  ;;  %v1301_v28 = vadd.f32 1.4214138, %v1237_v48  ;;  %v1176_v60 = vadd.f32 -1.4531521, %v1112_v41  ;;  %v1111_v11 = vmul.f32 1.0614054, %v4940_v56 }
 0x2f6   : > { %2563 = vmatprep.mubr.f32.mxu1 %v2322_v8  ;;  %v2321_v15 = vmul.f32 %v2257_v14, %v5959_v62  ;;  %v1556_v49 = vadd.f32 0.2548296, %v1492_v51  ;;  %v1427_v25 = vadd.f32 -0.28449672, %v1363_v9  ;;  %v1114_v29 = vmul.f32 1.0614054, %v5001_v50 }
 0x2f7   : > { %vm2068_vm4 = vcmp.ge.f32.partialorder %v5960_v43, 0.0  ;;  %v1430_v17 = vadd.f32 -0.28449672, %v1366_v37  ;;  %v1365_v59 = vmul.f32 %v4894_v22, %v1301_v28  ;;  %v1240_v13 = vmul.f32 %v4968_v7, %v1176_v60  ;;  %v5260_v48 = vpop.f32.mrb[4].mxu1  ;;  %v5964_v14 = vld [vmem:[#allocation75_spill] sm:$0xff] }
 0x2f8   : > { %v1175_v54 = vadd.f32 -1.4531521, %v1111_v11  ;;  %v1620_v27 = vmul.f32 %v4881_v10, %v1556_v49  ;;  %v1491_v40 = vmul.f32 %v4852_v21, %v1427_v25  ;;  %v1178_v2 = vadd.f32 -1.4531521, %v1114_v29  ;;  %v2472_v41 = vpop.f32.mrb[5].mxu1 }
 0x2f9   : > { %v1113_v3 = vmul.f32 1.0614054, %v4991_v44  ;;  %2564 = vmatmul.mubr.f32.gmra.mrb[42].mxu1 %v2321_v15  ;;  %v1494_v34 = vmul.f32 %v4920_v30, %v1430_v17  ;;  %v1429_v1 = vadd.f32 -0.28449672, %v1365_v59  ;;  %v1304_v31 = vadd.f32 1.4214138, %v1240_v13 }
 0x2fa   : > { %v1239_v39 = vmul.f32 %v4940_v56, %v1175_v54  ;;  %v1940_v47 = vmul.f32 %v4885_v26, %v1620_v27  ;;  %v1555_v6 = vadd.f32 0.2548296, %v1491_v40  ;;  %v1242_v5 = vmul.f32 %v5001_v50, %v1178_v2  ;;  %v5965_v17 = vld [vmem:[#allocation90_spill] sm:$0xff]  ;;  %v5966_v54 = vld [vmem:[#allocation79_spill] sm:$0xff] }
 0x2fb   : > { %v1177_v45 = vadd.f32 -1.4531521, %v1113_v3  ;;  %vm2067_vm5 = vcmp.ge.f32.partialorder %v5961_v36, 0.0  ;;  %v1558_v10 = vadd.f32 0.2548296, %v1494_v34  ;;  %v1493_v32 = vmul.f32 %v4894_v22, %v1429_v1  ;;  %v5967_v2 = vld [vmem:[#allocation82_spill] sm:$0xff] }
 0x2fc   : > { %v1368_v61 = vmul.f32 %v4968_v7, %v1304_v31  ;;  %v1303_v20 = vadd.f32 1.4214138, %v1239_v39  ;;  %vm2070_vm6 = vcmp.ge.f32.partialorder %v5962_v12, 0.0  ;;  %v2004_v18 = vsub.f32 1.0, %v1940_v47  ;;  %v5972_v12 = vld [vmem:[#allocation12_spill] sm:$0xff] }
 0x2fd   : > { %v1619_v19 = vmul.f32 %v4852_v21, %v1555_v6  ;;  %v1306_v58 = vadd.f32 1.4214138, %v1242_v5  ;;  %v1241_v26 = vmul.f32 %v4991_v44, %v1177_v45  ;;  %v1622_v46 = vmul.f32 %v4920_v30, %v1558_v10  ;;  %v5968_v5 = vld [vmem:[#allocation80_spill] sm:$0xff]  ;;  %v5969_v45 = vld [vmem:[#allocation86_spill] sm:$0xff] }
 0x2fe   : > { %v1557_v53 = vadd.f32 0.2548296, %v1493_v32  ;;  %v1432_v42 = vadd.f32 -0.28449672, %v1368_v61  ;;  %v1367_v63 = vmul.f32 %v4940_v56, %v1303_v20  ;;  %vm2069_vm7 = vcmp.ge.f32.partialorder %v5963_v16, 0.0 }
 0x2ff   : > { %v2132_v8 = vsub.f32 0.0, %v2004_v18  ;;  %v1939_v51 = vmul.f32 %v5964_v14, %v1619_v19  ;;  %v1370_v9 = vmul.f32 %v5001_v50, %v1306_v58  ;;  %v1305_v21 = vadd.f32 1.4214138, %v1241_v26  ;;  %v5970_v58 = vld [vmem:[#allocation71_spill] sm:$0xff] }
 0x300   : > { %v1942_v37 = vmul.f32 %v4930_v33, %v1622_v46  ;;  %v1621_v28 = vmul.f32 %v4894_v22, %v1557_v53  ;;  %v1496_v60 = vmul.f32 %v4968_v7, %v1432_v42  ;;  %v1431_v30 = vadd.f32 -0.28449672, %v1367_v63  ;;  %v5971_v63 = vld [vmem:[#allocation93_spill] sm:$0xff] }
 0x301   : > { %v2196_v11 = vsel %vm2068_vm4, %v2004_v18, %v2132_v8  ;;  %v2003_v62 = vsub.f32 1.0, %v1939_v51  ;;  %v1434_v15 = vadd.f32 -0.28449672, %v1370_v9  ;;  %v1369_v49 = vmul.f32 %v4991_v44, %v1305_v21  ;;  %v2475_v9 = vpop.f32.mrb[6].mxu1  ;;  %v5973_v21 = vld [vmem:[#allocation33_spill] sm:$0xff] }
 0x302   : > { %v2260_v25 = vadd.f32 1.0, %v2196_v11  ;;  %v2006_v29 = vsub.f32 1.0, %v1942_v37  ;;  %v1941_v59 = vmul.f32 %v5965_v17, %v1621_v28  ;;  %v1560_v13 = vadd.f32 0.2548296, %v1496_v60 }
 0x303   : > { %vm2072_vm8 = vcmp.ge.f32.partialorder %v5966_v54, 0.0  ;;  %v2131_v33 = vsub.f32 0.0, %v2003_v62  ;;  %v1495_v22 = vmul.f32 %v4940_v56, %v1431_v30  ;;  %v1498_v27 = vmul.f32 %v5001_v50, %v1434_v15  ;;  %v5974_v30 = vld [vmem:[#allocation41_spill] sm:$0xff] }
 0x304   : > { %v1433_v40 = vadd.f32 -0.28449672, %v1369_v49  ;;  %v2324_v43 = vmul.f32 %v2260_v25, %v5967_v2  ;;  %v2134_v3 = vsub.f32 0.0, %v2006_v29  ;;  %v2005_v34 = vsub.f32 1.0, %v1941_v59  ;;  %v5977_v2 = vld [vmem:[#allocation95_spill] sm:$0xff] }
 0x305   : > { %v1624_v1 = vmul.f32 %v4968_v7, %v1560_v13  ;;  %v2195_v31 = vsel %vm2067_vm5, %v2003_v62, %v2131_v33  ;;  %v1559_v39 = vadd.f32 0.2548296, %v1495_v22  ;;  %v1562_v47 = vadd.f32 0.2548296, %v1498_v27  ;;  %v2477_v62 = vpop.f32.mrb[7].mxu1  ;;  %v5976_v27 = vld [vmem:[#allocation49_spill] sm:$0xff] }
 0x306   : > { %v1497_v6 = vmul.f32 %v4991_v44, %v1433_v40  ;;  %vm2071_vm9 = vcmp.ge.f32.partialorder %v5968_v5, 0.0  ;;  %vm2074_vm10 = vcmp.ge.f32.partialorder %v5969_v45, 0.0  ;;  %2568 = vmatprep.mubr.f32.mxu1 %v2324_v43  ;;  %v2259_v10 = vadd.f32 1.0, %v2195_v31  ;;  %v5980_v5 = vld [vmem:[#allocation88_spill] sm:$0xff] }
 0x307   : > { %v2198_v32 = vsel %vm2070_vm6, %v2006_v29, %v2134_v3  ;;  %v2133_v61 = vsub.f32 0.0, %v2005_v34  ;;  %v1944_v20 = vmul.f32 %v4981_v24, %v1624_v1  ;;  %v1623_v36 = vmul.f32 %v4940_v56, %v1559_v39 }
 0x308   : > { %v2262_v7 = vadd.f32 1.0, %v2198_v32  ;;  %v1626_v18 = vmul.f32 %v5001_v50, %v1562_v47  ;;  %v1561_v19 = vadd.f32 0.2548296, %v1497_v6  ;;  %v2323_v26 = vmul.f32 %v2259_v10, %v5970_v58 }
 0x309   : > { %v2197_v46 = vsel %vm2069_vm7, %v2005_v34, %v2133_v61  ;;  %v2008_v53 = vsub.f32 1.0, %v1944_v20  ;;  %v1116_v42 = vmul.f32 1.0614054, %v5052_v35  ;;  %vm2073_vm11 = vcmp.ge.f32.partialorder %v5971_v63, 0.0  ;;  %v5978_v61 = vld [vmem:[#allocation14_spill] sm:$0xff]  ;;  %v5979_v20 = vld [vmem:[#allocation56_spill] sm:$0xff] }
 0x30a   : > { %v2326_v41 = vmul.f32 %v2262_v7, %v5972_v12  ;;  %v2261_v8 = vadd.f32 1.0, %v2197_v46  ;;  %v1943_v24 = vmul.f32 %v4949_v4, %v1623_v36  ;;  %v1946_v56 = vmul.f32 %v5012_v55, %v1626_v18  ;;  %2569 = vmatmul.mubr.f32.gmra.mrb[44].mxu1 %v2323_v26  ;;  %v5975_v55 = vld [vmem:[#allocation92_spill] sm:$0xff]  ;;  %v5981_v18 = vld [vmem:[#allocation89_spill] sm:$0xff] }
 0x30b   : > { %v2136_v50 = vsub.f32 0.0, %v2008_v53  ;;  %v1625_v14 = vmul.f32 %v4991_v44, %v1561_v19  ;;  %v1180_v51 = vadd.f32 -1.4531521, %v1116_v42  ;;  %v1115_v16 = vmul.f32 1.0614054, %v5032_v52 }
 0x30c   : > { %2573 = vmatprep.mubr.f32.mxu1 %v2326_v41  ;;  %v2325_v37 = vmul.f32 %v2261_v8, %v5973_v21  ;;  %v2007_v28 = vsub.f32 1.0, %v1943_v24  ;;  %v2010_v60 = vsub.f32 1.0, %v1946_v56  ;;  %v1118_v11 = vmul.f32 1.0614054, %v5974_v30  ;;  %v5982_v24 = vld [vmem:[#allocation13_spill] sm:$0xff] }
 0x30d   : > { %v2200_v4 = vsel %vm2072_vm8, %v2008_v53, %v2136_v50  ;;  %v1945_v15 = vmul.f32 %v5975_v55, %v1625_v14  ;;  %v1244_v49 = vmul.f32 %v5052_v35, %v1180_v51  ;;  %v1179_v44 = vadd.f32 -1.4531521, %v1115_v16 }
 0x30e   : > { %v2264_v25 = vadd.f32 1.0, %v2200_v4  ;;  %v2135_v29 = vsub.f32 0.0, %v2007_v28  ;;  %v2138_v17 = vsub.f32 0.0, %v2010_v60  ;;  %v1182_v59 = vadd.f32 -1.4531521, %v1118_v11  ;;  %2574 = vmatmul.mubr.f32.gmra.mrb[46].mxu1 %v2325_v37  ;;  %v5983_v4 = vld [vmem:[#allocation15_spill] sm:$0xff] }
 0x30f   : > { %v2009_v13 = vsub.f32 1.0, %v1945_v15  ;;  %v1308_v33 = vadd.f32 1.4214138, %v1244_v49  ;;  %v1243_v22 = vmul.f32 %v5032_v52, %v1179_v44  ;;  %v1117_v40 = vmul.f32 1.0614054, %v5976_v27  ;;  %v2480_v55 = vpop.f32.mrb[8].mxu1 }
 0x310   : > { %v2328_v43 = vmul.f32 %v2264_v25, %v5977_v2  ;;  %v2199_v54 = vsel %vm2071_vm9, %v2007_v28, %v2135_v29  ;;  %v2202_v3 = vsel %vm2074_vm10, %v2010_v60, %v2138_v17  ;;  %v1246_v34 = vmul.f32 %v5974_v30, %v1182_v59  ;;  %v2482_v25 = vpop.f32.mrb[9].mxu1  ;;  %v5984_v29 = vld [vmem:[#allocation32_spill] sm:$0xff]  ;;  %v5985_v59 = vld [vmem:[#allocation18_spill] sm:$0xff] }
 0x311   : > { %v2263_v1 = vadd.f32 1.0, %v2199_v54  ;;  %v2266_v31 = vadd.f32 1.0, %v2202_v3  ;;  %v2137_v39 = vsub.f32 0.0, %v2009_v13  ;;  %v1372_v47 = vmul.f32 %v5052_v35, %v1308_v33 }
 0x312   : > { %2578 = vmatprep.mubr.f32.mxu1 %v2328_v43  ;;  %v1307_v6 = vadd.f32 1.4214138, %v1243_v22  ;;  %v1310_v10 = vadd.f32 1.4214138, %v1246_v34  ;;  %v1181_v32 = vadd.f32 -1.4531521, %v1117_v40  ;;  %v2446_v7 = vadd.f32 %v5979_v20, %v5978_v61 }
 0x313   : > { %v2327_v36 = vmul.f32 %v2263_v1, %v5980_v5  ;;  %v2330_v45 = vmul.f32 %v2266_v31, %v5981_v18  ;;  %v2201_v19 = vsel %vm2073_vm11, %v2009_v13, %v2137_v39  ;;  %v1436_v58 = vadd.f32 -0.28449672, %v1372_v47  ;;  %v5986_v40 = vld [vmem:[#allocation91_spill] sm:$0xff]  ;;  %v5991_v5 = vld [vmem:[#allocation42_spill] sm:$0xff]  ;;  %v5992_v18 = vld [vmem:[#allocation16_spill] sm:$0xff] }
 0x314   : > { %v2265_v26 = vadd.f32 1.0, %v2201_v19  ;;  %v1371_v46 = vmul.f32 %v5032_v52, %v1307_v6  ;;  %v1374_v53 = vmul.f32 %v5974_v30, %v1310_v10  ;;  %v1245_v42 = vmul.f32 %v5976_v27, %v1181_v32  ;;  %2600 = vst [vmem:[%s5045_s10 + $0x8] sm:$0xff] %v2446_v7  ;;  %v5988_v39 = vld [vmem:[#allocation27_spill] sm:$0xff]  ;;  %v5990_v10 = vld [vmem:[#allocation34_spill] sm:$0xff] }
 0x315   : > { %2579 = vmatmul.mubr.f32.gmra.mrb[48].mxu1 %v2327_v36  ;;  %v1500_v12 = vmul.f32 %v5052_v35, %v1436_v58  ;;  %v2451_v41 = vadd.f32 %v5979_v20, %v5115_v0  ;;  %v2456_v63 = vadd.f32 %v5979_v20, %v5151_v23  ;;  %v2461_v8 = vadd.f32 %v5979_v20, %v5188_v38  ;;  %v5989_v6 = vld [vmem:[#allocation87_spill] sm:$0xff] }
 0x316   : > { %2583 = vmatprep.mubr.f32.mxu1 %v2330_v45  ;;  %v2329_v56 = vmul.f32 %v2265_v26, %v5982_v24  ;;  %v1435_v50 = vadd.f32 -0.28449672, %v1371_v46  ;;  %v1438_v14 = vadd.f32 -0.28449672, %v1374_v53  ;;  %v1309_v51 = vadd.f32 1.4214138, %v1245_v42 }
 0x317   : > { %v1564_v16 = vadd.f32 0.2548296, %v1500_v12  ;;  %2601 = vst [vmem:[%s5045_s10 + $0x10] sm:$0xff] %v2451_v41  ;;  %2602 = vst [vmem:[%s5045_s10 + $0x18] sm:$0xff] %v2456_v63  ;;  %v2466_v0 = vadd.f32 %v5979_v20, %v5227_v57  ;;  %v2471_v23 = vadd.f32 %v5979_v20, %v5260_v48  ;;  %v2476_v38 = vadd.f32 %v5979_v20, %v2475_v9  ;;  %v5993_v46 = vld [vmem:[#allocation22_spill] sm:$0xff] }
 0x318   : > { %2603 = vst [vmem:[%s5045_s10 + $0x20] sm:$0xff] %v2461_v8  ;;  %v1499_v21 = vmul.f32 %v5032_v52, %v1435_v50  ;;  %v1502_v37 = vmul.f32 %v5974_v30, %v1438_v14  ;;  %v1373_v28 = vmul.f32 %v5976_v27, %v1309_v51  ;;  %v2481_v44 = vadd.f32 %v5979_v20, %v2480_v55  ;;  %v5367_v12 = vld [vmem:[%s5471_s4] ss:$0 sm:$0xff]  ;;  %v5994_v24 = vld [vmem:[#allocation94_spill] sm:$0xff] }
 0x319   : > { %2584 = vmatmul.mubr.f32.gmra.mrb[50].mxu1 %v2329_v56  ;;  %v1628_v60 = vmul.f32 %v5052_v35, %v1564_v16  ;;  %2604 = vst [vmem:[%s5045_s10 + $0x28] sm:$0xff] %v2466_v0  ;;  %2605 = vst [vmem:[%s5045_s10 + $0x30] sm:$0xff] %v2471_v23  ;;  %vm2076_vm12 = vcmp.ge.f32.partialorder %v5986_v40, 0.0  ;;  %vm2075_vm13 = vcmp.ge.f32.partialorder %v5989_v6, 0.0  ;;  %vm2078_vm14 = vcmp.ge.f32.partialorder %v5990_v10, 0.0 }
 0x31a   : > { %2606 = vst [vmem:[%s5045_s10 + $0x38] sm:$0xff] %v2476_v38  ;;  %v1563_v11 = vadd.f32 0.2548296, %v1499_v21  ;;  %v1566_v57 = vadd.f32 0.2548296, %v1502_v37  ;;  %2607 = vst [vmem:[%s5045_s10 + $0x40] sm:$0xff] %v2481_v44 }
 0x31b   : > { %v1437_v62 = vadd.f32 -0.28449672, %v1373_v28  ;;  %v1948_v48 = vmul.f32 %v5983_v4, %v1628_v60  ;;  %v667_v36 = vmul.f32 0.5, %v5991_v5  ;;  %vm2077_vm15 = vcmp.ge.f32.partialorder %v5993_v46, 0.0 }
 0x31c   : > { %v1627_v9 = vmul.f32 %v5032_v52, %v1563_v11  ;;  %v1630_v15 = vmul.f32 %v5974_v30, %v1566_v57  ;;  %v5987_v30 = vld [vmem:[#allocation21_spill] sm:$0xff]  ;;  %v2485_v26 = vpop.f32.mrb[10].mxu1  ;;  %v669_v56 = vmul.f32 0.5, %v5994_v24 }
 0x31d   : > { %v1501_v49 = vmul.f32 %v5976_v27, %v1437_v62  ;;  %v2012_v35 = vsub.f32 1.0, %v1948_v48  ;;  %v668_v54 = vmul.f32 0.5, %v5987_v30  ;;  %v2486_v41 = vadd.f32 %v5367_v12, %v2485_v26  ;;  %v2487_v63 = vpop.f32.mrb[11].mxu1 }
 0x31e   : > { %v1947_v17 = vmul.f32 %v5984_v29, %v1627_v9  ;;  %v1950_v13 = vmul.f32 %v5985_v59, %v1630_v15 }
 0x31f   : > { %v1565_v33 = vadd.f32 0.2548296, %v1501_v49  ;;  %v2140_v22 = vsub.f32 0.0, %v2012_v35  ;;  %2608 = vst [vmem:[%s5045_s10 + $0x48] sm:$0xff] %v2486_v41 }
 0x320   : > { %v2011_v2 = vsub.f32 1.0, %v1947_v17  ;;  %v2014_v43 = vsub.f32 1.0, %v1950_v13 }
 0x321   : > { %v1629_v52 = vmul.f32 %v5976_v27, %v1565_v33  ;;  %v2204_v3 = vsel %vm2076_vm12, %v2012_v35, %v2140_v22  ;;  %v670_v27 = vmul.f32 0.5, %v5992_v18 }
 0x322   : > { %v2268_v34 = vadd.f32 1.0, %v2204_v3  ;;  %v2139_v1 = vsub.f32 0.0, %v2011_v2  ;;  %v2142_v31 = vsub.f32 0.0, %v2014_v43 }
 0x323   : > { %v1949_v47 = vmul.f32 %v5988_v39, %v1629_v52 }
 0x324   : > { %v2332_v32 = vmul.f32 %v2268_v34, %v668_v54  ;;  %v2203_v61 = vsel %vm2075_vm13, %v2011_v2, %v2139_v1  ;;  %v2206_v20 = vsel %vm2078_vm14, %v2014_v43, %v2142_v31 }
 0x325   : > { %v2013_v7 = vsub.f32 1.0, %v1949_v47  ;;  %v2267_v45 = vadd.f32 1.0, %v2203_v61  ;;  %v2270_v19 = vadd.f32 1.0, %v2206_v20 }
 0x326   : > { %2588 = vmatprep.mubr.f32.mxu1 %v2332_v32 }
 0x327   : > { %v2141_v58 = vsub.f32 0.0, %v2013_v7  ;;  %v2331_v53 = vmul.f32 %v2267_v45, %v667_v36  ;;  %v2334_v42 = vmul.f32 %v2270_v19, %v670_v27 }
 0x329   : > { %v2205_v8 = vsel %vm2077_vm15, %v2013_v7, %v2141_v58  ;;  %2589 = vmatmul.mubr.f32.gmra.mrb[52].mxu1 %v2331_v53 }
 0x32a   : > { %v2269_v50 = vadd.f32 1.0, %v2205_v8  ;;  %2593 = vmatprep.mubr.f32.mxu1 %v2334_v42 }
 0x32b   : > { %v2490_v51 = vpop.f32.mrb[12].mxu1 }
 0x32c   : > { %v2333_v14 = vmul.f32 %v2269_v50, %v669_v56  ;;  %v2491_v16 = vadd.f32 %v5367_v12, %v2490_v51  ;;  %v2492_v0 = vpop.f32.mrb[13].mxu1 }
 0x32e   : > { %2594 = vmatmul.mubr.f32.gmra.mrb[54].mxu1 %v2333_v14  ;;  %2609 = vst [vmem:[%s5045_s10 + $0x50] sm:$0xff] %v2491_v16 }
 0x338   : > { %v2495_v23 = vpop.f32.mrb[14].mxu1 }
 0x339   : > { %v2496_v38 = vadd.f32 %v5367_v12, %v2495_v23  ;;  %v2497_v21 = vpop.f32.mrb[15].mxu1 }
 0x33b   : > { %2610 = vst [vmem:[%s5045_s10 + $0x58] sm:$0xff] %v2496_v38 }
 0x347   : > { %v2500_v37 = vpop.f32.mrb[16].mxu1 }
 0x348   : > { %v2501_v28 = vadd.f32 %v5367_v12, %v2500_v37  ;;  %v2502_v60 = vpop.f32.mrb[17].mxu1 }
 0x34a   : > { %2611 = vst [vmem:[%s5045_s10 + $0x60] sm:$0xff] %v2501_v28 }
 0x354   : > { %v2505_v11 = vpop.f32.mrb[18].mxu1 }
 0x355   : > { %v2506_v57 = vadd.f32 %v5367_v12, %v2505_v11  ;;  %v2507_v62 = vpop.f32.mrb[19].mxu1 }
 0x357   : > { %2612 = vst [vmem:[%s5045_s10 + $0x68] sm:$0xff] %v2506_v57 }
 0x365   : > { %v2510_v4 = vpop.f32.mrb[20].mxu1 }
 0x366   : > { %v2511_v48 = vadd.f32 %v5367_v12, %v2510_v4  ;;  %v2512_v55 = vpop.f32.mrb[21].mxu1 }
 0x368   : > { %2613 = vst [vmem:[%s5045_s10 + $0x70] sm:$0xff] %v2511_v48 }
 0x370   : > { %v2515_v9 = vpop.f32.mrb[22].mxu1 }
 0x371   : > { %v2516_v15 = vadd.f32 %v5367_v12, %v2515_v9  ;;  %v2517_v49 = vpop.f32.mrb[23].mxu1 }
 0x373   : > { %2614 = vst [vmem:[%s5045_s10 + $0x78] sm:$0xff] %v2516_v15 }
 0x37e   : > { %v2520_v44 = vpop.f32.mrb[24].mxu1 }
 0x37f   : > { %v2521_v25 = vadd.f32 %v5367_v12, %v2520_v44  ;;  %v2522_v35 = vpop.f32.mrb[25].mxu1 }
 0x381   : > { %2615 = vst [vmem:[%s5045_s10 + $0x80] sm:$0xff] %v2521_v25 }
 0x38c   : > { %v2525_v29 = vpop.f32.mrb[26].mxu1 }
 0x38d   : > { %v2526_v17 = vadd.f32 %v5367_v12, %v2525_v29  ;;  %v2527_v59 = vpop.f32.mrb[27].mxu1 }
 0x38f   : > { %2616 = vst [vmem:[%s5045_s10 + $0x88] sm:$0xff] %v2526_v17 }
 0x39c   : > { %v2530_v13 = vpop.f32.mrb[28].mxu1 }
 0x39d   : > { %v2531_v33 = vadd.f32 %v5367_v12, %v2530_v13  ;;  %v2532_v22 = vpop.f32.mrb[29].mxu1 }
 0x39f   : > { %2617 = vst [vmem:[%s5045_s10 + $0x90] sm:$0xff] %v2531_v33 }
 0x3a0   : > { %v2535_v40 = vpop.f32.mrb[30].mxu1 }
 0x3a1   : > { %v2536_v2 = vadd.f32 %v5367_v12, %v2535_v40  ;;  %v2537_v43 = vpop.f32.mrb[31].mxu1 }
 0x3a3   : > { %2618 = vst [vmem:[%s5045_s10 + $0x98] sm:$0xff] %v2536_v2 }
 0x3a9   : > { %v2540_v52 = vpop.f32.mrb[32].mxu1 }
 0x3aa   : > { %v2541_v30 = vadd.f32 %v5367_v12, %v2540_v52  ;;  %v2542_v54 = vpop.f32.mrb[33].mxu1 }
 0x3ac   : > { %2619 = vst [vmem:[%s5045_s10 + $0xa0] sm:$0xff] %v2541_v30 }
 0x3ad   : > { %v2545_v3 = vpop.f32.mrb[34].mxu1 }
 0x3ae   : > { %v2546_v34 = vadd.f32 %v5367_v12, %v2545_v3  ;;  %v2547_v1 = vpop.f32.mrb[35].mxu1 }
 0x3b0   : > { %2620 = vst [vmem:[%s5045_s10 + $0xa8] sm:$0xff] %v2546_v34 }
 0x3bc   : > { %v2550_v31 = vpop.f32.mrb[36].mxu1 }
 0x3bd   : > { %v2551_v39 = vadd.f32 %v5367_v12, %v2550_v31  ;;  %v2552_v47 = vpop.f32.mrb[37].mxu1 }
 0x3bf   : > { %2621 = vst [vmem:[%s5045_s10 + $0xb0] sm:$0xff] %v2551_v39 }
 0x3c1   : > { %v2555_v6 = vpop.f32.mrb[38].mxu1 }
 0x3c2   : > { %v2556_v10 = vadd.f32 %v5367_v12, %v2555_v6  ;;  %v2557_v32 = vpop.f32.mrb[39].mxu1 }
 0x3c4   : > { %2622 = vst [vmem:[%s5045_s10 + $0xb8] sm:$0xff] %v2556_v10 }
 0x3c8   : > { %v2560_v61 = vpop.f32.mrb[40].mxu1 }
 0x3c9   : > { %v2561_v20 = vadd.f32 %v5367_v12, %v2560_v61  ;;  %v2562_v7 = vpop.f32.mrb[41].mxu1 }
 0x3cb   : > { %2623 = vst [vmem:[%s5045_s10 + $0xc0] sm:$0xff] %v2561_v20 }
 0x3cc   : > { %v2565_v5 = vpop.f32.mrb[42].mxu1 }
 0x3cd   : > { %v2566_v36 = vadd.f32 %v5367_v12, %v2565_v5  ;;  %v2567_v18 = vpop.f32.mrb[43].mxu1 }
 0x3cf   : > { %2624 = vst [vmem:[%s5045_s10 + $0xc8] sm:$0xff] %v2566_v36 }
 0x3dd   : > { %v2570_v27 = vpop.f32.mrb[44].mxu1 }
 0x3de   : > { %v2571_v45 = vadd.f32 %v5367_v12, %v2570_v27  ;;  %v2572_v19 = vpop.f32.mrb[45].mxu1 }
 0x3e0   : > { %2625 = vst [vmem:[%s5045_s10 + $0xd0] sm:$0xff] %v2571_v45 }
 0x3e1   : > { %v2575_v58 = vpop.f32.mrb[46].mxu1 }
 0x3e2   : > { %v2576_v26 = vadd.f32 %v5367_v12, %v2575_v58  ;;  %v2577_v46 = vpop.f32.mrb[47].mxu1 }
 0x3e4   : > { %2626 = vst [vmem:[%s5045_s10 + $0xd8] sm:$0xff] %v2576_v26 }
 0x3e8   : > { %v2580_v53 = vpop.f32.mrb[48].mxu1 }
 0x3e9   : > { %v2581_v42 = vadd.f32 %v5367_v12, %v2580_v53  ;;  %v2582_v41 = vpop.f32.mrb[49].mxu1 }
 0x3eb   : > { %2627 = vst [vmem:[%s5045_s10 + $0xe0] sm:$0xff] %v2581_v42 }
 0x3ec   : > { %v2585_v63 = vpop.f32.mrb[50].mxu1 }
 0x3ed   : > { %v2586_v8 = vadd.f32 %v5367_v12, %v2585_v63  ;;  %v2587_v24 = vpop.f32.mrb[51].mxu1 }
 0x3ef   : > { %2628 = vst [vmem:[%s5045_s10 + $0xe8] sm:$0xff] %v2586_v8 }
 0x3fc   : > { %v2590_v56 = vpop.f32.mrb[52].mxu1 }
 0x3fd   : > { %v2591_v50 = vadd.f32 %v5367_v12, %v2590_v56  ;;  %v2592_v14 = vpop.f32.mrb[53].mxu1 }
 0x3ff   : > { %2629 = vst [vmem:[%s5045_s10 + $0xf0] sm:$0xff] %v2591_v50 }
 0x401   : > { %v2595_v51 = vpop.f32.mrb[54].mxu1 }
 0x402   : > { %v2596_v16 = vadd.f32 %v5367_v12, %v2595_v51  ;;  %v2597_v0 = vpop.f32.mrb[55].mxu1 }
 0x404   : > { %2630 = vst [vmem:[%s5045_s10 + $0xf8] sm:$0xff] %v2596_v16 }
 0x405   : > { %3301 = shalt.err (!%p3298_p2)
}
 0x406   : > { %s3302_s26 = scalar_lea.hbm %s5419_s7, 4096  ;;  %s3306_s10 = scalar_lea.hbm %s5472_s5, 8192 }
 0x407   : > { %p3303_p13 = scmp.ne.s32.totalorder %s5419_s7, %s3302_s26  ;;  %p3307_p4 = scmp.lt.u32.totalorder %s5419_s7, %s5472_s5 }
 0x408   : > { %p3308_p7 = scmp.lt.u32.totalorder %s3306_s10, %s3302_s26  ;;  %p3310_p11 = scmp.lt.u32.totalorder %s3302_s26, %s5419_s7 }
 0x409   : > { %p3304_p6 = pnand %p3303_p13, %p5995_p0 }
 0x40a   : > { %p3309_p8 = por %p3308_p7, %p3307_p4 }
 0x40b   : > { %p3305_p10 = pneg %p3304_p6 }
 0x40c   : > { %p3311_p1 = por %p3310_p11, %p3309_p8 }
 0x40e   : > { %p3312_p3 = pnand %p3311_p1, %p3305_p10 }
 0x410   : > { %3315 = shalt.err (!%p3312_p3)
}
 0x411   : > { %s3370_s9 = smov 128   ;;  %s3371_s11 = smov 8  }
 0x412   : > { %2880 = dma.vmem_to_hbm [thread:$0]  (%p5995_p0), %s5421_s30, 4096, %s5419_s7, %s2632_s6, %s3370_s9, %s3370_s9, %s3371_s11  }
 0x413 PF: > { %s2660_s23 = sand.u32 1, %s3346_s18   ;;  %p5996_p5 = scmp.ne.s32.totalorder %s5612_s25, 0 }
 0x414   : > { %p5997_p9 = scmp.ge.s32.totalorder %s3358_s21, 2  ;;  %s2661_s8 = scalar_lea.sflag [#allocation4], %s2660_s23 }
 0x416   : > { %p2894_p12 = pnand %p5997_p9, %p5996_p5 }
 0x418   : > { %3341 = dma.done.wait (!%p2894_p12), %s2661_s8, 4096  }
 0x419   : > { %3343 = vsyncadd (!%p2894_p12), %s2661_s8, 4294963200  ;;  %p19_p2 = scmp.ge.s32.totalorder %s3515_s16, 4   ;;  %s5998_s18 = smov %s3350_s19 }
 0x41a   : > { %s5999_s19 = smov %s3354_s20  ;;  %s6000_s20 = smov %s3524_s27 }
 0x41b   : > { %s6001_s21 = smov %s3515_s16  ;;  %21 = sbr.rel (!%p19_p2) target bundleno = 6 (0x6), region = 93 }
 0x422   :  { %2666 = vsyncpa [#allocation3], 1 }
 0x423   :  { %2668 = vsyncpa [#allocation3 + $0x1], 1 }
 0x424   :  { %2669 = vsyncpa [#allocation6], 1 }
 0x425   :  { %2670 = vsyncpa [#allocation4], 1 }
 0x426   :  { %2672 = vsyncpa [#allocation4 + $0x1], 1 }

</bundles_post_ra>
